<compile_context>
chip_gen: v5e
topology: v5e:2x2
jax: 0.10.0
libtpu: 0.0.40
codegen_flags: <defaults>
</compile_context>

<pallas_src>
import jax
import jax.numpy as jnp
from jax.experimental import pallas as pl
from jax.experimental.pallas import tpu as pltpu

INPUT_DIM = 28 * 28            # 784
HIDDEN_DIMS = (512, 256)
LATENT_DIM = 20
LAT_PAD = 128                  # lane-dense latent dim (z @ w3 uses K=128)
TILE_B = 256                   # max batch rows per grid step


def _vae_kernel(x_ref, eps_ref,
                w1_ref, b1_ref, w2_ref, b2_ref,
                wh_ref, bh_ref,
                w3_ref, b3_ref, w4_ref, b4_ref, w5_ref, b5_ref,
                recon_ref, mu_ref, logvar_ref):
    """Whole VAE forward on one (tile_b, 784) batch tile.

    Weights are bf16 (MXU-native); activations are cast to bf16 right before
    each matmul; accumulation and all elementwise math stay f32.
    """
    bf16 = jnp.bfloat16
    f32 = jnp.float32

    x = x_ref[...].astype(bf16)

    # ---- encoder: Linear(784,512)+ReLU, Linear(512,256)+ReLU ----
    h = jnp.dot(x, w1_ref[...], preferred_element_type=f32) + b1_ref[...]
    h = jnp.maximum(h, 0.0).astype(bf16)
    h = jnp.dot(h, w2_ref[...], preferred_element_type=f32) + b2_ref[...]
    h = jnp.maximum(h, 0.0).astype(bf16)

    # ---- fused mu/logvar heads: one (256, 2*128) matmul, slice at lane 128 ----
    head = jnp.dot(h, wh_ref[...], preferred_element_type=f32) + bh_ref[...]
    mu = head[:, :LAT_PAD]          # real values in lanes [0, 20); pad lanes = 0
    logvar = head[:, LAT_PAD:]      # real values in lanes [0, 20); pad lanes = 0

    # ---- reparameterize: z = mu + eps * exp(0.5 * logvar) ----
    # padded lanes: mu=0, logvar=0 -> std=1, eps=0 -> z=0 (and w3 pad rows are 0)
    z = mu + eps_ref[...] * jnp.exp(0.5 * logvar)

    # ---- decoder: Linear(128,256)+ReLU, Linear(256,512)+ReLU, Linear(512,784)+Sigmoid ----
    d = jnp.dot(z.astype(bf16), w3_ref[...], preferred_element_type=f32) + b3_ref[...]
    d = jnp.maximum(d, 0.0).astype(bf16)
    d = jnp.dot(d, w4_ref[...], preferred_element_type=f32) + b4_ref[...]
    d = jnp.maximum(d, 0.0).astype(bf16)
    logits = jnp.dot(d, w5_ref[...], preferred_element_type=f32) + b5_ref[...]
    recon_ref[...] = jax.nn.sigmoid(logits)

    mu_ref[...] = mu
    logvar_ref[...] = logvar


def init_vae_params(key):
    """Unpadded Linear params: (in, out) weights + (1, out) biases (nn.Linear init range)."""
    dims = [(INPUT_DIM, HIDDEN_DIMS[0]), (HIDDEN_DIMS[0], HIDDEN_DIMS[1]),   # encoder
            (HIDDEN_DIMS[1], LATENT_DIM), (HIDDEN_DIMS[1], LATENT_DIM),      # mu / logvar heads
            (LATENT_DIM, HIDDEN_DIMS[1]), (HIDDEN_DIMS[1], HIDDEN_DIMS[0]),  # decoder
            (HIDDEN_DIMS[0], INPUT_DIM)]
    params = []
    for (fan_in, fan_out) in dims:
        key, wk, bk = jax.random.split(key, 3)
        bound = 1.0 / (fan_in ** 0.5)
        w = jax.random.uniform(wk, (fan_in, fan_out), jnp.float32, -bound, bound)
        b = jax.random.uniform(bk, (1, fan_out), jnp.float32, -bound, bound)
        params += [w, b]
    return tuple(params)


def pack_vae_params(params):
    """bf16 weights / f32 biases; mu+logvar heads fused; latent dims padded to 128.

    Call once outside the jitted forward (weights are static across calls)."""
    (w1, b1, w2, b2, wmu, bmu, wlv, blv, w3, b3, w4, b4, w5, b5) = params
    bf16, f32 = jnp.bfloat16, jnp.float32
    h1, h2 = HIDDEN_DIMS

    wh = jnp.zeros((h2, 2 * LAT_PAD), f32)
    wh = wh.at[:, :LATENT_DIM].set(wmu).at[:, LAT_PAD:LAT_PAD + LATENT_DIM].set(wlv)
    bh = jnp.zeros((1, 2 * LAT_PAD), f32)
    bh = bh.at[:, :LATENT_DIM].set(bmu).at[:, LAT_PAD:LAT_PAD + LATENT_DIM].set(blv)
    w3p = jnp.zeros((LAT_PAD, h2), f32).at[:LATENT_DIM, :].set(w3)   # zero pad K rows

    return (w1.astype(bf16), b1,
            w2.astype(bf16), b2,
            wh.astype(bf16), bh,
            w3p.astype(bf16), b3,
            w4.astype(bf16), b4,
            w5.astype(bf16), b5)


def _choose_tile(batch):
    """Sublane-aligned batch tile <= TILE_B; keep >=2 grid steps when the batch
    allows so dimension_semantics=('parallel',) engages both v7x TensorCores."""
    b8 = pl.cdiv(batch, 8) * 8
    tile_b = min(TILE_B, b8)
    if b8 > 8 and b8 // tile_b < 2:
        tile_b = pl.cdiv(b8 // 2, 8) * 8
    b_pad = pl.cdiv(batch, tile_b) * tile_b
    return tile_b, b_pad


@jax.jit
def vae_forward(x, eps, packed):
    """x: (B, 1, 28, 28) float32; eps: (B, LATENT_DIM) float32; packed = pack_vae_params(...)."""
    batch = x.shape[0]
    tile_b, b_pad = _choose_tile(batch)

    x2d = x.reshape(batch, -1).astype(jnp.float32)              # (B, 784) -- free reshape
    if b_pad != batch:
        x2d = jnp.pad(x2d, ((0, b_pad - batch), (0, 0)))        # batch pad only (no feature pad)
    eps_pad = jnp.zeros((b_pad, LAT_PAD), jnp.float32).at[:batch, :LATENT_DIM].set(eps)

    grid = (b_pad // tile_b,)

    x_spec = pl.BlockSpec((tile_b, INPUT_DIM), lambda i: (i, 0))
    eps_spec = pl.BlockSpec((tile_b, LAT_PAD), lambda i: (i, 0))
    # constant-index weight/bias blocks: VMEM-resident, single-buffered
    param_specs = [pl.BlockSpec(p.shape, lambda i: (0, 0), pipeline_mode=pl.Buffered(1))
                   for p in packed]

    # advisory cost estimate for the XLA scheduler
    h1, h2 = HIDDEN_DIMS
    mm_work = (INPUT_DIM * h1 + h1 * h2 + h2 * 2 * LAT_PAD +
               LAT_PAD * h2 + h2 * h1 + h1 * INPUT_DIM)
    param_bytes = sum(int(p.size) * p.dtype.itemsize for p in packed)
    cost = pl.CostEstimate(
        flops=2 * int(b_pad) * mm_work,
        transcendentals=int(b_pad) * (LAT_PAD + INPUT_DIM),
        bytes_accessed=param_bytes + int(b_pad) * (2 * INPUT_DIM + 3 * LAT_PAD) * 4,
    )

    recon_pad, mu_pad, logvar_pad = pl.pallas_call(
        _vae_kernel,
        grid=grid,
        out_shape=(
            jax.ShapeDtypeStruct((b_pad, INPUT_DIM), jnp.float32),
            jax.ShapeDtypeStruct((b_pad, LAT_PAD), jnp.float32),
            jax.ShapeDtypeStruct((b_pad, LAT_PAD), jnp.float32),
        ),
        in_specs=[x_spec, eps_spec] + param_specs,
        out_specs=(
            pl.BlockSpec((tile_b, INPUT_DIM), lambda i: (i, 0)),
            pl.BlockSpec((tile_b, LAT_PAD), lambda i: (i, 0)),
            pl.BlockSpec((tile_b, LAT_PAD), lambda i: (i, 0)),
        ),
        compiler_params=pltpu.CompilerParams(
            dimension_semantics=("parallel",),   # megacore sharding on v7x
            vmem_limit_bytes=32 << 20,           # well above working set; safe on v7x (64 MiB)
        ),
        cost_estimate=cost,
    )(x2d, eps_pad, *packed)

    recon = recon_pad[:batch].reshape(batch, 1, 28, 28)   # batch slice only; reshape is free
    mu = mu_pad[:batch, :LATENT_DIM]
    logvar = logvar_pad[:batch, :LATENT_DIM]
    return recon, mu, logvar


def _reference_forward(x, eps, params):
    """Pure-JAX reference mirroring the kernel's bf16-operand / f32-accumulate matmuls."""
    (w1, b1, w2, b2, wmu, bmu, wlv, blv, w3, b3, w4, b4, w5, b5) = params
    bf16 = jnp.bfloat16

    def mm(a, w):
        return jnp.dot(a.astype(bf16), w.astype(bf16), preferred_element_type=jnp.float32)

    xf = x.reshape(x.shape[0], -1)
    h = jnp.maximum(mm(xf, w1) + b1, 0.0)
    h = jnp.maximum(mm(h, w2) + b2, 0.0)
    mu = mm(h, wmu) + bmu
    logvar = mm(h, wlv) + blv
    z = mu + eps * jnp.exp(0.5 * logvar)
    d = jnp.maximum(mm(z, w3) + b3, 0.0)
    d = jnp.maximum(mm(d, w4) + b4, 0.0)
    recon = jax.nn.sigmoid(mm(d, w5) + b5)
    return recon.reshape(x.shape[0], 1, 28, 28), mu, logvar


if __name__ == "__main__":
    key = jax.random.PRNGKey(0)
    pkey, xkey, ekey = jax.random.split(key, 3)

    params = init_vae_params(pkey)
    packed = pack_vae_params(params)            # one-time packing, outside the jitted forward

    batch = 2
    x = jax.random.uniform(xkey, (batch, 1, 28, 28), jnp.float32)
    eps = jax.random.normal(ekey, (batch, LATENT_DIM), jnp.float32)

    recon, mu, logvar = vae_forward(x, eps, packed)
    jax.block_until_ready((recon, mu, logvar))

    # correctness: compare against a pure-JAX reference that uses the same bf16
    # matmul operands + f32 accumulation (only accumulation-order rounding differs)
    r_ref, mu_ref, lv_ref = _reference_forward(x, eps, params)
    assert recon.shape == (batch, 1, 28, 28)
    assert mu.shape == (batch, LATENT_DIM) and logvar.shape == (batch, LATENT_DIM)
    assert jnp.allclose(recon, r_ref, atol=5e-3, rtol=5e-3)
    assert jnp.allclose(mu, mu_ref, atol=5e-3, rtol=5e-3)
    assert jnp.allclose(logvar, lv_ref, atol=5e-3, rtol=5e-3)

    print("KERNEL_OK")
</pallas_src>

<mosaic_0001>
module attributes {stable_mosaic.version = 11 : i64} {
  func.func @_vae_kernel(%arg0: i32, %arg1: memref<8x784xf32, #tpu.memory_space<vmem>>, %arg2: memref<8x128xf32, #tpu.memory_space<vmem>>, %arg3: memref<784x512xbf16, #tpu.memory_space<vmem>>, %arg4: memref<1x512xf32, #tpu.memory_space<vmem>>, %arg5: memref<512x256xbf16, #tpu.memory_space<vmem>>, %arg6: memref<1x256xf32, #tpu.memory_space<vmem>>, %arg7: memref<256x256xbf16, #tpu.memory_space<vmem>>, %arg8: memref<1x256xf32, #tpu.memory_space<vmem>>, %arg9: memref<128x256xbf16, #tpu.memory_space<vmem>>, %arg10: memref<1x256xf32, #tpu.memory_space<vmem>>, %arg11: memref<256x512xbf16, #tpu.memory_space<vmem>>, %arg12: memref<1x512xf32, #tpu.memory_space<vmem>>, %arg13: memref<512x784xbf16, #tpu.memory_space<vmem>>, %arg14: memref<1x784xf32, #tpu.memory_space<vmem>>, %arg15: memref<8x784xf32, #tpu.memory_space<vmem>>, %arg16: memref<8x128xf32, #tpu.memory_space<vmem>>, %arg17: memref<8x128xf32, #tpu.memory_space<vmem>>) attributes {dimension_semantics = [#tpu.dimension_semantics<parallel>], iteration_bounds = array<i64: 1>, scalar_prefetch = 0 : i64, scratch_operands = 0 : i64, tpu.core_type = #tpu.core_type<tc>, window_params = [{transform_indices = @transform_0, window_bounds = array<i64: 8, 784>}, {transform_indices = @transform_1, window_bounds = array<i64: 8, 128>}, {pipeline_mode = #tpu.pipeline_mode<synchronous>, transform_indices = @transform_2, window_bounds = array<i64: 784, 512>}, {pipeline_mode = #tpu.pipeline_mode<synchronous>, transform_indices = @transform_3, window_bounds = array<i64: 1, 512>}, {pipeline_mode = #tpu.pipeline_mode<synchronous>, transform_indices = @transform_4, window_bounds = array<i64: 512, 256>}, {pipeline_mode = #tpu.pipeline_mode<synchronous>, transform_indices = @transform_5, window_bounds = array<i64: 1, 256>}, {pipeline_mode = #tpu.pipeline_mode<synchronous>, transform_indices = @transform_6, window_bounds = array<i64: 256, 256>}, {pipeline_mode = #tpu.pipeline_mode<synchronous>, transform_indices = @transform_7, window_bounds = array<i64: 1, 256>}, {pipeline_mode = #tpu.pipeline_mode<synchronous>, transform_indices = @transform_8, window_bounds = array<i64: 128, 256>}, {pipeline_mode = #tpu.pipeline_mode<synchronous>, transform_indices = @transform_9, window_bounds = array<i64: 1, 256>}, {pipeline_mode = #tpu.pipeline_mode<synchronous>, transform_indices = @transform_10, window_bounds = array<i64: 256, 512>}, {pipeline_mode = #tpu.pipeline_mode<synchronous>, transform_indices = @transform_11, window_bounds = array<i64: 1, 512>}, {pipeline_mode = #tpu.pipeline_mode<synchronous>, transform_indices = @transform_12, window_bounds = array<i64: 512, 784>}, {pipeline_mode = #tpu.pipeline_mode<synchronous>, transform_indices = @transform_13, window_bounds = array<i64: 1, 784>}, {transform_indices = @transform_14, window_bounds = array<i64: 8, 784>}, {transform_indices = @transform_15, window_bounds = array<i64: 8, 128>}, {transform_indices = @transform_16, window_bounds = array<i64: 8, 128>}]} {
    %c0 = arith.constant 0 : index
    %c0_0 = arith.constant 0 : index
    %0 = vector.load %arg1[%c0, %c0_0] : memref<8x784xf32, #tpu.memory_space<vmem>>, vector<8x784xf32>
    %1 = arith.truncf %0 : vector<8x784xf32> to vector<8x784xbf16>
    %c0_1 = arith.constant 0 : index
    %c0_2 = arith.constant 0 : index
    %2 = vector.load %arg3[%c0_1, %c0_2] : memref<784x512xbf16, #tpu.memory_space<vmem>>, vector<784x512xbf16>
    %cst = arith.constant dense<0.000000e+00> : vector<8x512xf32>
    %3 = tpu.matmul %1, %2, %cst {dimension_numbers = #tpu.dot_dimension_numbers<[1], [0], [0], [1], [0, 0, 1, 1], [], []>} : vector<8x784xbf16>, vector<784x512xbf16>, vector<8x512xf32> -> vector<8x512xf32>
    %c0_3 = arith.constant 0 : index
    %c0_4 = arith.constant 0 : index
    %4 = vector.load %arg4[%c0_3, %c0_4] : memref<1x512xf32, #tpu.memory_space<vmem>>, vector<1x512xf32>
    %5 = vector.broadcast %4 : vector<1x512xf32> to vector<8x512xf32>
    %6 = arith.addf %3, %5 : vector<8x512xf32>
    %cst_5 = arith.constant 0.000000e+00 : f32
    %7 = vector.broadcast %cst_5 : f32 to vector<8x512xf32>
    %8 = arith.maximumf %6, %7 : vector<8x512xf32>
    %9 = arith.truncf %8 : vector<8x512xf32> to vector<8x512xbf16>
    %c0_6 = arith.constant 0 : index
    %c0_7 = arith.constant 0 : index
    %10 = vector.load %arg5[%c0_6, %c0_7] : memref<512x256xbf16, #tpu.memory_space<vmem>>, vector<512x256xbf16>
    %cst_8 = arith.constant dense<0.000000e+00> : vector<8x256xf32>
    %11 = tpu.matmul %9, %10, %cst_8 {dimension_numbers = #tpu.dot_dimension_numbers<[1], [0], [0], [1], [0, 0, 1, 1], [], []>} : vector<8x512xbf16>, vector<512x256xbf16>, vector<8x256xf32> -> vector<8x256xf32>
    %c0_9 = arith.constant 0 : index
    %c0_10 = arith.constant 0 : index
    %12 = vector.load %arg6[%c0_9, %c0_10] : memref<1x256xf32, #tpu.memory_space<vmem>>, vector<1x256xf32>
    %13 = vector.broadcast %12 : vector<1x256xf32> to vector<8x256xf32>
    %14 = arith.addf %11, %13 : vector<8x256xf32>
    %cst_11 = arith.constant 0.000000e+00 : f32
    %15 = vector.broadcast %cst_11 : f32 to vector<8x256xf32>
    %16 = arith.maximumf %14, %15 : vector<8x256xf32>
    %17 = arith.truncf %16 : vector<8x256xf32> to vector<8x256xbf16>
    %c0_12 = arith.constant 0 : index
    %c0_13 = arith.constant 0 : index
    %18 = vector.load %arg7[%c0_12, %c0_13] : memref<256x256xbf16, #tpu.memory_space<vmem>>, vector<256x256xbf16>
    %cst_14 = arith.constant dense<0.000000e+00> : vector<8x256xf32>
    %19 = tpu.matmul %17, %18, %cst_14 {dimension_numbers = #tpu.dot_dimension_numbers<[1], [0], [0], [1], [0, 0, 1, 1], [], []>} : vector<8x256xbf16>, vector<256x256xbf16>, vector<8x256xf32> -> vector<8x256xf32>
    %c0_15 = arith.constant 0 : index
    %c0_16 = arith.constant 0 : index
    %20 = vector.load %arg8[%c0_15, %c0_16] : memref<1x256xf32, #tpu.memory_space<vmem>>, vector<1x256xf32>
    %21 = vector.broadcast %20 : vector<1x256xf32> to vector<8x256xf32>
    %22 = arith.addf %19, %21 : vector<8x256xf32>
    %23 = vector.extract_strided_slice %22 {offsets = [0, 0], sizes = [8, 128], strides = [1, 1]} : vector<8x256xf32> to vector<8x128xf32>
    %24 = vector.extract_strided_slice %22 {offsets = [0, 128], sizes = [8, 128], strides = [1, 1]} : vector<8x256xf32> to vector<8x128xf32>
    %c0_17 = arith.constant 0 : index
    %c0_18 = arith.constant 0 : index
    %25 = vector.load %arg2[%c0_17, %c0_18] : memref<8x128xf32, #tpu.memory_space<vmem>>, vector<8x128xf32>
    %cst_19 = arith.constant 5.000000e-01 : f32
    %26 = vector.broadcast %cst_19 : f32 to vector<8x128xf32>
    %27 = arith.mulf %26, %24 : vector<8x128xf32>
    %28 = math.exp %27 : vector<8x128xf32>
    %29 = arith.mulf %25, %28 : vector<8x128xf32>
    %30 = arith.addf %23, %29 : vector<8x128xf32>
    %31 = arith.truncf %30 : vector<8x128xf32> to vector<8x128xbf16>
    %c0_20 = arith.constant 0 : index
    %c0_21 = arith.constant 0 : index
    %32 = vector.load %arg9[%c0_20, %c0_21] : memref<128x256xbf16, #tpu.memory_space<vmem>>, vector<128x256xbf16>
    %cst_22 = arith.constant dense<0.000000e+00> : vector<8x256xf32>
    %33 = tpu.matmul %31, %32, %cst_22 {dimension_numbers = #tpu.dot_dimension_numbers<[1], [0], [0], [1], [0, 0, 1, 1], [], []>} : vector<8x128xbf16>, vector<128x256xbf16>, vector<8x256xf32> -> vector<8x256xf32>
    %c0_23 = arith.constant 0 : index
    %c0_24 = arith.constant 0 : index
    %34 = vector.load %arg10[%c0_23, %c0_24] : memref<1x256xf32, #tpu.memory_space<vmem>>, vector<1x256xf32>
    %35 = vector.broadcast %34 : vector<1x256xf32> to vector<8x256xf32>
    %36 = arith.addf %33, %35 : vector<8x256xf32>
    %cst_25 = arith.constant 0.000000e+00 : f32
    %37 = vector.broadcast %cst_25 : f32 to vector<8x256xf32>
    %38 = arith.maximumf %36, %37 : vector<8x256xf32>
    %39 = arith.truncf %38 : vector<8x256xf32> to vector<8x256xbf16>
    %c0_26 = arith.constant 0 : index
    %c0_27 = arith.constant 0 : index
    %40 = vector.load %arg11[%c0_26, %c0_27] : memref<256x512xbf16, #tpu.memory_space<vmem>>, vector<256x512xbf16>
    %cst_28 = arith.constant dense<0.000000e+00> : vector<8x512xf32>
    %41 = tpu.matmul %39, %40, %cst_28 {dimension_numbers = #tpu.dot_dimension_numbers<[1], [0], [0], [1], [0, 0, 1, 1], [], []>} : vector<8x256xbf16>, vector<256x512xbf16>, vector<8x512xf32> -> vector<8x512xf32>
    %c0_29 = arith.constant 0 : index
    %c0_30 = arith.constant 0 : index
    %42 = vector.load %arg12[%c0_29, %c0_30] : memref<1x512xf32, #tpu.memory_space<vmem>>, vector<1x512xf32>
    %43 = vector.broadcast %42 : vector<1x512xf32> to vector<8x512xf32>
    %44 = arith.addf %41, %43 : vector<8x512xf32>
    %cst_31 = arith.constant 0.000000e+00 : f32
    %45 = vector.broadcast %cst_31 : f32 to vector<8x512xf32>
    %46 = arith.maximumf %44, %45 : vector<8x512xf32>
    %47 = arith.truncf %46 : vector<8x512xf32> to vector<8x512xbf16>
    %c0_32 = arith.constant 0 : index
    %c0_33 = arith.constant 0 : index
    %48 = vector.load %arg13[%c0_32, %c0_33] : memref<512x784xbf16, #tpu.memory_space<vmem>>, vector<512x784xbf16>
    %cst_34 = arith.constant dense<0.000000e+00> : vector<8x784xf32>
    %49 = tpu.matmul %47, %48, %cst_34 {dimension_numbers = #tpu.dot_dimension_numbers<[1], [0], [0], [1], [0, 0, 1, 1], [], []>} : vector<8x512xbf16>, vector<512x784xbf16>, vector<8x784xf32> -> vector<8x784xf32>
    %c0_35 = arith.constant 0 : index
    %c0_36 = arith.constant 0 : index
    %50 = vector.load %arg14[%c0_35, %c0_36] : memref<1x784xf32, #tpu.memory_space<vmem>>, vector<1x784xf32>
    %51 = vector.broadcast %50 : vector<1x784xf32> to vector<8x784xf32>
    %52 = arith.addf %49, %51 : vector<8x784xf32>
    %53 = arith.negf %52 : vector<8x784xf32>
    %54 = math.exp %53 : vector<8x784xf32>
    %cst_37 = arith.constant 1.000000e+00 : f32
    %55 = vector.broadcast %cst_37 : f32 to vector<8x784xf32>
    %56 = arith.addf %55, %54 : vector<8x784xf32>
    %57 = arith.divf %55, %56 : vector<8x784xf32>
    %c0_38 = arith.constant 0 : index
    %c0_39 = arith.constant 0 : index
    %58 = vector.load %arg15[%c0_38, %c0_39] : memref<8x784xf32, #tpu.memory_space<vmem>>, vector<8x784xf32>
    tpu.vector_store %arg15[%c0_38, %c0_39], %57 {strides = array<i32>} : memref<8x784xf32, #tpu.memory_space<vmem>>, vector<8x784xf32>,
    %c0_40 = arith.constant 0 : index
    %c0_41 = arith.constant 0 : index
    %59 = vector.load %arg16[%c0_40, %c0_41] : memref<8x128xf32, #tpu.memory_space<vmem>>, vector<8x128xf32>
    tpu.vector_store %arg16[%c0_40, %c0_41], %23 {strides = array<i32>} : memref<8x128xf32, #tpu.memory_space<vmem>>, vector<8x128xf32>,
    %c0_42 = arith.constant 0 : index
    %c0_43 = arith.constant 0 : index
    %60 = vector.load %arg17[%c0_42, %c0_43] : memref<8x128xf32, #tpu.memory_space<vmem>>, vector<8x128xf32>
    tpu.vector_store %arg17[%c0_42, %c0_43], %24 {strides = array<i32>} : memref<8x128xf32, #tpu.memory_space<vmem>>, vector<8x128xf32>,
    return
  }
  func.func @transform_0(%arg0: i32) -> (i32, i32) {
    %c0_i32 = arith.constant 0 : i32
    %c0_i32_0 = arith.constant 0 : i32
    return %arg0, %c0_i32 : i32, i32
  }
  func.func @transform_1(%arg0: i32) -> (i32, i32) {
    %c0_i32 = arith.constant 0 : i32
    %c0_i32_0 = arith.constant 0 : i32
    return %arg0, %c0_i32 : i32, i32
  }
  func.func @transform_2(%arg0: i32) -> (i32, i32) {
    %c0_i32 = arith.constant 0 : i32
    %c0_i32_0 = arith.constant 0 : i32
    %c0_i32_1 = arith.constant 0 : i32
    return %c0_i32, %c0_i32_0 : i32, i32
  }
  func.func @transform_3(%arg0: i32) -> (i32, i32) {
    %c0_i32 = arith.constant 0 : i32
    %c0_i32_0 = arith.constant 0 : i32
    %c0_i32_1 = arith.constant 0 : i32
    return %c0_i32, %c0_i32_0 : i32, i32
  }
  func.func @transform_4(%arg0: i32) -> (i32, i32) {
    %c0_i32 = arith.constant 0 : i32
    %c0_i32_0 = arith.constant 0 : i32
    %c0_i32_1 = arith.constant 0 : i32
    return %c0_i32, %c0_i32_0 : i32, i32
  }
  func.func @transform_5(%arg0: i32) -> (i32, i32) {
    %c0_i32 = arith.constant 0 : i32
    %c0_i32_0 = arith.constant 0 : i32
    %c0_i32_1 = arith.constant 0 : i32
    return %c0_i32, %c0_i32_0 : i32, i32
  }
  func.func @transform_6(%arg0: i32) -> (i32, i32) {
    %c0_i32 = arith.constant 0 : i32
    %c0_i32_0 = arith.constant 0 : i32
    %c0_i32_1 = arith.constant 0 : i32
    return %c0_i32, %c0_i32_0 : i32, i32
  }
  func.func @transform_7(%arg0: i32) -> (i32, i32) {
    %c0_i32 = arith.constant 0 : i32
    %c0_i32_0 = arith.constant 0 : i32
    %c0_i32_1 = arith.constant 0 : i32
    return %c0_i32, %c0_i32_0 : i32, i32
  }
  func.func @transform_8(%arg0: i32) -> (i32, i32) {
    %c0_i32 = arith.constant 0 : i32
    %c0_i32_0 = arith.constant 0 : i32
    %c0_i32_1 = arith.constant 0 : i32
    return %c0_i32, %c0_i32_0 : i32, i32
  }
  func.func @transform_9(%arg0: i32) -> (i32, i32) {
    %c0_i32 = arith.constant 0 : i32
    %c0_i32_0 = arith.constant 0 : i32
    %c0_i32_1 = arith.constant 0 : i32
    return %c0_i32, %c0_i32_0 : i32, i32
  }
  func.func @transform_10(%arg0: i32) -> (i32, i32) {
    %c0_i32 = arith.constant 0 : i32
    %c0_i32_0 = arith.constant 0 : i32
    %c0_i32_1 = arith.constant 0 : i32
    return %c0_i32, %c0_i32_0 : i32, i32
  }
  func.func @transform_11(%arg0: i32) -> (i32, i32) {
    %c0_i32 = arith.constant 0 : i32
    %c0_i32_0 = arith.constant 0 : i32
    %c0_i32_1 = arith.constant 0 : i32
    return %c0_i32, %c0_i32_0 : i32, i32
  }
  func.func @transform_12(%arg0: i32) -> (i32, i32) {
    %c0_i32 = arith.constant 0 : i32
    %c0_i32_0 = arith.constant 0 : i32
    %c0_i32_1 = arith.constant 0 : i32
    return %c0_i32, %c0_i32_0 : i32, i32
  }
  func.func @transform_13(%arg0: i32) -> (i32, i32) {
    %c0_i32 = arith.constant 0 : i32
    %c0_i32_0 = arith.constant 0 : i32
    %c0_i32_1 = arith.constant 0 : i32
    return %c0_i32, %c0_i32_0 : i32, i32
  }
  func.func @transform_14(%arg0: i32) -> (i32, i32) {
    %c0_i32 = arith.constant 0 : i32
    %c0_i32_0 = arith.constant 0 : i32
    return %arg0, %c0_i32 : i32, i32
  }
  func.func @transform_15(%arg0: i32) -> (i32, i32) {
    %c0_i32 = arith.constant 0 : i32
    %c0_i32_0 = arith.constant 0 : i32
    return %arg0, %c0_i32 : i32, i32
  }
  func.func @transform_16(%arg0: i32) -> (i32, i32) {
    %c0_i32 = arith.constant 0 : i32
    %c0_i32_0 = arith.constant 0 : i32
    return %arg0, %c0_i32 : i32, i32
  }
}

</mosaic_0001>

<bundles_post_ra>
// kernel: vae_forward.1
= control target key start
LH: loop header
LB: loop body
LE: loop exit
PB: predicated region body
PF: predicated region fallthrough
CT: control target
= control target key end

     0   :  { %vm1251_vm0 = vcmask 130048   ;;  %s11858_s2 = inlined_call_operand.vmem [shape: bf16[784,512], index: 2, kind: input, shape index: {}]   ;;  %s11859_s0 = inlined_call_operand.vmem [shape: f32[8,784], index: 0, kind: input, shape index: {}]   ;;  %s11860_s3 = inlined_call_operand.vmem [shape: f32[1,512], index: 3, kind: input, shape index: {}]   ;;  %s11861_s4 = inlined_call_operand.vmem [shape: bf16[512,256], index: 4, kind: input, shape index: {}]   ;;  %s11862_s5 = inlined_call_operand.vmem [shape: f32[1,256], index: 5, kind: input, shape index: {}]   ;;  %s11863_s6 = inlined_call_operand.vmem [shape: bf16[256,256], index: 6, kind: input, shape index: {}]   ;;  %s11864_s8 = inlined_call_operand.vmem [shape: bf16[128,256], index: 8, kind: input, shape index: {}]   ;;  %s11865_s10 = inlined_call_operand.vmem [shape: bf16[256,512], index: 10, kind: input, shape index: {}]   ;;  %s11866_s7 = inlined_call_operand.vmem [shape: f32[1,256], index: 7, kind: input, shape index: {}]   ;;  %s11867_s15 = inlined_call_operand.vmem [shape: f32[8,128], index: 15, kind: output, shape index: {1}]   ;;  %s11868_s16 = inlined_call_operand.vmem [shape: f32[8,128], index: 16, kind: output, shape index: {2}]   ;;  %s11869_s1 = inlined_call_operand.vmem [shape: f32[8,128], index: 1, kind: input, shape index: {}]   ;;  %s11870_s9 = inlined_call_operand.vmem [shape: f32[1,256], index: 9, kind: input, shape index: {}]   ;;  %s11871_s12 = inlined_call_operand.vmem [shape: bf16[512,784], index: 12, kind: input, shape index: {}]   ;;  %s11872_s11 = inlined_call_operand.vmem [shape: f32[1,512], index: 11, kind: input, shape index: {}]   ;;  %s11873_s13 = inlined_call_operand.vmem [shape: f32[1,784], index: 13, kind: input, shape index: {}]   ;;  %s11874_s14 = inlined_call_operand.vmem [shape: f32[8,784], index: 14, kind: output, shape index: {0}]  }
   0x1   :  { %11876 = sst [smem:[#allocation2_spill]] %s11858_s2 }
   0x2   :  { %s11877_s23 = sld [smem:[#allocation2_spill]] }
   0x8   :  { %v5076_v0 = vld [vmem:[%s11877_s23 + $0xe0] sm:$0xf]  ;;  %v7387_v1 = vld [vmem:[%s11877_s23 + $0xec] sm:$0xf0] }
   0x9   :  { %v5204_v2 = vld [vmem:[%s11877_s23 + $0x1e0] sm:$0xf]  ;;  %v5077_v3 = vor.u32 %v7387_v1, %v5076_v0  ;;  %v7419_v4 = vld [vmem:[%s11877_s23 + $0x1ec] sm:$0xf0] }
   0xa   :  { %v5332_v5 = vld [vmem:[%s11877_s23 + $0x2e0] sm:$0xf]  ;;  %v7451_v6 = vld [vmem:[%s11877_s23 + $0x2ec] sm:$0xf0]  ;;  %v5205_v7 = vor.u32 %v7419_v4, %v5204_v2 }
   0xb   :  { %v5333_v8 = vor.u32 %v7451_v6, %v5332_v5  ;;  %v5460_v9 = vld [vmem:[%s11877_s23 + $0x3e0] sm:$0xf]  ;;  %v7483_v10 = vld [vmem:[%s11877_s23 + $0x3ec] sm:$0xf0]  ;;  %1255 = vmatpush.bf16.msra.mxu0 %v5077_v3 }
   0xc   :  { %v5060_v11 = vld [vmem:[%s11877_s23 + $0xc0] sm:$0xf]  ;;  %v5461_v12 = vor.u32 %v7483_v10, %v5460_v9  ;;  %v7383_v13 = vld [vmem:[%s11877_s23 + $0xcc] sm:$0xf0]  ;;  %1268 = vmatpush.bf16.msra.mxu1 %v5205_v7 }
   0xd   :  { %v5188_v14 = vld [vmem:[%s11877_s23 + $0x1c0] sm:$0xf]  ;;  %v7415_v15 = vld [vmem:[%s11877_s23 + $0x1cc] sm:$0xf0]  ;;  %1281 = vmatpush.bf16.msra.mxu2 %v5333_v8  ;;  %v5061_v16 = vor.u32 %v7383_v13, %v5060_v11 }
   0xe   :  { %v5189_v17 = vor.u32 %v7415_v15, %v5188_v14  ;;  %v5316_v18 = vld [vmem:[%s11877_s23 + $0x2c0] sm:$0xf]  ;;  %v7447_v19 = vld [vmem:[%s11877_s23 + $0x2cc] sm:$0xf0]  ;;  %1294 = vmatpush.bf16.msra.mxu3 %v5461_v12 }
   0xf   :  { %v5444_v20 = vld [vmem:[%s11877_s23 + $0x3c0] sm:$0xf]  ;;  %v5317_v21 = vor.u32 %v7447_v19, %v5316_v18  ;;  %v7479_v22 = vld [vmem:[%s11877_s23 + $0x3cc] sm:$0xf0]  ;;  %1256 = vmatpush.bf16.msra.mxu0 %v5061_v16 }
  0x10   :  { %v5044_v23 = vld [vmem:[%s11877_s23 + $0xa0] sm:$0xf]  ;;  %v7379_v24 = vld [vmem:[%s11877_s23 + $0xac] sm:$0xf0]  ;;  %v5445_v25 = vor.u32 %v7479_v22, %v5444_v20  ;;  %1269 = vmatpush.bf16.msra.mxu1 %v5189_v17 }
  0x11   :  { %v5172_v26 = vld [vmem:[%s11877_s23 + $0x1a0] sm:$0xf]  ;;  %v7411_v27 = vld [vmem:[%s11877_s23 + $0x1ac] sm:$0xf0]  ;;  %v5045_v29 = vor.u32 %v7379_v24, %v5044_v23  ;;  %1282 = vmatpush.bf16.msra.mxu2 %v5317_v21 }
  0x12   :  { %v5300_v28 = vld [vmem:[%s11877_s23 + $0x2a0] sm:$0xf]  ;;  %v7443_v30 = vld [vmem:[%s11877_s23 + $0x2ac] sm:$0xf0]  ;;  %v5173_v33 = vor.u32 %v7411_v27, %v5172_v26  ;;  %1295 = vmatpush.bf16.msra.mxu3 %v5445_v25 }
  0x13   :  { %v5428_v31 = vld [vmem:[%s11877_s23 + $0x3a0] sm:$0xf]  ;;  %v7475_v32 = vld [vmem:[%s11877_s23 + $0x3ac] sm:$0xf0]  ;;  %v5301_v34 = vor.u32 %v7443_v30, %v5300_v28  ;;  %1257 = vmatpush.bf16.msra.mxu0 %v5045_v29 }
  0x14   :  { %v5028_v35 = vld [vmem:[%s11877_s23 + $0x80] sm:$0xf]  ;;  %v7375_v36 = vld [vmem:[%s11877_s23 + $0x8c] sm:$0xf0]  ;;  %v5429_v38 = vor.u32 %v7475_v32, %v5428_v31  ;;  %1270 = vmatpush.bf16.msra.mxu1 %v5173_v33  ;;  %v7385_v33 = vld [vmem:[%s11877_s23 + $0xe4] sm:$0xf] }
  0x15   :  { %v5156_v37 = vld [vmem:[%s11877_s23 + $0x180] sm:$0xf]  ;;  %v7407_v39 = vld [vmem:[%s11877_s23 + $0x18c] sm:$0xf0]  ;;  %v5029_v44 = vor.u32 %v7375_v36, %v5028_v35  ;;  %1283 = vmatpush.bf16.msra.mxu2 %v5301_v34  ;;  %v5078_v34 = vld [vmem:[%s11877_s23 + $0xf0] sm:$0xf0] }
  0x16   :  { %v5284_v40 = vld [vmem:[%s11877_s23 + $0x280] sm:$0xf]  ;;  %v7439_v41 = vld [vmem:[%s11877_s23 + $0x28c] sm:$0xf0]  ;;  %v5157_v45 = vor.u32 %v7407_v39, %v5156_v37  ;;  %1296 = vmatpush.bf16.msra.mxu3 %v5429_v38 }
  0x17   :  { %v5412_v42 = vld [vmem:[%s11877_s23 + $0x380] sm:$0xf]  ;;  %v7471_v43 = vld [vmem:[%s11877_s23 + $0x38c] sm:$0xf0]  ;;  %v5285_v46 = vor.u32 %v7439_v41, %v5284_v40  ;;  %1258 = vmatpush.bf16.msra.mxu0 %v5029_v44  ;;  %v5206_v44 = vld [vmem:[%s11877_s23 + $0x1f0] sm:$0xf0] }
  0x18   :  { %v5012_v47 = vld [vmem:[%s11877_s23 + $0x60] sm:$0xf]  ;;  %v7371_v48 = vld [vmem:[%s11877_s23 + $0x6c] sm:$0xf0]  ;;  %v5413_v50 = vor.u32 %v7471_v43, %v5412_v42  ;;  %1271 = vmatpush.bf16.msra.mxu1 %v5157_v45  ;;  %v7417_v43 = vld [vmem:[%s11877_s23 + $0x1e4] sm:$0xf] }
  0x19   :  { %v5140_v49 = vld [vmem:[%s11877_s23 + $0x160] sm:$0xf]  ;;  %v7403_v51 = vld [vmem:[%s11877_s23 + $0x16c] sm:$0xf0]  ;;  %v5013_v56 = vor.u32 %v7371_v48, %v5012_v47  ;;  %1284 = vmatpush.bf16.msra.mxu2 %v5285_v46  ;;  %v54_v45 = vld [vmem:[%s11859_s0 + $0x18] sm:$0xff]  ;;  %v5081_v47 = vor.u32 %v7385_v33, %v5078_v34 }
  0x1a   :  { %v5268_v52 = vld [vmem:[%s11877_s23 + $0x260] sm:$0xf]  ;;  %v7435_v53 = vld [vmem:[%s11877_s23 + $0x26c] sm:$0xf0]  ;;  %v5141_v57 = vor.u32 %v7403_v51, %v5140_v49  ;;  %1297 = vmatpush.bf16.msra.mxu3 %v5413_v50 }
  0x1b   :  { %v5396_v54 = vld [vmem:[%s11877_s23 + $0x360] sm:$0xf]  ;;  %v7467_v55 = vld [vmem:[%s11877_s23 + $0x36c] sm:$0xf0]  ;;  %v5269_v58 = vor.u32 %v7435_v53, %v5268_v52  ;;  %1259 = vmatpush.bf16.msra.mxu0 %v5013_v56  ;;  %v7381_v53 = vld [vmem:[%s11877_s23 + $0xc4] sm:$0xf] }
  0x1c   :  { %v4996_v59 = vld [vmem:[%s11877_s23 + $0x40] sm:$0xf]  ;;  %v7367_v60 = vld [vmem:[%s11877_s23 + $0x4c] sm:$0xf0]  ;;  %v5397_v62 = vor.u32 %v7467_v55, %v5396_v54  ;;  %1272 = vmatpush.bf16.msra.mxu1 %v5141_v57  ;;  %v5062_v54 = vld [vmem:[%s11877_s23 + $0xd0] sm:$0xf0]  ;;  %v8321_v57 = vpack.c.bf16 %v54_v45, %v54_v45 }
  0x1d   :  { %v5124_v61 = vld [vmem:[%s11877_s23 + $0x140] sm:$0xf]  ;;  %v7399_v63 = vld [vmem:[%s11877_s23 + $0x14c] sm:$0xf0]  ;;  %v4997_v4 = vor.u32 %v7367_v60, %v4996_v59  ;;  %1285 = vmatpush.bf16.msra.mxu2 %v5269_v58  ;;  %v52_v58 = vld [vmem:[%s11859_s0 + $0x8] sm:$0xff]  ;;  %v5209_v59 = vor.u32 %v7417_v43, %v5206_v44 }
  0x1e   :  { %v5252_v0 = vld [vmem:[%s11877_s23 + $0x240] sm:$0xf]  ;;  %v7431_v1 = vld [vmem:[%s11877_s23 + $0x24c] sm:$0xf0]  ;;  %v5125_v5 = vor.u32 %v7399_v63, %v5124_v61  ;;  %1298 = vmatpush.bf16.msra.mxu3 %v5397_v62  ;;  %v7413_v61 = vld [vmem:[%s11877_s23 + $0x1c4] sm:$0xf] }
  0x1f   :  { %v5380_v2 = vld [vmem:[%s11877_s23 + $0x340] sm:$0xf]  ;;  %v7463_v3 = vld [vmem:[%s11877_s23 + $0x34c] sm:$0xf0]  ;;  %v5253_v6 = vor.u32 %v7431_v1, %v5252_v0  ;;  %1260 = vmatpush.bf16.msra.mxu0 %v4997_v4  ;;  %v5190_v62 = vld [vmem:[%s11877_s23 + $0x1d0] sm:$0xf0]  ;;  %v5065_v0 = vor.u32 %v7381_v53, %v5062_v54  ;;  %v8343_v4 = vpack.c.bf16 %v52_v58, %v52_v58 }
  0x20   :  { %v4980_v7 = vld [vmem:[%s11877_s23 + $0x20] sm:$0xf]  ;;  %v7363_v8 = vld [vmem:[%s11877_s23 + $0x2c] sm:$0xf0]  ;;  %v5381_v10 = vor.u32 %v7463_v3, %v5380_v2  ;;  %1273 = vmatpush.bf16.msra.mxu1 %v5125_v5  ;;  %v7365_v43 = vld [vmem:[%s11877_s23 + $0x44] sm:$0xf] }
  0x21   :  { %v5108_v9 = vld [vmem:[%s11877_s23 + $0x120] sm:$0xf]  ;;  %v7395_v11 = vld [vmem:[%s11877_s23 + $0x12c] sm:$0xf0]  ;;  %v4981_v16 = vor.u32 %v7363_v8, %v4980_v7  ;;  %1286 = vmatpush.bf16.msra.mxu2 %v5253_v6  ;;  %v7377_v6 = vld [vmem:[%s11877_s23 + $0xa4] sm:$0xf]  ;;  %v5193_v8 = vor.u32 %v7413_v61, %v5190_v62 }
  0x22   :  { %v5236_v12 = vld [vmem:[%s11877_s23 + $0x220] sm:$0xf]  ;;  %v7427_v13 = vld [vmem:[%s11877_s23 + $0x22c] sm:$0xf0]  ;;  %v5109_v20 = vor.u32 %v7395_v11, %v5108_v9  ;;  %1299 = vmatpush.bf16.msra.mxu3 %v5381_v10  ;;  %v5046_v7 = vld [vmem:[%s11877_s23 + $0xb0] sm:$0xf0] }
  0x23   :  { %v5364_v14 = vld [vmem:[%s11877_s23 + $0x320] sm:$0xf]  ;;  %v7459_v15 = vld [vmem:[%s11877_s23 + $0x32c] sm:$0xf0]  ;;  %v5237_v21 = vor.u32 %v7427_v13, %v5236_v12  ;;  %1261 = vmatpush.bf16.msra.mxu0 %v4981_v16  ;;  %v7409_v10 = vld [vmem:[%s11877_s23 + $0x1a4] sm:$0xf]  ;;  %v5049_v13 = vor.u32 %v7377_v6, %v5046_v7 }
  0x24   :  { %v4964_v17 = vld [vmem:[%s11877_s23] sm:$0xf]  ;;  %v7359_v18 = vld [vmem:[%s11877_s23 + $0xc] sm:$0xf0]  ;;  %v5365_v25 = vor.u32 %v7459_v15, %v5364_v14  ;;  %1274 = vmatpush.bf16.msra.mxu1 %v5109_v20  ;;  %v5174_v11 = vld [vmem:[%s11877_s23 + $0x1b0] sm:$0xf0] }
  0x25   :  { %v5092_v19 = vld [vmem:[%s11877_s23 + $0x100] sm:$0xf]  ;;  %v7391_v22 = vld [vmem:[%s11877_s23 + $0x10c] sm:$0xf0]  ;;  %v4965_v32 = vor.u32 %v7359_v18, %v4964_v17  ;;  %1287 = vmatpush.bf16.msra.mxu2 %v5237_v21  ;;  %v7373_v18 = vld [vmem:[%s11877_s23 + $0x84] sm:$0xf]  ;;  %v5177_v20 = vor.u32 %v7409_v10, %v5174_v11 }
  0x26   :  { %v5220_v23 = vld [vmem:[%s11877_s23 + $0x200] sm:$0xf]  ;;  %v7423_v24 = vld [vmem:[%s11877_s23 + $0x20c] sm:$0xf0]  ;;  %v5093_v36 = vor.u32 %v7391_v22, %v5092_v19  ;;  %1300 = vmatpush.bf16.msra.mxu3 %v5365_v25  ;;  %v5030_v19 = vld [vmem:[%s11877_s23 + $0x90] sm:$0xf0] }
  0x27   :  { %v5348_v26 = vld [vmem:[%s11877_s23 + $0x300] sm:$0xf]  ;;  %v7455_v27 = vld [vmem:[%s11877_s23 + $0x30c] sm:$0xf0]  ;;  %v5221_v37 = vor.u32 %v7423_v24, %v5220_v23  ;;  %1262 = vmatpush.bf16.msra.mxu0 %v4965_v32  ;;  %v7405_v22 = vld [vmem:[%s11877_s23 + $0x184] sm:$0xf]  ;;  %v5033_v25 = vor.u32 %v7373_v18, %v5030_v19 }
  0x28   :  { %v5588_v28 = vld [vmem:[%s11877_s23 + $0x4e0] sm:$0xf]  ;;  %v7515_v29 = vld [vmem:[%s11877_s23 + $0x4ec] sm:$0xf0]  ;;  %v5349_v41 = vor.u32 %v7455_v27, %v5348_v26  ;;  %1275 = vmatpush.bf16.msra.mxu1 %v5093_v36  ;;  %v5158_v23 = vld [vmem:[%s11877_s23 + $0x190] sm:$0xf0] }
  0x29   :  { %v5716_v30 = vld [vmem:[%s11877_s23 + $0x5e0] sm:$0xf]  ;;  %v7547_v31 = vld [vmem:[%s11877_s23 + $0x5ec] sm:$0xf0]  ;;  %v5589_v42 = vor.u32 %v7515_v29, %v5588_v28  ;;  %1288 = vmatpush.bf16.msra.mxu2 %v5221_v37  ;;  %v5161_v33 = vor.u32 %v7405_v22, %v5158_v23  ;;  %v5142_v36 = vld [vmem:[%s11877_s23 + $0x170] sm:$0xf0] }
  0x2a   :  { %v53_v35 = vld [vmem:[%s11859_s0 + $0x10] sm:$0xff]  ;;  %v5732_v38 = vld [vmem:[%s11877_s23 + $0x600] sm:$0xf]  ;;  %v5717_v46 = vor.u32 %v7547_v31, %v5716_v30  ;;  %1301 = vmatpush.bf16.msra.mxu3 %v5349_v41  ;;  %v7369_v30 = vld [vmem:[%s11877_s23 + $0x64] sm:$0xf] }
  0x2b   :  { %v7551_v39 = vld [vmem:[%s11877_s23 + $0x60c] sm:$0xf0]  ;;  %v51_v40 = vld [vmem:[%s11859_s0] sm:$0xff]  ;;  %v8308_v51 = vpack.c.bf16 %v53_v35, %v53_v35  ;;  %1307 = vmatpush.bf16.msrb.mxu0 %v5589_v42  ;;  %1276 = vmatmul.bf16.vlgmr.msra.gmra.mxu1 %v8343_v4  ;;  %v5014_v31 = vld [vmem:[%s11877_s23 + $0x70] sm:$0xf0] }
  0x2c   :  { %v5572_v48 = vld [vmem:[%s11877_s23 + $0x4c0] sm:$0xf]  ;;  %v7511_v49 = vld [vmem:[%s11877_s23 + $0x4cc] sm:$0xf0]  ;;  %v8319_v55 = vpack.c.bf16 %v51_v40, %v51_v40  ;;  %v5733_v56 = vor.u32 %v7551_v39, %v5732_v38  ;;  %1320 = vmatpush.bf16.msrb.mxu1 %v5717_v46  ;;  %v7401_v35 = vld [vmem:[%s11877_s23 + $0x164] sm:$0xf]  ;;  %v5017_v38 = vor.u32 %v7369_v30, %v5014_v31 }
  0x2d   :  { %v5700_v50 = vld [vmem:[%s11877_s23 + $0x5c0] sm:$0xf]  ;;  %v7543_v52 = vld [vmem:[%s11877_s23 + $0x5cc] sm:$0xf0]  ;;  %v5573_v60 = vor.u32 %v7511_v49, %v5572_v48  ;;  %1289 = vmatmul.bf16.vlgmr.msra.gmra.mxu2 %v8308_v51  ;;  %1302 = vmatmul.bf16.vlgmr.msra.gmra.mxu3 %v8321_v57  ;;  %v4998_v44 = vld [vmem:[%s11877_s23 + $0x50] sm:$0xf0]  ;;  %v5145_v46 = vor.u32 %v7401_v35, %v5142_v36 }
  0x2e   :  { %1346 = vmatpush.bf16.msrb.mxu3 %v5081_v47  ;;  %v5701_v63 = vor.u32 %v7543_v52, %v5700_v50  ;;  %v5556_v1 = vld [vmem:[%s11877_s23 + $0x4a0] sm:$0xf]  ;;  %v7507_v2 = vld [vmem:[%s11877_s23 + $0x4ac] sm:$0xf0]  ;;  %1263 = vmatmul.bf16.vlgmr.msra.gmra.mxu0 %v8319_v55  ;;  %v7397_v48 = vld [vmem:[%s11877_s23 + $0x144] sm:$0xf]  ;;  %v5001_v52 = vor.u32 %v7365_v43, %v4998_v44 }
  0x2f   :  { %v5684_v3 = vld [vmem:[%s11877_s23 + $0x5a0] sm:$0xf]  ;;  %v7539_v5 = vld [vmem:[%s11877_s23 + $0x5ac] sm:$0xf0]  ;;  %1340 = vmatpush.bf16.msrb.mxu2 %v5733_v56  ;;  %1308 = vmatpush.bf16.msrb.mxu0 %v5573_v60  ;;  %v5557_v9 = vor.u32 %v7507_v2, %v5556_v1  ;;  %v5126_v49 = vld [vmem:[%s11877_s23 + $0x150] sm:$0xf0] }
  0x30   :  { %1321 = vmatpush.bf16.msrb.mxu1 %v5701_v63  ;;  %v5685_v12 = vor.u32 %v7539_v5, %v5684_v3  ;;  %v5540_v14 = vld [vmem:[%s11877_s23 + $0x480] sm:$0xf]  ;;  %v7503_v15 = vld [vmem:[%s11877_s23 + $0x48c] sm:$0xf0]  ;;  %v4982_v60 = vld [vmem:[%s11877_s23 + $0x30] sm:$0xf0]  ;;  %v5129_v61 = vor.u32 %v7397_v48, %v5126_v49 }
  0x31   :  { %v5668_v16 = vld [vmem:[%s11877_s23 + $0x580] sm:$0xf]  ;;  %v7535_v17 = vld [vmem:[%s11877_s23 + $0x58c] sm:$0xf0]  ;;  %v5541_v21 = vor.u32 %v7503_v15, %v5540_v14  ;;  %v7393_v63 = vld [vmem:[%s11877_s23 + $0x124] sm:$0xf] }
  0x32   :  { %1347 = vmatpush.bf16.msrb.mxu3 %v5065_v0  ;;  %v5669_v24 = vor.u32 %v7535_v17, %v5668_v16  ;;  %v5524_v26 = vld [vmem:[%s11877_s23 + $0x460] sm:$0xf]  ;;  %v7499_v27 = vld [vmem:[%s11877_s23 + $0x46c] sm:$0xf0]  ;;  %v5110_v0 = vld [vmem:[%s11877_s23 + $0x130] sm:$0xf0] }
  0x33   :  { %1359 = vmatpush.bf16.msra.mxu2 %v5209_v59  ;;  %1309 = vmatpush.bf16.msrb.mxu0 %v5557_v9  ;;  %v5652_v28 = vld [vmem:[%s11877_s23 + $0x560] sm:$0xf]  ;;  %v7531_v29 = vld [vmem:[%s11877_s23 + $0x56c] sm:$0xf0]  ;;  %v5525_v34 = vor.u32 %v7499_v27, %v5524_v26  ;;  %v7361_v59 = vld [vmem:[%s11877_s23 + $0x24] sm:$0xf]  ;;  %v5113_v14 = vor.u32 %v7393_v63, %v5110_v0 }
  0x34   :  { %1322 = vmatpush.bf16.msrb.mxu1 %v5685_v12  ;;  %v57_v32 = vld [vmem:[%s11859_s0 + $0x30] sm:$0xff]  ;;  %v5653_v37 = vor.u32 %v7531_v29, %v5652_v28  ;;  %v5508_v39 = vld [vmem:[%s11877_s23 + $0x440] sm:$0xf]  ;;  %v4985_v3 = vor.u32 %v7361_v59, %v4982_v60  ;;  %v7449_v10 = vld [vmem:[%s11877_s23 + $0x2e4] sm:$0xf] }
  0x35   :  { %v7495_v40 = vld [vmem:[%s11877_s23 + $0x44c] sm:$0xf0]  ;;  %v5636_v41 = vld [vmem:[%s11877_s23 + $0x540] sm:$0xf]  ;;  %v8431_v45 = vpack.c.bf16 %v57_v32, %v57_v32  ;;  %v4966_v9 = vld [vmem:[%s11877_s23 + $0x10] sm:$0xf0] }
  0x36   :  { %1348 = vmatpush.bf16.msrb.mxu3 %v5049_v13  ;;  %v7527_v42 = vld [vmem:[%s11877_s23 + $0x54c] sm:$0xf0]  ;;  %v5509_v47 = vor.u32 %v7495_v40, %v5508_v39  ;;  %v5492_v53 = vld [vmem:[%s11877_s23 + $0x420] sm:$0xf]  ;;  %v5334_v11 = vld [vmem:[%s11877_s23 + $0x2f0] sm:$0xf0] }
  0x37   :  { %1360 = vmatpush.bf16.msra.mxu2 %v5193_v8  ;;  %1310 = vmatpush.bf16.msrb.mxu0 %v5541_v21  ;;  %v5637_v50 = vor.u32 %v7527_v42, %v5636_v41  ;;  %v7491_v54 = vld [vmem:[%s11877_s23 + $0x42c] sm:$0xf0]  ;;  %v5620_v56 = vld [vmem:[%s11877_s23 + $0x520] sm:$0xf]  ;;  %v7357_v8 = vld [vmem:[%s11877_s23 + $0x4] sm:$0xf] }
  0x38   :  { %1323 = vmatpush.bf16.msrb.mxu1 %v5669_v24  ;;  %v7523_v58 = vld [vmem:[%s11877_s23 + $0x52c] sm:$0xf0]  ;;  %v5493_v62 = vor.u32 %v7491_v54, %v5492_v53  ;;  %v5476_v1 = vld [vmem:[%s11877_s23 + $0x400] sm:$0xf]  ;;  %v7481_v12 = vld [vmem:[%s11877_s23 + $0x3e4] sm:$0xf]  ;;  %v5337_v24 = vor.u32 %v7449_v10, %v5334_v11 }
  0x39   :  { %v5621_v2 = vor.u32 %v7523_v58, %v5620_v56  ;;  %v7487_v5 = vld [vmem:[%s11877_s23 + $0x40c] sm:$0xf0]  ;;  %v5604_v6 = vld [vmem:[%s11877_s23 + $0x500] sm:$0xf]  ;;  %v5462_v13 = vld [vmem:[%s11877_s23 + $0x3f0] sm:$0xf0] }
  0x3a   :  { %1349 = vmatpush.bf16.msrb.mxu3 %v5033_v25  ;;  %v7519_v7 = vld [vmem:[%s11877_s23 + $0x50c] sm:$0xf0]  ;;  %v5477_v15 = vor.u32 %v7487_v5, %v5476_v1  ;;  %v7513_v16 = vld [vmem:[%s11877_s23 + $0x4e4] sm:$0xf]  ;;  %v5590_v17 = vld [vmem:[%s11877_s23 + $0x4f0] sm:$0xf0]  ;;  %v5465_v25 = vor.u32 %v7481_v12, %v5462_v13 }
  0x3b   :  { %1361 = vmatpush.bf16.msra.mxu2 %v5177_v20  ;;  %1311 = vmatpush.bf16.msrb.mxu0 %v5525_v34  ;;  %v55_v18 = vld [vmem:[%s11859_s0 + $0x20] sm:$0xff]  ;;  %v5605_v19 = vor.u32 %v7519_v7, %v5604_v6  ;;  %v4969_v20 = vor.u32 %v7357_v8, %v4966_v9  ;;  %v5094_v22 = vld [vmem:[%s11877_s23 + $0x110] sm:$0xf0]  ;;  %v56_v23 = vld [vmem:[%s11859_s0 + $0x28] sm:$0xff]  ;;  %v5593_v29 = vor.u32 %v7513_v16, %v5590_v17 }
  0x3c   :  { %1324 = vmatpush.bf16.msrb.mxu1 %v5653_v37  ;;  %v7389_v21 = vld [vmem:[%s11877_s23 + $0x104] sm:$0xf]  ;;  %v5718_v27 = vld [vmem:[%s11877_s23 + $0x5f0] sm:$0xf0]  ;;  %v8522_v30 = vpack.c.bf16 %v55_v18, %v55_v18  ;;  %v8533_v35 = vpack.c.bf16 %v56_v23, %v56_v23 }
  0x3d   :  { %5746 = vmatmul.msk.bf16.vlgmr.msrb.gmra.mxu2 %vm1251_vm0, %v8431_v45  ;;  %v7545_v26 = vld [vmem:[%s11877_s23 + $0x5e4] sm:$0xf]  ;;  %v5318_v31 = vld [vmem:[%s11877_s23 + $0x2d0] sm:$0xf0]  ;;  %v5097_v34 = vor.u32 %v7389_v21, %v5094_v22 }
  0x3e   :  { %1350 = vmatpush.bf16.msrb.mxu3 %v5017_v38  ;;  %v7445_v28 = vld [vmem:[%s11877_s23 + $0x2c4] sm:$0xf]  ;;  %v5574_v37 = vld [vmem:[%s11877_s23 + $0x4d0] sm:$0xf0]  ;;  %v5721_v38 = vor.u32 %v7545_v26, %v5718_v27 }
  0x3f   :  { %1362 = vmatpush.bf16.msra.mxu2 %v5161_v33  ;;  %1312 = vmatpush.bf16.msrb.mxu0 %v5509_v47  ;;  %v7477_v32 = vld [vmem:[%s11877_s23 + $0x3c4] sm:$0xf]  ;;  %v5446_v33 = vld [vmem:[%s11877_s23 + $0x3d0] sm:$0xf0]  ;;  %v5321_v39 = vor.u32 %v7445_v28, %v5318_v31 }
  0x40   :  { %1325 = vmatpush.bf16.msrb.mxu1 %v5637_v50  ;;  %v7509_v36 = vld [vmem:[%s11877_s23 + $0x4c4] sm:$0xf]  ;;  %v5449_v40 = vor.u32 %v7477_v32, %v5446_v33  ;;  %v5702_v42 = vld [vmem:[%s11877_s23 + $0x5d0] sm:$0xf0] }
  0x41   :  { %v7541_v41 = vld [vmem:[%s11877_s23 + $0x5c4] sm:$0xf]  ;;  %v5577_v44 = vor.u32 %v7509_v36, %v5574_v37  ;;  %v5430_v48 = vld [vmem:[%s11877_s23 + $0x3b0] sm:$0xf0] }
  0x42   :  { %1351 = vmatpush.bf16.msrb.mxu3 %v5001_v52  ;;  %v7441_v43 = vld [vmem:[%s11877_s23 + $0x2a4] sm:$0xf]  ;;  %v5558_v50 = vld [vmem:[%s11877_s23 + $0x4b0] sm:$0xf0]  ;;  %v5705_v52 = vor.u32 %v7541_v41, %v5702_v42 }
  0x43   :  { %1363 = vmatpush.bf16.msra.mxu2 %v5145_v46  ;;  %1313 = vmatpush.bf16.msrb.mxu0 %v5493_v62  ;;  %v5302_v46 = vld [vmem:[%s11877_s23 + $0x2b0] sm:$0xf0]  ;;  %v7473_v47 = vld [vmem:[%s11877_s23 + $0x3a4] sm:$0xf] }
  0x44   :  { %1326 = vmatpush.bf16.msrb.mxu1 %v5621_v2  ;;  %v7505_v49 = vld [vmem:[%s11877_s23 + $0x4a4] sm:$0xf]  ;;  %v5305_v53 = vor.u32 %v7441_v43, %v5302_v46  ;;  %v5433_v54 = vor.u32 %v7473_v47, %v5430_v48  ;;  %v5686_v58 = vld [vmem:[%s11877_s23 + $0x5b0] sm:$0xf0] }
  0x45   :  { %v7537_v56 = vld [vmem:[%s11877_s23 + $0x5a4] sm:$0xf]  ;;  %v5561_v60 = vor.u32 %v7505_v49, %v5558_v50  ;;  %v5414_v63 = vld [vmem:[%s11877_s23 + $0x390] sm:$0xf0] }
  0x46   :  { %1352 = vmatpush.bf16.msrb.mxu3 %v4985_v3  ;;  %v7437_v59 = vld [vmem:[%s11877_s23 + $0x284] sm:$0xf]  ;;  %v5542_v1 = vld [vmem:[%s11877_s23 + $0x490] sm:$0xf0]  ;;  %v5689_v2 = vor.u32 %v7537_v56, %v5686_v58  ;;  %v5084_v56 = vld [vmem:[%s11877_s23 + $0xe8] sm:$0xf] }
  0x47   :  { %1364 = vmatpush.bf16.msra.mxu2 %v5129_v61  ;;  %1314 = vmatpush.bf16.msrb.mxu0 %v5477_v15  ;;  %v5286_v61 = vld [vmem:[%s11877_s23 + $0x290] sm:$0xf0]  ;;  %v7469_v62 = vld [vmem:[%s11877_s23 + $0x384] sm:$0xf]  ;;  %v7388_v58 = vld [vmem:[%s11877_s23 + $0xf4] sm:$0xf0] }
  0x48   :  { %1327 = vmatpush.bf16.msrb.mxu1 %v5605_v19  ;;  %v7501_v0 = vld [vmem:[%s11877_s23 + $0x484] sm:$0xf]  ;;  %v5289_v3 = vor.u32 %v7437_v59, %v5286_v61  ;;  %v5417_v5 = vor.u32 %v7469_v62, %v5414_v63  ;;  %v5670_v7 = vld [vmem:[%s11877_s23 + $0x590] sm:$0xf0]  ;;  %v5212_v59 = vld [vmem:[%s11877_s23 + $0x1e8] sm:$0xf] }
  0x49   :  { %v7533_v6 = vld [vmem:[%s11877_s23 + $0x584] sm:$0xf]  ;;  %v5545_v9 = vor.u32 %v7501_v0, %v5542_v1  ;;  %v5270_v10 = vld [vmem:[%s11877_s23 + $0x270] sm:$0xf0]  ;;  %v7420_v61 = vld [vmem:[%s11877_s23 + $0x1f4] sm:$0xf0] }
  0x4a   :  { %1353 = vmatpush.bf16.msrb.mxu3 %v4969_v20  ;;  %1315 = vmatmul.bf16.vlgmr.msrb.gmra.mxu0 %v8522_v30  ;;  %v7433_v8 = vld [vmem:[%s11877_s23 + $0x264] sm:$0xf]  ;;  %v5398_v12 = vld [vmem:[%s11877_s23 + $0x370] sm:$0xf0]  ;;  %v5673_v15 = vor.u32 %v7533_v6, %v5670_v7  ;;  %v5085_v6 = vor.u32 %v7388_v58, %v5084_v56  ;;  %v5468_v7 = vld [vmem:[%s11877_s23 + $0x3e8] sm:$0xf] }
  0x4b   :  { %1365 = vmatpush.bf16.msra.mxu2 %v5113_v14  ;;  %1372 = vmatpush.bf16.msra.mxu0 %v5337_v24  ;;  %v7465_v11 = vld [vmem:[%s11877_s23 + $0x364] sm:$0xf]  ;;  %v5526_v14 = vld [vmem:[%s11877_s23 + $0x470] sm:$0xf0]  ;;  %v5273_v16 = vor.u32 %v7433_v8, %v5270_v10  ;;  %v7484_v8 = vld [vmem:[%s11877_s23 + $0x3f4] sm:$0xf0]  ;;  %v5213_v10 = vor.u32 %v7420_v61, %v5212_v59 }
  0x4c   :  { %1385 = vmatpush.bf16.msra.mxu1 %v5465_v25  ;;  %v7497_v13 = vld [vmem:[%s11877_s23 + $0x464] sm:$0xf]  ;;  %v5401_v17 = vor.u32 %v7465_v11, %v5398_v12  ;;  %v5654_v19 = vld [vmem:[%s11877_s23 + $0x570] sm:$0xf0]  ;;  %v7384_v11 = vld [vmem:[%s11877_s23 + $0xd4] sm:$0xf0] }
  0x4d   :  { %1328 = vmatmul.bf16.vlgmr.msrb.gmra.mxu1 %v8533_v35  ;;  %1354 = vmatmul.bf16.vlgmr.msrb.gmra.mxu3 %v8319_v55  ;;  %v7529_v18 = vld [vmem:[%s11877_s23 + $0x564] sm:$0xf]  ;;  %v5529_v21 = vor.u32 %v7497_v13, %v5526_v14  ;;  %v5254_v22 = vld [vmem:[%s11877_s23 + $0x250] sm:$0xf0]  ;;  %v5340_v13 = vld [vmem:[%s11877_s23 + $0x2e8] sm:$0xf] }
  0x4e   :  { %1398 = vmatpush.bf16.msra.mxu3 %v5593_v29  ;;  %v7429_v20 = vld [vmem:[%s11877_s23 + $0x244] sm:$0xf]  ;;  %v5382_v24 = vld [vmem:[%s11877_s23 + $0x350] sm:$0xf0]  ;;  %v5657_v27 = vor.u32 %v7529_v18, %v5654_v19  ;;  %v7452_v14 = vld [vmem:[%s11877_s23 + $0x2f4] sm:$0xf0]  ;;  %v5469_v18 = vor.u32 %v7484_v8, %v5468_v7 }
  0x4f   :  { %1366 = vmatpush.bf16.msra.mxu2 %v5097_v34  ;;  %1373 = vmatpush.bf16.msra.mxu0 %v5321_v39  ;;  %v7461_v23 = vld [vmem:[%s11877_s23 + $0x344] sm:$0xf]  ;;  %v5510_v26 = vld [vmem:[%s11877_s23 + $0x450] sm:$0xf0]  ;;  %v5257_v28 = vor.u32 %v7429_v20, %v5254_v22  ;;  %v5452_v20 = vld [vmem:[%s11877_s23 + $0x3c8] sm:$0xf] }
  0x50   :  { %1386 = vmatpush.bf16.msra.mxu1 %v5449_v40  ;;  %v7493_v25 = vld [vmem:[%s11877_s23 + $0x444] sm:$0xf]  ;;  %v5385_v29 = vor.u32 %v7461_v23, %v5382_v24  ;;  %v5638_v32 = vld [vmem:[%s11877_s23 + $0x550] sm:$0xf0]  ;;  %v5052_v22 = vld [vmem:[%s11877_s23 + $0xa8] sm:$0xf]  ;;  %v5341_v23 = vor.u32 %v7452_v14, %v5340_v13 }
  0x51   :  { %v7525_v31 = vld [vmem:[%s11877_s23 + $0x544] sm:$0xf]  ;;  %v5513_v34 = vor.u32 %v7493_v25, %v5510_v26  ;;  %v5238_v36 = vld [vmem:[%s11877_s23 + $0x230] sm:$0xf0]  ;;  %v7380_v25 = vld [vmem:[%s11877_s23 + $0xb4] sm:$0xf0] }
  0x52   :  { %1399 = vmatpush.bf16.msra.mxu3 %v5577_v44  ;;  %1367 = vmatmul.bf16.vlgmr.msra.gmra.mxu2 %v8343_v4  ;;  %v7425_v33 = vld [vmem:[%s11877_s23 + $0x224] sm:$0xf]  ;;  %v5494_v40 = vld [vmem:[%s11877_s23 + $0x430] sm:$0xf0]  ;;  %v5641_v41 = vor.u32 %v7525_v31, %v5638_v32  ;;  %v5324_v26 = vld [vmem:[%s11877_s23 + $0x2c8] sm:$0xf]  ;;  %v5053_v32 = vor.u32 %v7380_v25, %v5052_v22 }
  0x53   :  { %1411 = vmatpush.bf16.msrb.mxu2 %v5721_v38  ;;  %1374 = vmatpush.bf16.msra.mxu0 %v5305_v53  ;;  %v7457_v37 = vld [vmem:[%s11877_s23 + $0x324] sm:$0xf]  ;;  %v5366_v38 = vld [vmem:[%s11877_s23 + $0x330] sm:$0xf0]  ;;  %v5241_v44 = vor.u32 %v7425_v33, %v5238_v36  ;;  %v5436_v33 = vld [vmem:[%s11877_s23 + $0x3a8] sm:$0xf] }
  0x54   :  { %1387 = vmatpush.bf16.msra.mxu1 %v5433_v54  ;;  %v7489_v39 = vld [vmem:[%s11877_s23 + $0x424] sm:$0xf]  ;;  %v5622_v43 = vld [vmem:[%s11877_s23 + $0x530] sm:$0xf0]  ;;  %v5369_v46 = vor.u32 %v7457_v37, %v5366_v38  ;;  %v5036_v36 = vld [vmem:[%s11877_s23 + $0x88] sm:$0xf] }
  0x55   :  { %v7521_v42 = vld [vmem:[%s11877_s23 + $0x524] sm:$0xf]  ;;  %v5222_v48 = vld [vmem:[%s11877_s23 + $0x210] sm:$0xf0]  ;;  %v5497_v50 = vor.u32 %v7489_v39, %v5494_v40  ;;  %v7376_v39 = vld [vmem:[%s11877_s23 + $0x94] sm:$0xf0] }
  0x56   :  { %1400 = vmatpush.bf16.msra.mxu3 %v5561_v60  ;;  %v7421_v47 = vld [vmem:[%s11877_s23 + $0x204] sm:$0xf]  ;;  %v5478_v54 = vld [vmem:[%s11877_s23 + $0x410] sm:$0xf0]  ;;  %v5625_v60 = vor.u32 %v7521_v42, %v5622_v43  ;;  %v5308_v40 = vld [vmem:[%s11877_s23 + $0x2a8] sm:$0xf] }
  0x57   :  { %1412 = vmatpush.bf16.msrb.mxu2 %v5705_v52  ;;  %1375 = vmatpush.bf16.msra.mxu0 %v5289_v3  ;;  %v7453_v49 = vld [vmem:[%s11877_s23 + $0x304] sm:$0xf]  ;;  %v5350_v52 = vld [vmem:[%s11877_s23 + $0x310] sm:$0xf0]  ;;  %v5225_v0 = vor.u32 %v7421_v47, %v5222_v48  ;;  %v5164_v42 = vld [vmem:[%s11877_s23 + $0x188] sm:$0xf] }
  0x58   :  { %1388 = vmatpush.bf16.msra.mxu1 %v5417_v5  ;;  %v7485_v53 = vld [vmem:[%s11877_s23 + $0x404] sm:$0xf]  ;;  %v5734_v63 = vld [vmem:[%s11877_s23 + $0x610] sm:$0xf0]  ;;  %v5353_v1 = vor.u32 %v7453_v49, %v5350_v52  ;;  %v7408_v43 = vld [vmem:[%s11877_s23 + $0x194] sm:$0xf0] }
  0x59   :  { %v7549_v62 = vld [vmem:[%s11877_s23 + $0x604] sm:$0xf]  ;;  %v5606_v3 = vld [vmem:[%s11877_s23 + $0x510] sm:$0xf0]  ;;  %v5481_v5 = vor.u32 %v7485_v53, %v5478_v54  ;;  %v5420_v47 = vld [vmem:[%s11877_s23 + $0x388] sm:$0xf]  ;;  %v5165_v52 = vor.u32 %v7408_v43, %v5164_v42 }
  0x5a   :  { %1401 = vmatpush.bf16.msra.mxu3 %v5545_v9  ;;  %v5068_v9 = vld [vmem:[%s11877_s23 + $0xc8] sm:$0xf]  ;;  %v5737_v12 = vor.u32 %v7549_v62, %v5734_v63  ;;  %v7472_v48 = vld [vmem:[%s11877_s23 + $0x394] sm:$0xf0] }
  0x5b   :  { %1413 = vmatpush.bf16.msrb.mxu2 %v5689_v2  ;;  %1376 = vmatpush.bf16.msra.mxu0 %v5273_v16  ;;  %v7517_v2 = vld [vmem:[%s11877_s23 + $0x504] sm:$0xf]  ;;  %v5196_v16 = vld [vmem:[%s11877_s23 + $0x1c8] sm:$0xf]  ;;  %v5069_v19 = vor.u32 %v7384_v11, %v5068_v9  ;;  %v7372_v53 = vld [vmem:[%s11877_s23 + $0x74] sm:$0xf0] }
  0x5c   :  { %1389 = vmatpush.bf16.msra.mxu1 %v5401_v17  ;;  %v7416_v17 = vld [vmem:[%s11877_s23 + $0x1d4] sm:$0xf0]  ;;  %v5020_v49 = vld [vmem:[%s11877_s23 + $0x68] sm:$0xf] }
  0x5d   :  { %v5197_v24 = vor.u32 %v7416_v17, %v5196_v16  ;;  %v5292_v54 = vld [vmem:[%s11877_s23 + $0x288] sm:$0xf]  ;;  %v7440_v56 = vld [vmem:[%s11877_s23 + $0x294] sm:$0xf0]  ;;  %v5021_v61 = vor.u32 %v7372_v53, %v5020_v49 }
  0x5e   :  { %1402 = vmatpush.bf16.msra.mxu3 %v5529_v21  ;;  %v7480_v21 = vld [vmem:[%s11877_s23 + $0x3d4] sm:$0xf0]  ;;  %v5148_v58 = vld [vmem:[%s11877_s23 + $0x168] sm:$0xf] }
  0x5f   :  { %1414 = vmatpush.bf16.msrb.mxu2 %v5673_v15  ;;  %1377 = vmatpush.bf16.msra.mxu0 %v5257_v28  ;;  %v5609_v15 = vor.u32 %v7517_v2, %v5606_v3  ;;  %v5180_v28 = vld [vmem:[%s11877_s23 + $0x1a8] sm:$0xf]  ;;  %v5453_v31 = vor.u32 %v7480_v21, %v5452_v20  ;;  %v7404_v59 = vld [vmem:[%s11877_s23 + $0x174] sm:$0xf0] }
  0x60   :  { %1390 = vmatpush.bf16.msra.mxu1 %v5385_v29  ;;  %v7412_v29 = vld [vmem:[%s11877_s23 + $0x1b4] sm:$0xf0]  ;;  %v5404_v62 = vld [vmem:[%s11877_s23 + $0x368] sm:$0xf]  ;;  %v5149_v2 = vor.u32 %v7404_v59, %v5148_v58 }
  0x61   :  { %v5181_v38 = vor.u32 %v7412_v29, %v5180_v28  ;;  %v7468_v63 = vld [vmem:[%s11877_s23 + $0x374] sm:$0xf0]  ;;  %v5132_v7 = vld [vmem:[%s11877_s23 + $0x148] sm:$0xf] }
  0x62   :  { %1403 = vmatpush.bf16.msra.mxu3 %v5513_v34  ;;  %v7476_v34 = vld [vmem:[%s11877_s23 + $0x3b4] sm:$0xf0]  ;;  %v5405_v9 = vor.u32 %v7468_v63, %v5404_v62  ;;  %v5388_v11 = vld [vmem:[%s11877_s23 + $0x348] sm:$0xf] }
  0x63   :  { %1415 = vmatpush.bf16.msrb.mxu2 %v5657_v27  ;;  %1378 = vmatpush.bf16.msra.mxu0 %v5241_v44  ;;  %v7448_v27 = vld [vmem:[%s11877_s23 + $0x2d4] sm:$0xf0]  ;;  %v5437_v44 = vor.u32 %v7476_v34, %v5436_v33  ;;  %v4988_v13 = vld [vmem:[%s11877_s23 + $0x28] sm:$0xf] }
  0x64   :  { %1391 = vmatpush.bf16.msra.mxu1 %v5369_v46  ;;  %v5325_v37 = vor.u32 %v7448_v27, %v5324_v26  ;;  %v5037_v46 = vor.u32 %v7376_v39, %v5036_v36  ;;  %v7368_v3 = vld [vmem:[%s11877_s23 + $0x54] sm:$0xf0]  ;;  %v5260_v17 = vld [vmem:[%s11877_s23 + $0x248] sm:$0xf] }
  0x65   :  { %v7400_v8 = vld [vmem:[%s11877_s23 + $0x154] sm:$0xf0]  ;;  %v5372_v22 = vld [vmem:[%s11877_s23 + $0x328] sm:$0xf] }
  0x66   :  { %1404 = vmatpush.bf16.msra.mxu3 %v5497_v50  ;;  %v7364_v16 = vld [vmem:[%s11877_s23 + $0x34] sm:$0xf0]  ;;  %v4972_v25 = vld [vmem:[%s11877_s23 + $0x8] sm:$0xf] }
  0x67   :  { %1416 = vmatpush.bf16.msrb.mxu2 %v5641_v41  ;;  %1379 = vmatpush.bf16.msra.mxu0 %v5225_v0  ;;  %v7444_v41 = vld [vmem:[%s11877_s23 + $0x2b4] sm:$0xf0]  ;;  %v5004_v0 = vld [vmem:[%s11877_s23 + $0x48] sm:$0xf] }
  0x68   :  { %1392 = vmatpush.bf16.msra.mxu1 %v5353_v1  ;;  %v5309_v50 = vor.u32 %v7444_v41, %v5308_v40  ;;  %v5293_v1 = vor.u32 %v7440_v56, %v5292_v54  ;;  %v7396_v20 = vld [vmem:[%s11877_s23 + $0x134] sm:$0xf0]  ;;  %v5100_v29 = vld [vmem:[%s11877_s23 + $0x108] sm:$0xf] }
  0x69   :  { %v7360_v26 = vld [vmem:[%s11877_s23 + $0x14] sm:$0xf0]  ;;  %v5596_v34 = vld [vmem:[%s11877_s23 + $0x4e8] sm:$0xf] }
  0x6a   :  { %1405 = vmatpush.bf16.msra.mxu3 %v5481_v5  ;;  %1380 = vmatmul.bf16.vlgmr.msra.gmra.mxu0 %v8308_v51  ;;  %v5276_v5 = vld [vmem:[%s11877_s23 + $0x268] sm:$0xf]  ;;  %v7392_v33 = vld [vmem:[%s11877_s23 + $0x114] sm:$0xf0]  ;;  %v4973_v41 = vor.u32 %v7360_v26, %v4972_v25  ;;  %v7374_v25 = vld [vmem:[%s11877_s23 + $0x8c] sm:$0xf] }
  0x6b   :  { %1417 = vmatpush.bf16.msrb.mxu2 %v5625_v60  ;;  %1431 = vmatpush.bf16.msrb.mxu0 %v5737_v12  ;;  %v5421_v60 = vor.u32 %v7472_v48, %v5420_v47  ;;  %v7464_v12 = vld [vmem:[%s11877_s23 + $0x354] sm:$0xf0]  ;;  %v5356_v40 = vld [vmem:[%s11877_s23 + $0x308] sm:$0xf]  ;;  %v5101_v47 = vor.u32 %v7392_v33, %v5100_v29  ;;  %v7410_v29 = vld [vmem:[%s11877_s23 + $0x1ac] sm:$0xf] }
  0x6c   :  { %1437 = vmatpush.bf16.msrb.mxu1 %v5085_v6  ;;  %v7436_v6 = vld [vmem:[%s11877_s23 + $0x274] sm:$0xf0]  ;;  %v5389_v21 = vor.u32 %v7464_v12, %v5388_v11  ;;  %v5580_v49 = vld [vmem:[%s11877_s23 + $0x4c8] sm:$0xf] }
  0x6d   :  { %1406 = vmatmul.bf16.vlgmr.msra.gmra.mxu3 %v8522_v30  ;;  %1393 = vmatmul.bf16.vlgmr.msra.gmra.mxu1 %v8321_v57  ;;  %v5277_v14 = vor.u32 %v7436_v6, %v5276_v5  ;;  %v7516_v36 = vld [vmem:[%s11877_s23 + $0x4f4] sm:$0xf0]  ;;  %v5740_v56 = vld [vmem:[%s11877_s23 + $0x608] sm:$0xf]  ;;  %v7418_v5 = vld [vmem:[%s11877_s23 + $0x1ec] sm:$0xf] }
  0x6e   :  { %1450 = vmatpush.bf16.msrb.mxu3 %v5213_v10  ;;  %v5005_v10 = vor.u32 %v7368_v3, %v5004_v0  ;;  %v7548_v39 = vld [vmem:[%s11877_s23 + $0x5f4] sm:$0xf0]  ;;  %v5597_v48 = vor.u32 %v7516_v36, %v5596_v34  ;;  %v7382_v0 = vld [vmem:[%s11877_s23 + $0xcc] sm:$0xf]  ;;  %v5214_v6 = vld [vmem:[%s11877_s23 + $0x1f8] sm:$0xf0] }
  0x6f   :  { %1418 = vmatpush.bf16.msrb.mxu2 %v5609_v15  ;;  %1463 = vmatpush.bf16.msra.mxu0 %v5341_v23  ;;  %v5133_v15 = vor.u32 %v7400_v8, %v5132_v7  ;;  %v4989_v23 = vor.u32 %v7364_v16, %v4988_v13  ;;  %v7456_v42 = vld [vmem:[%s11877_s23 + $0x314] sm:$0xf0]  ;;  %v5564_v8 = vld [vmem:[%s11877_s23 + $0x4a8] sm:$0xf]  ;;  %v7378_v13 = vld [vmem:[%s11877_s23 + $0xac] sm:$0xf] }
  0x70   :  { %1438 = vmatpush.bf16.msrb.mxu1 %v5069_v19  ;;  %v5116_v19 = vld [vmem:[%s11877_s23 + $0x128] sm:$0xf]  ;;  %v7512_v54 = vld [vmem:[%s11877_s23 + $0x4d4] sm:$0xf0]  ;;  %v5357_v59 = vor.u32 %v7456_v42, %v5356_v40  ;;  %v5054_v16 = vld [vmem:[%s11877_s23 + $0xb8] sm:$0xf0] }
  0x71   :  { %v5117_v28 = vor.u32 %v7396_v20, %v5116_v19  ;;  %v7552_v58 = vld [vmem:[%s11877_s23 + $0x614] sm:$0xf0]  ;;  %v5548_v20 = vld [vmem:[%s11877_s23 + $0x488] sm:$0xf]  ;;  %v5022_v42 = vld [vmem:[%s11877_s23 + $0x78] sm:$0xf0] }
  0x72   :  { %1451 = vmatpush.bf16.msrb.mxu3 %v5197_v24  ;;  %1419 = vmatmul.bf16.vlgmr.msrb.gmra.mxu2 %v8533_v35  ;;  %v7460_v24 = vld [vmem:[%s11877_s23 + $0x334] sm:$0xf0]  ;;  %v5741_v3 = vor.u32 %v7552_v58, %v5740_v56  ;;  %v5532_v33 = vld [vmem:[%s11877_s23 + $0x468] sm:$0xf]  ;;  %v5006_v58 = vld [vmem:[%s11877_s23 + $0x58] sm:$0xf0] }
  0x73   :  { %1476 = vmatpush.bf16.msra.mxu2 %v5469_v18  ;;  %1464 = vmatpush.bf16.msra.mxu0 %v5325_v37  ;;  %v7432_v18 = vld [vmem:[%s11877_s23 + $0x254] sm:$0xf0]  ;;  %v5373_v37 = vor.u32 %v7460_v24, %v5372_v22  ;;  %v5676_v22 = vld [vmem:[%s11877_s23 + $0x588] sm:$0xf]  ;;  %v5057_v24 = vor.u32 %v7378_v13, %v5054_v16  ;;  %v5342_v16 = vld [vmem:[%s11877_s23 + $0x2f8] sm:$0xf0] }
  0x74   :  { %1439 = vmatpush.bf16.msrb.mxu1 %v5053_v32  ;;  %v5261_v27 = vor.u32 %v7432_v18, %v5260_v17  ;;  %v7428_v32 = vld [vmem:[%s11877_s23 + $0x234] sm:$0xf0]  ;;  %v7414_v17 = vld [vmem:[%s11877_s23 + $0x1cc] sm:$0xf]  ;;  %v5198_v18 = vld [vmem:[%s11877_s23 + $0x1d8] sm:$0xf0] }
  0x75   :  { %v7540_v11 = vld [vmem:[%s11877_s23 + $0x5b4] sm:$0xf0]  ;;  %v5201_v26 = vor.u32 %v7414_v17, %v5198_v18  ;;  %v5660_v36 = vld [vmem:[%s11877_s23 + $0x568] sm:$0xf]  ;;  %v7482_v18 = vld [vmem:[%s11877_s23 + $0x3ec] sm:$0xf] }
  0x76   :  { %1452 = vmatpush.bf16.msrb.mxu3 %v5181_v38  ;;  %v5724_v38 = vld [vmem:[%s11877_s23 + $0x5e8] sm:$0xf]  ;;  %v7500_v34 = vld [vmem:[%s11877_s23 + $0x474] sm:$0xf0] }
  0x77   :  { %1477 = vmatpush.bf16.msra.mxu2 %v5453_v31  ;;  %1465 = vmatpush.bf16.msra.mxu0 %v5309_v50  ;;  %v5244_v31 = vld [vmem:[%s11877_s23 + $0x228] sm:$0xf]  ;;  %v5725_v53 = vor.u32 %v7548_v39, %v5724_v38  ;;  %v7370_v39 = vld [vmem:[%s11877_s23 + $0x6c] sm:$0xf] }
  0x78   :  { %1440 = vmatpush.bf16.msrb.mxu1 %v5037_v46  ;;  %v5245_v43 = vor.u32 %v7428_v32, %v5244_v31  ;;  %v5086_v46 = vld [vmem:[%s11877_s23 + $0xf8] sm:$0xf0]  ;;  %v5228_v50 = vld [vmem:[%s11877_s23 + $0x208] sm:$0xf] }
  0x79   :  { %v5182_v31 = vld [vmem:[%s11877_s23 + $0x1b8] sm:$0xf0]  ;;  %v5612_v13 = vld [vmem:[%s11877_s23 + $0x508] sm:$0xf] }
  0x7a   :  { %1453 = vmatpush.bf16.msrb.mxu3 %v5165_v52  ;;  %5747 = vmatmul.msk.bf16.vlgmr.msrb.gmra.mxu0 %vm1251_vm0, %v8431_v45  ;;  %v7424_v52 = vld [vmem:[%s11877_s23 + $0x214] sm:$0xf0]  ;;  %v5185_v40 = vor.u32 %v7410_v29, %v5182_v31  ;;  %v5326_v31 = vld [vmem:[%s11877_s23 + $0x2d8] sm:$0xf0] }
  0x7b   :  { %1478 = vmatpush.bf16.msra.mxu2 %v5437_v44  ;;  %1466 = vmatpush.bf16.msra.mxu0 %v5293_v1  ;;  %v7386_v44 = vld [vmem:[%s11877_s23 + $0xec] sm:$0xf]  ;;  %v5229_v63 = vor.u32 %v7424_v52, %v5228_v50  ;;  %v5581_v1 = vor.u32 %v7512_v54, %v5580_v49  ;;  %v5644_v49 = vld [vmem:[%s11877_s23 + $0x548] sm:$0xf]  ;;  %v7528_v50 = vld [vmem:[%s11877_s23 + $0x554] sm:$0xf0]  ;;  %v5025_v52 = vor.u32 %v7370_v39, %v5022_v42 }
  0x7c   :  { %1441 = vmatpush.bf16.msrb.mxu1 %v5021_v61  ;;  %v7544_v61 = vld [vmem:[%s11877_s23 + $0x5d4] sm:$0xf0]  ;;  %v5089_v62 = vor.u32 %v7386_v44, %v5086_v46  ;;  %v5166_v44 = vld [vmem:[%s11877_s23 + $0x198] sm:$0xf0]  ;;  %v7510_v39 = vld [vmem:[%s11877_s23 + $0x4cc] sm:$0xf] }
  0x7d   :  { %v5582_v42 = vld [vmem:[%s11877_s23 + $0x4d8] sm:$0xf0] }
  0x7e   :  { %1454 = vmatpush.bf16.msrb.mxu3 %v5149_v2  ;;  %v5070_v2 = vld [vmem:[%s11877_s23 + $0xd8] sm:$0xf0] }
  0x7f   :  { %1479 = vmatpush.bf16.msra.mxu2 %v5421_v60  ;;  %1467 = vmatpush.bf16.msra.mxu0 %v5277_v14  ;;  %v5708_v60 = vld [vmem:[%s11877_s23 + $0x5c8] sm:$0xf]  ;;  %v5073_v12 = vor.u32 %v7382_v0, %v5070_v2  ;;  %v5217_v14 = vor.u32 %v7418_v5, %v5214_v6 }
  0x80   :  { %1442 = vmatpush.bf16.msrb.mxu1 %v5005_v10  ;;  %v5709_v7 = vor.u32 %v7544_v61, %v5708_v60  ;;  %v5692_v10 = vld [vmem:[%s11877_s23 + $0x5a8] sm:$0xf]  ;;  %v5150_v60 = vld [vmem:[%s11877_s23 + $0x178] sm:$0xf0]  ;;  %v5645_v61 = vor.u32 %v7528_v50, %v5644_v49 }
  0x81   :  { %v5693_v19 = vor.u32 %v7540_v11, %v5692_v10  ;;  %v5628_v0 = vld [vmem:[%s11877_s23 + $0x528] sm:$0xf]  ;;  %v5102_v49 = vld [vmem:[%s11877_s23 + $0x118] sm:$0xf0] }
  0x82   :  { %1455 = vmatpush.bf16.msrb.mxu3 %v5133_v15  ;;  %v5484_v11 = vld [vmem:[%s11877_s23 + $0x408] sm:$0xf]  ;;  %v5438_v50 = vld [vmem:[%s11877_s23 + $0x3b8] sm:$0xf0] }
  0x83   :  { %1480 = vmatpush.bf16.msra.mxu2 %v5405_v9  ;;  %1468 = vmatpush.bf16.msra.mxu0 %v5261_v27  ;;  %v7508_v9 = vld [vmem:[%s11877_s23 + $0x4b4] sm:$0xf0] }
  0x84   :  { %1443 = vmatpush.bf16.msrb.mxu1 %v4989_v23  ;;  %v5565_v15 = vor.u32 %v7508_v9, %v5564_v8  ;;  %v7536_v23 = vld [vmem:[%s11877_s23 + $0x594] sm:$0xf0]  ;;  %v7398_v8 = vld [vmem:[%s11877_s23 + $0x14c] sm:$0xf]  ;;  %v5134_v9 = vld [vmem:[%s11877_s23 + $0x158] sm:$0xf0] }
  0x85   :  { %v5677_v32 = vor.u32 %v7536_v23, %v5676_v22  ;;  %v7358_v22 = vld [vmem:[%s11877_s23 + $0xc] sm:$0xf]  ;;  %v4974_v23 = vld [vmem:[%s11877_s23 + $0x18] sm:$0xf0] }
  0x86   :  { %1456 = vmatpush.bf16.msrb.mxu3 %v5117_v28  ;;  %v5038_v28 = vld [vmem:[%s11877_s23 + $0x98] sm:$0xf0] }
  0x87   :  { %1481 = vmatpush.bf16.msra.mxu2 %v5389_v21  ;;  %1469 = vmatpush.bf16.msra.mxu0 %v5245_v43  ;;  %v7504_v21 = vld [vmem:[%s11877_s23 + $0x494] sm:$0xf0]  ;;  %v5041_v38 = vor.u32 %v7374_v25, %v5038_v28  ;;  %v7406_v43 = vld [vmem:[%s11877_s23 + $0x18c] sm:$0xf] }
  0x88   :  { %1444 = vmatpush.bf16.msrb.mxu1 %v4973_v41  ;;  %v5549_v27 = vor.u32 %v7504_v21, %v5548_v20  ;;  %v5533_v41 = vor.u32 %v7500_v34, %v5532_v33  ;;  %v5169_v54 = vor.u32 %v7406_v43, %v5166_v44  ;;  %v5137_v20 = vor.u32 %v7398_v8, %v5134_v9  ;;  %v7446_v28 = vld [vmem:[%s11877_s23 + $0x2cc] sm:$0xf]  ;;  %v5118_v33 = vld [vmem:[%s11877_s23 + $0x138] sm:$0xf0] }
  0x89   :  { %v4977_v34 = vor.u32 %v7358_v22, %v4974_v23  ;;  %v7442_v43 = vld [vmem:[%s11877_s23 + $0x2ac] sm:$0xf]  ;;  %v5310_v44 = vld [vmem:[%s11877_s23 + $0x2b8] sm:$0xf0] }
  0x8a   :  { %1457 = vmatpush.bf16.msrb.mxu3 %v5101_v47  ;;  %v5516_v47 = vld [vmem:[%s11877_s23 + $0x448] sm:$0xf]  ;;  %v5550_v8 = vld [vmem:[%s11877_s23 + $0x498] sm:$0xf0] }
  0x8b   :  { %1482 = vmatpush.bf16.msra.mxu2 %v5373_v37  ;;  %1445 = vmatmul.bf16.vlgmr.msrb.gmra.mxu1 %v8319_v55  ;;  %v7532_v37 = vld [vmem:[%s11877_s23 + $0x574] sm:$0xf0] }
  0x8c   :  { %1489 = vmatpush.bf16.msra.mxu1 %v5597_v48  ;;  %1470 = vmatpush.bf16.msra.mxu0 %v5229_v63  ;;  %v5661_v46 = vor.u32 %v7532_v37, %v5660_v36  ;;  %v7496_v48 = vld [vmem:[%s11877_s23 + $0x454] sm:$0xf0]  ;;  %v7478_v36 = vld [vmem:[%s11877_s23 + $0x3cc] sm:$0xf]  ;;  %v5454_v37 = vld [vmem:[%s11877_s23 + $0x3d8] sm:$0xf0] }
  0x8d   :  { %1458 = vmatmul.bf16.vlgmr.msrb.gmra.mxu3 %v8343_v4  ;;  %v5517_v56 = vor.u32 %v7496_v48, %v5516_v47  ;;  %v7492_v63 = vld [vmem:[%s11877_s23 + $0x434] sm:$0xf0]  ;;  %v7474_v47 = vld [vmem:[%s11877_s23 + $0x3ac] sm:$0xf] }
  0x8e   :  { %1502 = vmatpush.bf16.msra.mxu3 %v5725_v53  ;;  %v7366_v53 = vld [vmem:[%s11877_s23 + $0x4c] sm:$0xf] }
  0x8f   :  { %1483 = vmatpush.bf16.msra.mxu2 %v5357_v59  ;;  %1471 = vmatmul.bf16.vlgmr.msra.gmra.mxu0 %v8308_v51  ;;  %v7402_v59 = vld [vmem:[%s11877_s23 + $0x16c] sm:$0xf]  ;;  %v5009_v2 = vor.u32 %v7366_v53, %v5006_v58  ;;  %v5726_v53 = vld [vmem:[%s11877_s23 + $0x5f8] sm:$0xf0] }
  0x90   :  { %1490 = vmatpush.bf16.msra.mxu1 %v5581_v1  ;;  %1522 = vmatpush.bf16.msrb.mxu0 %v5741_v3  ;;  %v7524_v1 = vld [vmem:[%s11877_s23 + $0x534] sm:$0xf0]  ;;  %v7362_v3 = vld [vmem:[%s11877_s23 + $0x2c] sm:$0xf]  ;;  %v5153_v5 = vor.u32 %v7402_v59, %v5150_v60  ;;  %v5566_v60 = vld [vmem:[%s11877_s23 + $0x4b8] sm:$0xf0] }
  0x91   :  { %v5629_v10 = vor.u32 %v7524_v1, %v5628_v0  ;;  %v7390_v48 = vld [vmem:[%s11877_s23 + $0x10c] sm:$0xf]  ;;  %v5294_v0 = vld [vmem:[%s11877_s23 + $0x298] sm:$0xf0] }
  0x92   :  { %1503 = vmatpush.bf16.msra.mxu3 %v5709_v7  ;;  %1484 = vmatmul.bf16.vlgmr.msra.gmra.mxu2 %v8321_v57  ;;  %v4990_v7 = vld [vmem:[%s11877_s23 + $0x38] sm:$0xf0]  ;;  %v5105_v58 = vor.u32 %v7390_v48, %v5102_v49  ;;  %v7506_v59 = vld [vmem:[%s11877_s23 + $0x4ac] sm:$0xf]  ;;  %v9268_v49 = vld [vmem:[%s11860_s3] sm:$0xf] }
  0x93   :  { %1528 = vmatpush.bf16.msrb.mxu2 %v5089_v62  ;;  %v5500_v62 = vld [vmem:[%s11877_s23 + $0x428] sm:$0xf]  ;;  %v4993_v17 = vor.u32 %v7362_v3, %v4990_v7  ;;  %v7470_v1 = vld [vmem:[%s11877_s23 + $0x38c] sm:$0xf]  ;;  %v5710_v3 = vld [vmem:[%s11877_s23 + $0x5d8] sm:$0xf0] }
  0x94   :  { %1541 = vmatpush.bf16.msra.mxu0 %v5217_v14  ;;  %1491 = vmatpush.bf16.msra.mxu1 %v5565_v15  ;;  %v5501_v6 = vor.u32 %v7492_v63, %v5500_v62  ;;  %v7520_v14 = vld [vmem:[%s11877_s23 + $0x514] sm:$0xf0]  ;;  %v7450_v15 = vld [vmem:[%s11877_s23 + $0x2ec] sm:$0xf] }
  0x95   :  { %v5345_v25 = vor.u32 %v7450_v15, %v5342_v16  ;;  %v7438_v63 = vld [vmem:[%s11877_s23 + $0x28c] sm:$0xf]  ;;  %v5406_v15 = vld [vmem:[%s11877_s23 + $0x378] sm:$0xf0] }
  0x96   :  { %1504 = vmatpush.bf16.msra.mxu3 %v5693_v19  ;;  %v5470_v19 = vld [vmem:[%s11877_s23 + $0x3f8] sm:$0xf0]  ;;  %v7502_v7 = vld [vmem:[%s11877_s23 + $0x48c] sm:$0xf] }
  0x97   :  { %1529 = vmatpush.bf16.msrb.mxu2 %v5073_v12  ;;  %v7488_v12 = vld [vmem:[%s11877_s23 + $0x414] sm:$0xf0]  ;;  %v5473_v29 = vor.u32 %v7482_v18, %v5470_v19  ;;  %v7538_v16 = vld [vmem:[%s11877_s23 + $0x5ac] sm:$0xf]  ;;  %v5553_v18 = vor.u32 %v7502_v7, %v5550_v8 }
  0x98   :  { %1542 = vmatpush.bf16.msra.mxu0 %v5201_v26  ;;  %1492 = vmatpush.bf16.msra.mxu1 %v5549_v27  ;;  %v5485_v21 = vor.u32 %v7488_v12, %v5484_v11  ;;  %v7514_v26 = vld [vmem:[%s11877_s23 + $0x4ec] sm:$0xf]  ;;  %v5598_v27 = vld [vmem:[%s11877_s23 + $0x4f8] sm:$0xf0] }
  0x99   :  { %v7434_v11 = vld [vmem:[%s11877_s23 + $0x26c] sm:$0xf]  ;;  %v5278_v12 = vld [vmem:[%s11877_s23 + $0x278] sm:$0xf0] }
  0x9a   :  { %1505 = vmatpush.bf16.msra.mxu3 %v5677_v32  ;;  %v7394_v32 = vld [vmem:[%s11877_s23 + $0x12c] sm:$0xf]  ;;  %v5281_v19 = vor.u32 %v7434_v11, %v5278_v12 }
  0x9b   :  { %1530 = vmatpush.bf16.msrb.mxu2 %v5057_v24  ;;  %v5613_v24 = vor.u32 %v7520_v14, %v5612_v13  ;;  %v7466_v13 = vld [vmem:[%s11877_s23 + $0x36c] sm:$0xf] }
  0x9c   :  { %1543 = vmatpush.bf16.msra.mxu0 %v5185_v40  ;;  %1493 = vmatpush.bf16.msra.mxu1 %v5533_v41  ;;  %v5329_v40 = vor.u32 %v7446_v28, %v5326_v31  ;;  %v5121_v41 = vor.u32 %v7394_v32, %v5118_v33  ;;  %v5409_v22 = vor.u32 %v7466_v13, %v5406_v15  ;;  %v7534_v28 = vld [vmem:[%s11877_s23 + $0x58c] sm:$0xf]  ;;  %v5742_v15 = vld [vmem:[%s11877_s23 + $0x618] sm:$0xf0] }
  0x9d   :  { %v7486_v8 = vld [vmem:[%s11877_s23 + $0x40c] sm:$0xf] }
  0x9e   :  { %1506 = vmatpush.bf16.msra.mxu3 %v5661_v46  ;;  %v5457_v46 = vor.u32 %v7478_v36, %v5454_v37  ;;  %v5518_v36 = vld [vmem:[%s11877_s23 + $0x458] sm:$0xf0]  ;;  %v7550_v13 = vld [vmem:[%s11877_s23 + $0x60c] sm:$0xf] }
  0x9f   :  { %1531 = vmatpush.bf16.msrb.mxu2 %v5041_v38  ;;  %5748 = vmatmul.msk.bf16.vlgmr.msrb.gmra.mxu0 %vm1251_vm0, %v8431_v45  ;;  %v5601_v38 = vor.u32 %v7514_v26, %v5598_v27  ;;  %v5390_v27 = vld [vmem:[%s11877_s23 + $0x358] sm:$0xf0] }
  0xa0   :  { %1544 = vmatpush.bf16.msra.mxu0 %v5169_v54  ;;  %1494 = vmatpush.bf16.msra.mxu1 %v5517_v56  ;;  %v5585_v54 = vor.u32 %v7510_v39, %v5582_v42  ;;  %v5313_v56 = vor.u32 %v7442_v43, %v5310_v44  ;;  %v7458_v42 = vld [vmem:[%s11877_s23 + $0x32c] sm:$0xf]  ;;  %v5374_v43 = vld [vmem:[%s11877_s23 + $0x338] sm:$0xf0] }
  0xa1   :  { %v7530_v44 = vld [vmem:[%s11877_s23 + $0x56c] sm:$0xf] }
  0xa2   :  { %1507 = vmatpush.bf16.msra.mxu3 %v5645_v61  ;;  %v5441_v61 = vor.u32 %v7474_v47, %v5438_v50 }
  0xa3   :  { %1532 = vmatpush.bf16.msrb.mxu2 %v5025_v52  ;;  %v7546_v52 = vld [vmem:[%s11877_s23 + $0x5ec] sm:$0xf] }
  0xa4   :  { %1545 = vmatpush.bf16.msra.mxu0 %v5153_v5  ;;  %1495 = vmatpush.bf16.msra.mxu1 %v5501_v6  ;;  %v5729_v62 = vor.u32 %v7546_v52, %v5726_v53  ;;  %v5569_v5 = vor.u32 %v7506_v59, %v5566_v60  ;;  %v5297_v6 = vor.u32 %v7438_v63, %v5294_v0  ;;  %v7490_v52 = vld [vmem:[%s11877_s23 + $0x42c] sm:$0xf]  ;;  %v5502_v53 = vld [vmem:[%s11877_s23 + $0x438] sm:$0xf0] }
  0xa5   :  { %v5230_v59 = vld [vmem:[%s11877_s23 + $0x218] sm:$0xf0]  ;;  %v7454_v60 = vld [vmem:[%s11877_s23 + $0x30c] sm:$0xf] }
  0xa6   :  { %1508 = vmatpush.bf16.msra.mxu3 %v5629_v10  ;;  %v7526_v63 = vld [vmem:[%s11877_s23 + $0x54c] sm:$0xf]  ;;  %v5646_v0 = vld [vmem:[%s11877_s23 + $0x558] sm:$0xf0] }
  0xa7   :  { %1533 = vmatpush.bf16.msrb.mxu2 %v5009_v2  ;;  %v5422_v2 = vld [vmem:[%s11877_s23 + $0x398] sm:$0xf0]  ;;  %v5649_v12 = vor.u32 %v7526_v63, %v5646_v0  ;;  %v5832_v0 = vld [vmem:[%s11861_s4 + $0xa0] sm:$0xf] }
  0xa8   :  { %1546 = vmatpush.bf16.msra.mxu0 %v5137_v20  ;;  %1496 = vmatpush.bf16.msra.mxu1 %v5485_v21  ;;  %v5425_v9 = vor.u32 %v7470_v1, %v5422_v2  ;;  %v7498_v20 = vld [vmem:[%s11877_s23 + $0x46c] sm:$0xf]  ;;  %v5534_v21 = vld [vmem:[%s11877_s23 + $0x478] sm:$0xf0]  ;;  %v9226_v26 = vpop.f32.mrf.mxu1  ;;  %v5505_v2 = vor.u32 %v7490_v52, %v5502_v53  ;;  %v7560_v52 = vld [vmem:[%s11861_s4 + $0x34] sm:$0xf0] }
  0xa9   :  { %v5537_v31 = vor.u32 %v7498_v20, %v5534_v21 }
  0xaa   :  { %1509 = vmatpush.bf16.msra.mxu3 %v5613_v24  ;;  %v7430_v24 = vld [vmem:[%s11877_s23 + $0x24c] sm:$0xf] }
  0xab   :  { %1534 = vmatpush.bf16.msrb.mxu2 %v4993_v17  ;;  %1497 = vmatmul.bf16.vlgmr.msra.gmra.mxu1 %v8522_v30  ;;  %v9199_v14 = vpop.f32.mrf.mxu0  ;;  %v5694_v17 = vld [vmem:[%s11877_s23 + $0x5b8] sm:$0xf0] }
  0xac   :  { %1554 = vmatpush.bf16.msrb.mxu1 %v5345_v25  ;;  %1547 = vmatpush.bf16.msra.mxu0 %v5121_v41  ;;  %v5697_v23 = vor.u32 %v7538_v16, %v5694_v17  ;;  %v7462_v25 = vld [vmem:[%s11877_s23 + $0x34c] sm:$0xf]  ;;  %v5246_v41 = vld [vmem:[%s11877_s23 + $0x238] sm:$0xf0] }
  0xad   :  { %1510 = vmatmul.bf16.vlgmr.msra.gmra.mxu3 %v8533_v35 }
  0xae   :  { %1567 = vmatpush.bf16.msrb.mxu3 %v5473_v29  ;;  %v5678_v29 = vld [vmem:[%s11877_s23 + $0x598] sm:$0xf0] }
  0xaf   :  { %1535 = vmatpush.bf16.msrb.mxu2 %v4977_v34  ;;  %v7494_v34 = vld [vmem:[%s11877_s23 + $0x44c] sm:$0xf]  ;;  %v5681_v39 = vor.u32 %v7534_v28, %v5678_v29 }
  0xb0   :  { %1555 = vmatpush.bf16.msrb.mxu1 %v5329_v40  ;;  %1548 = vmatpush.bf16.msra.mxu0 %v5105_v58  ;;  %v9237_v32 = vpop.f32.mrf.mxu2  ;;  %v9245_v37 = vpop.f32.mrf.mxu3  ;;  %v7426_v40 = vld [vmem:[%s11877_s23 + $0x22c] sm:$0xf]  ;;  %v5521_v48 = vor.u32 %v7494_v34, %v5518_v36  ;;  %v7564_v34 = vld [vmem:[%s11861_s4 + $0x54] sm:$0xf0] }
  0xb1   :  { %v5249_v50 = vor.u32 %v7426_v40, %v5246_v41  ;;  %v1279_v1 = vpop.f32.mrf.mxu1 }
  0xb2   :  { %1568 = vmatpush.bf16.msrb.mxu3 %v5457_v46  ;;  %1536 = vmatmul.bf16.vlgmr.msrb.gmra.mxu2 %v8319_v55  ;;  %v7542_v55 = vld [vmem:[%s11877_s23 + $0x5cc] sm:$0xf]  ;;  %v5662_v46 = vld [vmem:[%s11877_s23 + $0x578] sm:$0xf0] }
  0xb3   :  { %1580 = vmatpush.bf16.msra.mxu2 %v5601_v38  ;;  %v5713_v10 = vor.u32 %v7542_v55, %v5710_v3  ;;  %1549 = vmatmul.bf16.vlgmr.msra.gmra.mxu0 %v8343_v4  ;;  %v5262_v4 = vld [vmem:[%s11877_s23 + $0x258] sm:$0xf0]  ;;  %v5393_v38 = vor.u32 %v7462_v25, %v5390_v27  ;;  %v1266_v47 = vpop.f32.mrf.mxu0  ;;  %v5665_v58 = vor.u32 %v7530_v44, %v5662_v46  ;;  %v7568_v55 = vld [vmem:[%s11861_s4 + $0x74] sm:$0xf0]  ;;  %v5872_v3 = vld [vmem:[%s11861_s4 + $0xf0] sm:$0xf] }
  0xb4   :  { %1556 = vmatpush.bf16.msrb.mxu1 %v5313_v56  ;;  %1593 = vmatpush.bf16.msrb.mxu0 %v5729_v62  ;;  %v5265_v33 = vor.u32 %v7430_v24, %v5262_v4  ;;  %v5377_v56 = vor.u32 %v7458_v42, %v5374_v43  ;;  %v5808_v62 = vld [vmem:[%s11861_s4 + $0x70] sm:$0xf]  ;;  %v5745_v24 = vor.u32 %v7550_v13, %v5742_v15  ;;  %v5864_v4 = vld [vmem:[%s11861_s4 + $0xe0] sm:$0xf]  ;;  %v7582_v25 = vld [vmem:[%s11861_s4 + $0xe4] sm:$0xf0] }
  0xb5   :  { %v5809_v17 = vor.u32 %v7568_v55, %v5808_v62  ;;  %v5865_v36 = vor.u32 %v7582_v25, %v5864_v4  ;;  %v7562_v43 = vld [vmem:[%s11861_s4 + $0x44] sm:$0xf0]  ;;  %v5768_v62 = vld [vmem:[%s11861_s4 + $0x20] sm:$0xf]  ;;  %v5760_v55 = vld [vmem:[%s11861_s4 + $0x10] sm:$0xf] }
  0xb6   :  { %1569 = vmatpush.bf16.msrb.mxu3 %v5441_v61  ;;  %v5358_v61 = vld [vmem:[%s11877_s23 + $0x318] sm:$0xf0]  ;;  %v7578_v46 = vld [vmem:[%s11861_s4 + $0xc4] sm:$0xf0]  ;;  %v5752_v15 = vld [vmem:[%s11861_s4] sm:$0xf] }
  0xb7   :  { %1581 = vmatpush.bf16.msra.mxu2 %v5585_v54  ;;  %v7422_v54 = vld [vmem:[%s11877_s23 + $0x20c] sm:$0xf]  ;;  %v5361_v11 = vor.u32 %v7454_v60, %v5358_v61 }
  0xb8   :  { %1557 = vmatpush.bf16.msrb.mxu1 %v5297_v6  ;;  %1594 = vmatpush.bf16.msrb.mxu0 %v5713_v10  ;;  %v1292_v6 = vpop.f32.mrf.mxu2  ;;  %v5233_v7 = vor.u32 %v7422_v54, %v5230_v59  ;;  %v263_v10 = vperm.slane %v9268_v49, 0  ;;  %v1305_v16 = vpop.f32.mrf.mxu3 }
  0xb9   :  { %v7554_v16 = vld [vmem:[%s11861_s4 + $0x4] sm:$0xf0] }
  0xba   :  { %1570 = vmatpush.bf16.msrb.mxu3 %v5425_v9  ;;  %v5486_v9 = vld [vmem:[%s11877_s23 + $0x418] sm:$0xf0]  ;;  %v1265_v27 = vadd.f32 %v9199_v14, %v263_v10  ;;  %v5792_v14 = vld [vmem:[%s11861_s4 + $0x50] sm:$0xf]  ;;  %v7572_v10 = vld [vmem:[%s11861_s4 + $0x94] sm:$0xf0] }
  0xbb   :  { %1582 = vmatpush.bf16.msra.mxu2 %v5569_v5  ;;  %v7584_v5 = vld [vmem:[%s11861_s4 + $0xf4] sm:$0xf0]  ;;  %v5489_v21 = vor.u32 %v7486_v8, %v5486_v9  ;;  %v5793_v42 = vor.u32 %v7564_v34, %v5792_v14  ;;  %v5824_v9 = vld [vmem:[%s11861_s4 + $0x90] sm:$0xf]  ;;  %v7581_v14 = vld [vmem:[%s11861_s4 + $0xe4] sm:$0xf] }
  0xbc   :  { %1558 = vmatpush.bf16.msrb.mxu1 %v5281_v19  ;;  %1595 = vmatpush.bf16.msrb.mxu0 %v5697_v23  ;;  %v5630_v19 = vld [vmem:[%s11877_s23 + $0x538] sm:$0xf0]  ;;  %v5873_v20 = vor.u32 %v7584_v5, %v5872_v3  ;;  %v7566_v23 = vld [vmem:[%s11861_s4 + $0x64] sm:$0xf0]  ;;  %v1278_v40 = vadd.f32 %v9226_v26, %v1265_v27  ;;  %v5848_v26 = vld [vmem:[%s11861_s4 + $0xc0] sm:$0xf] }
  0xbd   :  { %v5849_v53 = vor.u32 %v7578_v46, %v5848_v26  ;;  %v7556_v3 = vld [vmem:[%s11861_s4 + $0x14] sm:$0xf0]  ;;  %v5866_v34 = vld [vmem:[%s11861_s4 + $0xe8] sm:$0xf0] }
  0xbe   :  { %1571 = vmatpush.bf16.msrb.mxu3 %v5409_v22  ;;  %v5800_v22 = vld [vmem:[%s11861_s4 + $0x60] sm:$0xf] }
  0xbf   :  { %1583 = vmatpush.bf16.msra.mxu2 %v5553_v18  ;;  %v7522_v18 = vld [vmem:[%s11877_s23 + $0x52c] sm:$0xf]  ;;  %v5801_v29 = vor.u32 %v7566_v23, %v5800_v22  ;;  %v5874_v22 = vld [vmem:[%s11861_s4 + $0xf8] sm:$0xf0]  ;;  %v5753_v23 = vor.u32 %v7554_v16, %v5752_v15 }
  0xc0   :  { %1559 = vmatpush.bf16.msrb.mxu1 %v5265_v33  ;;  %1596 = vmatpush.bf16.msrb.mxu0 %v5681_v39  ;;  %v5633_v28 = vor.u32 %v7522_v18, %v5630_v19  ;;  %v5614_v33 = vld [vmem:[%s11877_s23 + $0x518] sm:$0xf0]  ;;  %v5856_v39 = vld [vmem:[%s11861_s4 + $0xd0] sm:$0xf]  ;;  %v5825_v18 = vor.u32 %v7572_v10, %v5824_v9  ;;  %v5816_v19 = vld [vmem:[%s11861_s4 + $0x80] sm:$0xf] }
  0xc1   :  { %v7573_v9 = vld [vmem:[%s11861_s4 + $0xa4] sm:$0xf]  ;;  %v5834_v10 = vld [vmem:[%s11861_s4 + $0xa8] sm:$0xf0]  ;;  %v5762_v15 = vld [vmem:[%s11861_s4 + $0x18] sm:$0xf0] }
  0xc2   :  { %1572 = vmatpush.bf16.msrb.mxu3 %v5393_v38  ;;  %v1342_v38 = vpop.f32.mrf.mxu2 }
  0xc3   :  { %1584 = vmatpush.bf16.msra.mxu2 %v5537_v31  ;;  %v7518_v31 = vld [vmem:[%s11877_s23 + $0x50c] sm:$0xf] }
  0xc4   :  { %1560 = vmatpush.bf16.msrb.mxu1 %v5249_v50  ;;  %1597 = vmatpush.bf16.msrb.mxu0 %v5665_v58  ;;  %v5617_v41 = vor.u32 %v7518_v31, %v5614_v33  ;;  %v5776_v50 = vld [vmem:[%s11861_s4 + $0x30] sm:$0xf]  ;;  %v7576_v58 = vld [vmem:[%s11861_s4 + $0xb4] sm:$0xf0] }
  0xc5   :  { %v5777_v60 = vor.u32 %v7560_v52, %v5776_v50  ;;  %v7561_v50 = vld [vmem:[%s11861_s4 + $0x44] sm:$0xf]  ;;  %v5786_v52 = vld [vmem:[%s11861_s4 + $0x48] sm:$0xf0] }
  0xc6   :  { %1573 = vmatpush.bf16.msrb.mxu3 %v5377_v56 }
  0xc7   :  { %1585 = vmatpush.bf16.msra.mxu2 %v5521_v48  ;;  %v1316_v48 = vpop.f32.mrf.mxu0 }
  0xc8   :  { %1561 = vmatpush.bf16.msrb.mxu1 %v5233_v7  ;;  %1598 = vmatpush.bf16.msrb.mxu0 %v5649_v12  ;;  %v5761_v12 = vor.u32 %v7556_v3, %v5760_v55 }
  0xca   :  { %1574 = vmatpush.bf16.msrb.mxu3 %v5361_v11  ;;  %v1329_v54 = vpop.f32.mrf.mxu1  ;;  %v1344_v56 = vpop.f32.mrf.mxu2 }
  0xcb   :  { %1586 = vmatpush.bf16.msra.mxu2 %v5505_v2  ;;  %1562 = vmatmul.bf16.vlgmr.msrb.gmra.mxu1 %v8308_v51  ;;  %v7580_v51 = vld [vmem:[%s11861_s4 + $0xd4] sm:$0xf0] }
  0xcc   :  { %2030 = vmatpush.bf16.msra.mxu1 %v5873_v20  ;;  %1599 = vmatpush.bf16.msrb.mxu0 %v5633_v28  ;;  %v5857_v44 = vor.u32 %v7580_v51, %v5856_v39  ;;  %v7570_v20 = vld [vmem:[%s11861_s4 + $0x84] sm:$0xf0]  ;;  %v7565_v28 = vld [vmem:[%s11861_s4 + $0x64] sm:$0xf]  ;;  %v7563_v51 = vld [vmem:[%s11861_s4 + $0x54] sm:$0xf] }
  0xcd   :  { %1575 = vmatmul.bf16.vlgmr.msrb.gmra.mxu3 %v8321_v57  ;;  %v5784_v57 = vld [vmem:[%s11861_s4 + $0x40] sm:$0xf]  ;;  %v5817_v27 = vor.u32 %v7570_v20, %v5816_v19  ;;  %v7594_v19 = vld [vmem:[%s11861_s4 + $0x144] sm:$0xf0] }
  0xce   :  { %2017 = vmatpush.bf16.msra.mxu3 %v5809_v17  ;;  %v5785_v47 = vor.u32 %v7562_v43, %v5784_v57  ;;  %v7567_v17 = vld [vmem:[%s11861_s4 + $0x74] sm:$0xf]  ;;  %v5858_v43 = vld [vmem:[%s11861_s4 + $0xd8] sm:$0xf0] }
  0xcf   :  { %1587 = vmatpush.bf16.msra.mxu2 %v5489_v21  ;;  %v1318_v5 = vpop.f32.mrf.mxu0  ;;  %v7583_v21 = vld [vmem:[%s11861_s4 + $0xf4] sm:$0xf] }
  0xd0   :  { %2031 = vmatpush.bf16.msra.mxu1 %v5865_v36  ;;  %1600 = vmatpush.bf16.msrb.mxu0 %v5617_v41  ;;  %v1355_v6 = vpop.f32.mrf.mxu3  ;;  %v5877_v31 = vor.u32 %v7583_v21, %v5874_v22  ;;  %v264_v36 = vperm.slane %v9268_v49, 1  ;;  %v5869_v41 = vor.u32 %v7581_v14, %v5866_v34  ;;  %v7579_v57 = vld [vmem:[%s11861_s4 + $0xd4] sm:$0xf]  ;;  %v7557_v5 = vld [vmem:[%s11861_s4 + $0x24] sm:$0xf] }
  0xd1   :  { %v5826_v21 = vld [vmem:[%s11861_s4 + $0x98] sm:$0xf0]  ;;  %v5896_v14 = vld [vmem:[%s11861_s4 + $0x120] sm:$0xf]  ;;  %v7590_v34 = vld [vmem:[%s11861_s4 + $0x124] sm:$0xf0] }
  0xd2   :  { %2018 = vmatpush.bf16.msra.mxu3 %v5801_v29  ;;  %1588 = vmatmul.bf16.vlgmr.msra.gmra.mxu2 %v8522_v30  ;;  %v1291_v30 = vadd.f32 %v9237_v32, %v1278_v40  ;;  %v5840_v32 = vld [vmem:[%s11861_s4 + $0xb0] sm:$0xf]  ;;  %v1331_v8 = vpop.f32.mrf.mxu1  ;;  %v5802_v29 = vld [vmem:[%s11861_s4 + $0x68] sm:$0xf0]  ;;  %v5794_v40 = vld [vmem:[%s11861_s4 + $0x58] sm:$0xf0]  ;;  %v1356_v26 = vadd.f32 %v1355_v6, %v264_v36 }
  0xd3   :  { %1613 = vmatpush.bf16.msrb.mxu2 %v5745_v24  ;;  %1601 = vmatmul.bf16.vlgmr.msrb.gmra.mxu0 %v8533_v35  ;;  %v7558_v35 = vld [vmem:[%s11861_s4 + $0x24] sm:$0xf0]  ;;  %v5841_v63 = vor.u32 %v7576_v58, %v5840_v32  ;;  %v5805_v39 = vor.u32 %v7565_v28, %v5802_v29  ;;  %v5850_v32 = vld [vmem:[%s11861_s4 + $0xc8] sm:$0xf0]  ;;  %v5920_v58 = vld [vmem:[%s11861_s4 + $0x150] sm:$0xf] }
  0xd4   :  { %2032 = vmatpush.bf16.msra.mxu1 %v5857_v44  ;;  %v1304_v59 = vadd.f32 %v9245_v37, %v1291_v30  ;;  %v7574_v37 = vld [vmem:[%s11861_s4 + $0xa4] sm:$0xf0]  ;;  %v5769_v1 = vor.u32 %v7558_v35, %v5768_v62  ;;  %v7600_v44 = vld [vmem:[%s11861_s4 + $0x174] sm:$0xf0]  ;;  %v5928_v30 = vld [vmem:[%s11861_s4 + $0x160] sm:$0xf] }
  0xd5   :  { %v5833_v7 = vor.u32 %v7574_v37, %v5832_v0  ;;  %v1368_v11 = vpop.f32.mrf.mxu2  ;;  %v7559_v62 = vld [vmem:[%s11861_s4 + $0x34] sm:$0xf]  ;;  %v5778_v35 = vld [vmem:[%s11861_s4 + $0x38] sm:$0xf0]  ;;  %v5770_v6 = vld [vmem:[%s11861_s4 + $0x28] sm:$0xf0] }
  0xd6   :  { %2019 = vmatpush.bf16.msra.mxu3 %v5793_v42  ;;  %v1317_v61 = vadd.f32 %v1316_v48, %v1304_v59  ;;  %v5936_v42 = vld [vmem:[%s11861_s4 + $0x170] sm:$0xf]  ;;  %v5797_v48 = vor.u32 %v7563_v51, %v5794_v40  ;;  %v7596_v59 = vld [vmem:[%s11861_s4 + $0x154] sm:$0xf0]  ;;  %v5781_v3 = vor.u32 %v7559_v62, %v5778_v35  ;;  %v7553_v28 = vld [vmem:[%s11861_s4 + $0x4] sm:$0xf] }
  0xd7   :  { %v5937_v46 = vor.u32 %v7600_v44, %v5936_v42  ;;  %v5921_v0 = vor.u32 %v7596_v59, %v5920_v58  ;;  %v5818_v51 = vld [vmem:[%s11861_s4 + $0x88] sm:$0xf0]  ;;  %v5897_v42 = vor.u32 %v7590_v34, %v5896_v14  ;;  %v5888_v44 = vld [vmem:[%s11861_s4 + $0x110] sm:$0xf]  ;;  %v7599_v58 = vld [vmem:[%s11861_s4 + $0x174] sm:$0xf] }
  0xd8   :  { %2033 = vmatpush.bf16.msra.mxu1 %v5849_v53  ;;  %v1330_v2 = vadd.f32 %v1329_v54, %v1317_v61  ;;  %v1357_v25 = vpop.f32.mrf.mxu3  ;;  %v5861_v53 = vor.u32 %v7579_v57, %v5858_v43  ;;  %v7577_v54 = vld [vmem:[%s11861_s4 + $0xc4] sm:$0xf]  ;;  %v5789_v61 = vor.u32 %v7561_v50, %v5786_v52  ;;  %v5880_v52 = vld [vmem:[%s11861_s4 + $0x100] sm:$0xf]  ;;  %v5938_v59 = vld [vmem:[%s11861_s4 + $0x178] sm:$0xf0] }
  0xd9   :  { %2043 = vmatpush.bf16.msra.mxu2 %v5937_v46 }
  0xda   :  { %2020 = vmatpush.bf16.msra.mxu3 %v5785_v47  ;;  %v1343_v13 = vadd.f32 %v1342_v38, %v1330_v2  ;;  %v7598_v47 = vld [vmem:[%s11861_s4 + $0x164] sm:$0xf0]  ;;  %v5842_v2 = vld [vmem:[%s11861_s4 + $0xb8] sm:$0xf0] }
  0xdb   :  { %v5929_v56 = vor.u32 %v7598_v47, %v5928_v30 }
  0xdc   :  { %2034 = vmatpush.bf16.msra.mxu1 %v5841_v63  ;;  %v1619_v24 = vmax.f32 %v1343_v13, 0.0  ;;  %v5853_v63 = vor.u32 %v7577_v54, %v5850_v32  ;;  %v7555_v13 = vld [vmem:[%s11861_s4 + $0x14] sm:$0xf] }
  0xdd   :  { %v1370_v33 = vpop.f32.mrf.mxu2  ;;  %2044 = vmatpush.bf16.msra.mxu2 %v5929_v56 }
  0xde   :  { %2021 = vmatpush.bf16.msra.mxu3 %v5777_v60  ;;  %v9450_v38 = vpack.c.bf16 %v1619_v24, %v1619_v24  ;;  %v1369_v60 = vadd.f32 %v1368_v11, %v1356_v26  ;;  %v7592_v24 = vld [vmem:[%s11861_s4 + $0x134] sm:$0xf0] }
  0xdf   :  { %v7588_v26 = vld [vmem:[%s11861_s4 + $0x114] sm:$0xf0] }
  0xe0   :  { %2035 = vmatpush.bf16.msra.mxu1 %v5833_v7 }
  0xe1   :  { %2045 = vmatpush.bf16.msra.mxu2 %v5921_v0  ;;  %v5922_v0 = vld [vmem:[%s11861_s4 + $0x158] sm:$0xf0] }
  0xe2   :  { %2022 = vmatpush.bf16.msra.mxu3 %v5769_v1  ;;  %5749 = vmatmul.msk.bf16.vlgmr.msrb.gmra.mxu2 %vm1251_vm0, %v8431_v45  ;;  %v5810_v45 = vld [vmem:[%s11861_s4 + $0x78] sm:$0xf0]  ;;  %v7575_v1 = vld [vmem:[%s11861_s4 + $0xb4] sm:$0xf] }
  0xe3   :  { %v5813_v4 = vor.u32 %v7567_v17, %v5810_v45  ;;  %v5845_v7 = vor.u32 %v7575_v1, %v5842_v2  ;;  %v5837_v17 = vor.u32 %v7573_v9, %v5834_v10  ;;  %v5912_v45 = vld [vmem:[%s11861_s4 + $0x140] sm:$0xf]  ;;  %v7593_v2 = vld [vmem:[%s11861_s4 + $0x144] sm:$0xf]  ;;  %v5906_v9 = vld [vmem:[%s11861_s4 + $0x138] sm:$0xf0] }
  0xe4   :  { %2036 = vmatpush.bf16.msra.mxu1 %v5825_v18  ;;  %v7571_v18 = vld [vmem:[%s11861_s4 + $0x94] sm:$0xf]  ;;  %v5913_v22 = vor.u32 %v7594_v19, %v5912_v45  ;;  %v7614_v19 = vld [vmem:[%s11861_s4 + $0x1e4] sm:$0xf0] }
  0xe5   :  { %v5829_v33 = vor.u32 %v7571_v18, %v5826_v21  ;;  %v5992_v18 = vld [vmem:[%s11861_s4 + $0x1e0] sm:$0xf]  ;;  %v7587_v21 = vld [vmem:[%s11861_s4 + $0x114] sm:$0xf] }
  0xe6   :  { %2023 = vmatpush.bf16.msra.mxu3 %v5761_v12  ;;  %v5773_v12 = vor.u32 %v7557_v5, %v5770_v6  ;;  %2046 = vmatpush.bf16.msra.mxu2 %v5913_v22  ;;  %v5890_v22 = vld [vmem:[%s11861_s4 + $0x118] sm:$0xf0] }
  0xe7   :  { %v1381_v37 = vpop.f32.mrf.mxu0 }
  0xe8   :  { %2037 = vmatpush.bf16.msra.mxu1 %v5817_v27  ;;  %v1382_v55 = vadd.f32 %v1381_v37, %v1369_v60  ;;  %v5765_v27 = vor.u32 %v7555_v13, %v5762_v15  ;;  %v5941_v60 = vor.u32 %v7599_v58, %v5938_v59  ;;  %v7616_v13 = vld [vmem:[%s11861_s4 + $0x1f4] sm:$0xf0] }
  0xea   :  { %2024 = vmatpush.bf16.msra.mxu3 %v5753_v23  ;;  %v1394_v8 = vpop.f32.mrf.mxu1  ;;  %v5904_v23 = vld [vmem:[%s11861_s4 + $0x130] sm:$0xf] }
  0xeb   :  { %v1395_v11 = vadd.f32 %v1394_v8, %v1382_v55  ;;  %v5905_v29 = vor.u32 %v7592_v24, %v5904_v23  ;;  %v5914_v55 = vld [vmem:[%s11861_s4 + $0x148] sm:$0xf0]  ;;  %v7591_v8 = vld [vmem:[%s11861_s4 + $0x134] sm:$0xf]  ;;  %v5984_v23 = vld [vmem:[%s11861_s4 + $0x1d0] sm:$0xf] }
  0xec   :  { %2082 = vmatpush.bf16.msrb.mxu1 %v5877_v31  ;;  %v5754_v31 = vld [vmem:[%s11861_s4 + $0x8] sm:$0xf0]  ;;  %v5917_v5 = vor.u32 %v7593_v2, %v5914_v55  ;;  %v7612_v24 = vld [vmem:[%s11861_s4 + $0x1d4] sm:$0xf0] }
  0xed   :  { %2025 = vmatmul.bf16.vlgmr.msra.gmra.mxu3 %v9450_v38  ;;  %2047 = vmatpush.bf16.msra.mxu2 %v5905_v29  ;;  %v5985_v29 = vor.u32 %v7612_v24, %v5984_v23  ;;  %v7603_v24 = vld [vmem:[%s11861_s4 + $0x194] sm:$0xf] }
  0xee   :  { %2069 = vmatpush.bf16.msrb.mxu3 %v5813_v4 }
  0xef   :  { %v1383_v20 = vpop.f32.mrf.mxu0 }
  0xf0   :  { %2083 = vmatpush.bf16.msrb.mxu1 %v5869_v41  ;;  %v1407_v16 = vpop.f32.mrf.mxu3  ;;  %v5757_v41 = vor.u32 %v7553_v28, %v5754_v31  ;;  %v5993_v20 = vor.u32 %v7614_v19, %v5992_v18  ;;  %v5893_v28 = vor.u32 %v7587_v21, %v5890_v22  ;;  %v7585_v31 = vld [vmem:[%s11861_s4 + $0x104] sm:$0xf]  ;;  %v5970_v18 = vld [vmem:[%s11861_s4 + $0x1b8] sm:$0xf0]  ;;  %v5962_v21 = vld [vmem:[%s11861_s4 + $0x1a8] sm:$0xf0] }
  0xf1   :  { %v1408_v4 = vadd.f32 %v1407_v16, %v1395_v11  ;;  %2048 = vmatpush.bf16.msra.mxu2 %v5897_v42  ;;  %v5909_v11 = vor.u32 %v7591_v8, %v5906_v9  ;;  %v7589_v16 = vld [vmem:[%s11861_s4 + $0x124] sm:$0xf]  ;;  %v266_v22 = vperm.slane %v9268_v49, 3 }
  0xf2   :  { %2070 = vmatpush.bf16.msrb.mxu3 %v5805_v39  ;;  %v1396_v36 = vpop.f32.mrf.mxu1  ;;  %v7569_v39 = vld [vmem:[%s11861_s4 + $0x84] sm:$0xf] }
  0xf3   :  { %v5821_v57 = vor.u32 %v7569_v39, %v5818_v51  ;;  %v5976_v39 = vld [vmem:[%s11861_s4 + $0x1c0] sm:$0xf]  ;;  %v7610_v51 = vld [vmem:[%s11861_s4 + $0x1c4] sm:$0xf0] }
  0xf4   :  { %2084 = vmatpush.bf16.msrb.mxu1 %v5861_v53  ;;  %v7586_v53 = vld [vmem:[%s11861_s4 + $0x104] sm:$0xf0] }
  0xf5   :  { %v1420_v25 = vpop.f32.mrf.mxu2  ;;  %v5881_v56 = vor.u32 %v7586_v53, %v5880_v52 }
  0xf6   :  { %2071 = vmatpush.bf16.msrb.mxu3 %v5797_v48  ;;  %v1421_v40 = vadd.f32 %v1420_v25, %v1408_v4  ;;  %v5889_v48 = vor.u32 %v7588_v26, %v5888_v44  ;;  %v265_v4 = vperm.slane %v9268_v49, 2  ;;  %v7601_v49 = vld [vmem:[%s11861_s4 + $0x184] sm:$0xf] }
  0xf7   :  { %v1433_v46 = vpop.f32.mrf.mxu0 }
  0xf8   :  { %2085 = vmatpush.bf16.msrb.mxu1 %v5853_v63  ;;  %v1409_v43 = vpop.f32.mrf.mxu3  ;;  %v1434_v30 = vadd.f32 %v1433_v46, %v1421_v40  ;;  %2049 = vmatpush.bf16.msra.mxu2 %v5889_v48  ;;  %v7595_v63 = vld [vmem:[%s11861_s4 + $0x154] sm:$0xf] }
  0xf9   :  { %v5925_v1 = vor.u32 %v7595_v63, %v5922_v0  ;;  %v7608_v43 = vld [vmem:[%s11861_s4 + $0x1b4] sm:$0xf0] }
  0xfa   :  { %2072 = vmatpush.bf16.msrb.mxu3 %v5789_v61  ;;  %v1620_v50 = vmax.f32 %v1434_v30, 0.0  ;;  %v7597_v61 = vld [vmem:[%s11861_s4 + $0x164] sm:$0xf]  ;;  %v5960_v30 = vld [vmem:[%s11861_s4 + $0x1a0] sm:$0xf] }
  0xfc   :  { %2086 = vmatpush.bf16.msrb.mxu1 %v5845_v7  ;;  %v1624_v54 = vpack.c.bf16 %v1620_v50, %v1620_v50  ;;  %2050 = vmatpush.bf16.msra.mxu2 %v5881_v56  ;;  %v7604_v56 = vld [vmem:[%s11861_s4 + $0x194] sm:$0xf0] }
  0xfd   :  { %v1422_v47 = vpop.f32.mrf.mxu2 }
  0xfe   :  { %2073 = vmatpush.bf16.msrb.mxu3 %v5781_v3  ;;  %2038 = vmatmul.bf16.vlgmr.msra.gmra.mxu1 %v1624_v54  ;;  %v7606_v47 = vld [vmem:[%s11861_s4 + $0x1a4] sm:$0xf0] }
  0xff   :  { %v1435_v32 = vpop.f32.mrf.mxu0  ;;  %v5961_v50 = vor.u32 %v7606_v47, %v5960_v30 }
 0x100   :  { %2087 = vmatpush.bf16.msrb.mxu1 %v5837_v17  ;;  %2095 = vmatpush.bf16.msrb.mxu2 %v5941_v60  ;;  %v5898_v17 = vld [vmem:[%s11861_s4 + $0x128] sm:$0xf0] }
 0x101   :  { %v5901_v45 = vor.u32 %v7589_v16, %v5898_v17  ;;  %v7607_v17 = vld [vmem:[%s11861_s4 + $0x1b4] sm:$0xf] }
 0x102   :  { %2074 = vmatpush.bf16.msrb.mxu3 %v5773_v12  ;;  %v6000_v12 = vld [vmem:[%s11861_s4 + $0x1f0] sm:$0xf]  ;;  %v5973_v19 = vor.u32 %v7607_v17, %v5970_v18  ;;  %v6040_v18 = vld [vmem:[%s11863_s6 + $0x40] sm:$0xf] }
 0x103   :  { %v6001_v15 = vor.u32 %v7616_v13, %v6000_v12  ;;  %v7609_v13 = vld [vmem:[%s11861_s4 + $0x1c4] sm:$0xf] }
 0x104   :  { %2088 = vmatpush.bf16.msrb.mxu1 %v5829_v33  ;;  %v5882_v33 = vld [vmem:[%s11861_s4 + $0x108] sm:$0xf0] }
 0x105   :  { %2056 = vmatpush.bf16.msra.mxu0 %v6001_v15  ;;  %v5885_v36 = vor.u32 %v7585_v31, %v5882_v33  ;;  %v5978_v15 = vld [vmem:[%s11861_s4 + $0x1c8] sm:$0xf0] }
 0x106   :  { %2075 = vmatpush.bf16.msrb.mxu3 %v5765_v27  ;;  %v5981_v16 = vor.u32 %v7609_v13, %v5978_v15  ;;  %v7627_v13 = vld [vmem:[%s11863_s6 + $0x54] sm:$0xf] }
 0x108   :  { %2089 = vmatpush.bf16.msrb.mxu1 %v5821_v57  ;;  %v1446_v35 = vpop.f32.mrf.mxu1  ;;  %v5968_v57 = vld [vmem:[%s11861_s4 + $0x1b0] sm:$0xf] }
 0x109   :  { %2057 = vmatpush.bf16.msra.mxu0 %v5993_v20  ;;  %v1447_v34 = vadd.f32 %v1446_v35, %v265_v4  ;;  %v5969_v46 = vor.u32 %v7608_v43, %v5968_v57  ;;  %v7605_v20 = vld [vmem:[%s11861_s4 + $0x1a4] sm:$0xf]  ;;  %v5954_v4 = vld [vmem:[%s11861_s4 + $0x198] sm:$0xf0] }
 0x10a   :  { %2076 = vmatpush.bf16.msrb.mxu3 %v5757_v41  ;;  %v5977_v41 = vor.u32 %v7610_v51, %v5976_v39  ;;  %v5965_v23 = vor.u32 %v7605_v20, %v5962_v21  ;;  %v6042_v21 = vld [vmem:[%s11863_s6 + $0x48] sm:$0xf0] }
 0x10c   :  { %v1472_v37 = vpop.f32.mrf.mxu0 }
 0x10d   :  { %2077 = vmatmul.bf16.vlgmr.msrb.gmra.mxu3 %v9450_v38  ;;  %v5930_v38 = vld [vmem:[%s11861_s4 + $0x168] sm:$0xf0]  ;;  %2058 = vmatpush.bf16.msra.mxu0 %v5985_v29 }
 0x10e   :  { %v5933_v62 = vor.u32 %v7597_v61, %v5930_v38  ;;  %2090 = vmatmul.bf16.vlgmr.msrb.gmra.mxu1 %v1624_v54  ;;  %v5952_v54 = vld [vmem:[%s11861_s4 + $0x190] sm:$0xf]  ;;  %v5944_v38 = vld [vmem:[%s11861_s4 + $0x180] sm:$0xf] }
 0x10f   :  { %v5953_v59 = vor.u32 %v7604_v56, %v5952_v54 }
 0x110   :  { %2096 = vmatpush.bf16.msrb.mxu2 %v5933_v62  ;;  %v1448_v3 = vpop.f32.mrf.mxu1  ;;  %v1459_v7 = vpop.f32.mrf.mxu3  ;;  %v7602_v62 = vld [vmem:[%s11861_s4 + $0x184] sm:$0xf0] }
 0x111   :  { %v1460_v40 = vadd.f32 %v1459_v7, %v1447_v34  ;;  %2059 = vmatpush.bf16.msra.mxu0 %v5977_v41  ;;  %v5945_v63 = vor.u32 %v7602_v62, %v5944_v38  ;;  %v7613_v3 = vld [vmem:[%s11861_s4 + $0x1e4] sm:$0xf] }
 0x113   :  { %v1473_v44 = vadd.f32 %v1472_v37, %v1460_v40  ;;  %v7615_v37 = vld [vmem:[%s11861_s4 + $0x1f4] sm:$0xf] }
 0x114   :  { %2097 = vmatpush.bf16.msrb.mxu2 %v5925_v1  ;;  %v1474_v10 = vpop.f32.mrf.mxu0  ;;  %v6002_v1 = vld [vmem:[%s11861_s4 + $0x1f8] sm:$0xf0] }
 0x115   :  { %v1485_v6 = vpop.f32.mrf.mxu2  ;;  %2060 = vmatpush.bf16.msra.mxu0 %v5969_v46  ;;  %v6005_v2 = vor.u32 %v7615_v37, %v6002_v1  ;;  %v7611_v10 = vld [vmem:[%s11861_s4 + $0x1d4] sm:$0xf]  ;;  %v7632_v37 = vld [vmem:[%s11863_s6 + $0x74] sm:$0xf0] }
 0x116   :  { %v1486_v48 = vadd.f32 %v1485_v6, %v1473_v44  ;;  %v7631_v1 = vld [vmem:[%s11863_s6 + $0x74] sm:$0xf] }
 0x118   :  { %2098 = vmatpush.bf16.msrb.mxu2 %v5917_v5  ;;  %v1461_v27 = vpop.f32.mrf.mxu3  ;;  %v5994_v5 = vld [vmem:[%s11861_s4 + $0x1e8] sm:$0xf0] }
 0x119   :  { %2061 = vmatpush.bf16.msra.mxu0 %v5961_v50  ;;  %v5997_v7 = vor.u32 %v7613_v3, %v5994_v5  ;;  %v6056_v5 = vld [vmem:[%s11863_s6 + $0x60] sm:$0xf] }
 0x11c   :  { %2099 = vmatpush.bf16.msrb.mxu2 %v5909_v11  ;;  %v1524_v14 = vpop.f32.mrf.mxu0  ;;  %v5986_v11 = vld [vmem:[%s11861_s4 + $0x1d8] sm:$0xf0] }
 0x11d   :  { %v1487_v25 = vpop.f32.mrf.mxu2  ;;  %2062 = vmatpush.bf16.msra.mxu0 %v5953_v59  ;;  %v5989_v12 = vor.u32 %v7611_v10, %v5986_v11  ;;  %v6048_v11 = vld [vmem:[%s11863_s6 + $0x50] sm:$0xf] }
 0x11e   :  { %v5957_v25 = vor.u32 %v7603_v24, %v5954_v4  ;;  %v6128_v4 = vld [vmem:[%s11863_s6 + $0xf0] sm:$0xf] }
 0x120   :  { %2100 = vmatpush.bf16.msrb.mxu2 %v5901_v45 }
 0x121   :  { %2063 = vmatpush.bf16.msra.mxu0 %v5945_v63 }
 0x124   :  { %2101 = vmatpush.bf16.msrb.mxu2 %v5893_v28  ;;  %v1526_v42 = vpop.f32.mrf.mxu0 }
 0x125   :  { %2108 = vmatpush.bf16.msrb.mxu0 %v6005_v2 }
 0x128   :  { %2102 = vmatpush.bf16.msrb.mxu2 %v5885_v36  ;;  %v1498_v26 = vpop.f32.mrf.mxu1 }
 0x129   :  { %v1499_v52 = vadd.f32 %v1498_v26, %v1486_v48  ;;  %2109 = vmatpush.bf16.msrb.mxu0 %v5997_v7  ;;  %v7629_v7 = vld [vmem:[%s11863_s6 + $0x64] sm:$0xf] }
 0x12d   :  { %2110 = vmatpush.bf16.msrb.mxu0 %v5989_v12  ;;  %v7628_v12 = vld [vmem:[%s11863_s6 + $0x54] sm:$0xf0] }
 0x12e   :  { %v6049_v15 = vor.u32 %v7628_v12, %v6048_v11  ;;  %v6096_v11 = vld [vmem:[%s11863_s6 + $0xb0] sm:$0xf]  ;;  %v7640_v12 = vld [vmem:[%s11863_s6 + $0xb4] sm:$0xf0] }
 0x130   :  { %v1511_v53 = vpop.f32.mrf.mxu3  ;;  %v1500_v58 = vpop.f32.mrf.mxu1 }
 0x131   :  { %v1512_v32 = vadd.f32 %v1511_v53, %v1499_v52  ;;  %v1550_v61 = vpop.f32.mrf.mxu0  ;;  %2111 = vmatpush.bf16.msrb.mxu0 %v5981_v16  ;;  %v1691_v52 = vld [vmem:[%s11862_s5] sm:$0x3]  ;;  %v6050_v16 = vld [vmem:[%s11863_s6 + $0x58] sm:$0xf0] }
 0x132   :  { %v1693_v53 = vperm.slane %v1691_v52, 0  ;;  %v6053_v17 = vor.u32 %v7627_v13, %v6050_v16  ;;  %v7639_v13 = vld [vmem:[%s11863_s6 + $0xb4] sm:$0xf]  ;;  %v6098_v16 = vld [vmem:[%s11863_s6 + $0xb8] sm:$0xf0] }
 0x133   :  { %v1525_v35 = vadd.f32 %v1524_v14, %v1512_v32  ;;  %v5946_v14 = vld [vmem:[%s11861_s4 + $0x188] sm:$0xf0] }
 0x134   :  { %v5949_v36 = vor.u32 %v7601_v49, %v5946_v14 }
 0x135   :  { %v1537_v60 = vpop.f32.mrf.mxu2  ;;  %v1621_v0 = vmax.f32 %v1525_v35, 0.0  ;;  %2112 = vmatpush.bf16.msrb.mxu0 %v5973_v19  ;;  %v7625_v19 = vld [vmem:[%s11863_s6 + $0x44] sm:$0xf] }
 0x136   :  { %v1538_v28 = vadd.f32 %v1537_v60, %v266_v22  ;;  %v1694_v60 = vperm.slane %v1691_v52, 1  ;;  %v6032_v22 = vld [vmem:[%s11863_s6 + $0x30] sm:$0xf]  ;;  %v6045_v24 = vor.u32 %v7625_v19, %v6042_v21  ;;  %v7637_v19 = vld [vmem:[%s11863_s6 + $0xa4] sm:$0xf] }
 0x137   :  { %v1625_v55 = vpack.c.bf16 %v1621_v0, %v1621_v0  ;;  %v6064_v0 = vld [vmem:[%s11863_s6 + $0x70] sm:$0xf]  ;;  %v6090_v21 = vld [vmem:[%s11863_s6 + $0xa8] sm:$0xf0] }
 0x138   :  { %v1513_v6 = vpop.f32.mrf.mxu3  ;;  %v1551_v34 = vadd.f32 %v1550_v61, %v1538_v28  ;;  %v6065_v2 = vor.u32 %v7632_v37, %v6064_v0  ;;  %v6112_v52 = vld [vmem:[%s11863_s6 + $0xd0] sm:$0xf]  ;;  %v6008_v0 = vld [vmem:[%s11863_s6] sm:$0xf]  ;;  %v7618_v37 = vld [vmem:[%s11863_s6 + $0x4] sm:$0xf0] }
 0x139   :  { %2051 = vmatmul.bf16.vlgmr.msra.gmra.mxu2 %v1625_v55  ;;  %v1552_v9 = vpop.f32.mrf.mxu0  ;;  %2113 = vmatpush.bf16.msrb.mxu0 %v5965_v23  ;;  %v7630_v6 = vld [vmem:[%s11863_s6 + $0x64] sm:$0xf0]  ;;  %v7624_v23 = vld [vmem:[%s11863_s6 + $0x34] sm:$0xf0] }
 0x13a   :  { %2323 = vmatpush.bf16.msra.mxu3 %v6065_v2  ;;  %v6058_v9 = vld [vmem:[%s11863_s6 + $0x68] sm:$0xf0]  ;;  %v6033_v49 = vor.u32 %v7624_v23, %v6032_v22  ;;  %v6009_v2 = vor.u32 %v7618_v37, %v6008_v0  ;;  %v6093_v23 = vor.u32 %v7637_v19, %v6090_v21  ;;  %v7659_v0 = vld [vmem:[%s11864_s8 + $0x54] sm:$0xf]  ;;  %v6178_v37 = vld [vmem:[%s11864_s8 + $0x58] sm:$0xf0] }
 0x13b   :  { %v6061_v10 = vor.u32 %v7629_v7, %v6058_v9  ;;  %v6106_v9 = vld [vmem:[%s11863_s6 + $0xc8] sm:$0xf0]  ;;  %v7652_v21 = vld [vmem:[%s11864_s8 + $0x14] sm:$0xf0] }
 0x13c   :  { %v6154_v19 = vld [vmem:[%s11864_s8 + $0x28] sm:$0xf0] }
 0x13d   :  { %v1539_v8 = vpop.f32.mrf.mxu2  ;;  %2114 = vmatpush.bf16.msrb.mxu0 %v5957_v25  ;;  %v7648_v25 = vld [vmem:[%s11863_s6 + $0xf4] sm:$0xf0] }
 0x13e   :  { %v6057_v8 = vor.u32 %v7630_v6, %v6056_v5  ;;  %v6129_v28 = vor.u32 %v7648_v25, %v6128_v4  ;;  %v6010_v5 = vld [vmem:[%s11863_s6 + $0x8] sm:$0xf0]  ;;  %v7636_v4 = vld [vmem:[%s11863_s6 + $0x94] sm:$0xf0]  ;;  %v7635_v25 = vld [vmem:[%s11863_s6 + $0x94] sm:$0xf] }
 0x140   :  { %2324 = vmatpush.bf16.msra.mxu3 %v6057_v8  ;;  %2336 = vmatpush.bf16.msra.mxu1 %v6129_v28  ;;  %v7641_v8 = vld [vmem:[%s11863_s6 + $0xc4] sm:$0xf]  ;;  %v6082_v28 = vld [vmem:[%s11863_s6 + $0x98] sm:$0xf0] }
 0x141   :  { %2115 = vmatpush.bf16.msrb.mxu0 %v5949_v36  ;;  %v6120_v36 = vld [vmem:[%s11863_s6 + $0xe0] sm:$0xf] }
 0x144   :  { %2325 = vmatpush.bf16.msra.mxu3 %v6049_v15  ;;  %v6097_v15 = vor.u32 %v7640_v12, %v6096_v11  ;;  %v7655_v11 = vld [vmem:[%s11864_s8 + $0x34] sm:$0xf] }
 0x148   :  { %v1563_v45 = vpop.f32.mrf.mxu1 }
 0x149   :  { %2103 = vmatmul.bf16.vlgmr.msrb.gmra.mxu2 %v1625_v55  ;;  %v1564_v39 = vadd.f32 %v1563_v45, %v1551_v34  ;;  %v6066_v55 = vld [vmem:[%s11863_s6 + $0x78] sm:$0xf0]  ;;  %v7626_v45 = vld [vmem:[%s11863_s6 + $0x44] sm:$0xf0]  ;;  %v6024_v34 = vld [vmem:[%s11863_s6 + $0x20] sm:$0xf] }
 0x14a   :  { %v6069_v3 = vor.u32 %v7631_v1, %v6066_v55  ;;  %v6041_v20 = vor.u32 %v7626_v45, %v6040_v18  ;;  %v6104_v1 = vld [vmem:[%s11863_s6 + $0xc0] sm:$0xf]  ;;  %v7642_v55 = vld [vmem:[%s11863_s6 + $0xc4] sm:$0xf0] }
 0x14b   :  { %v6105_v6 = vor.u32 %v7642_v55, %v6104_v1  ;;  %v6088_v18 = vld [vmem:[%s11863_s6 + $0xa0] sm:$0xf]  ;;  %v7638_v45 = vld [vmem:[%s11863_s6 + $0xa4] sm:$0xf0] }
 0x14c   :  { %2349 = vmatpush.bf16.msra.mxu2 %v6069_v3  ;;  %2326 = vmatpush.bf16.msra.mxu3 %v6041_v20  ;;  %v7617_v3 = vld [vmem:[%s11863_s6 + $0x4] sm:$0xf]  ;;  %v6089_v22 = vor.u32 %v7638_v45, %v6088_v18  ;;  %v6168_v55 = vld [vmem:[%s11864_s8 + $0x40] sm:$0xf] }
 0x14d   :  { %v6013_v7 = vor.u32 %v7617_v3, %v6010_v5  ;;  %v7658_v3 = vld [vmem:[%s11864_s8 + $0x44] sm:$0xf0]  ;;  %v7657_v5 = vld [vmem:[%s11864_s8 + $0x44] sm:$0xf] }
 0x14e   :  { %v7653_v18 = vld [vmem:[%s11864_s8 + $0x24] sm:$0xf] }
 0x150   :  { %v1576_v27 = vpop.f32.mrf.mxu3  ;;  %v1565_v29 = vpop.f32.mrf.mxu1  ;;  %2350 = vmatpush.bf16.msra.mxu2 %v6061_v10  ;;  %2327 = vmatpush.bf16.msra.mxu3 %v6033_v49  ;;  %v6109_v10 = vor.u32 %v7641_v8, %v6106_v9  ;;  %v7634_v49 = vld [vmem:[%s11863_s6 + $0x84] sm:$0xf0]  ;;  %v6160_v9 = vld [vmem:[%s11864_s8 + $0x30] sm:$0xf] }
 0x151   :  { %v1602_v33 = vpop.f32.mrf.mxu0  ;;  %v1577_v40 = vadd.f32 %v1576_v27, %v1564_v39  ;;  %v7623_v27 = vld [vmem:[%s11863_s6 + $0x34] sm:$0xf]  ;;  %v6034_v29 = vld [vmem:[%s11863_s6 + $0x38] sm:$0xf0] }
 0x152   :  { %v6037_v39 = vor.u32 %v7623_v27, %v6034_v29  ;;  %v6085_v29 = vor.u32 %v7635_v25, %v6082_v28  ;;  %v7650_v28 = vld [vmem:[%s11864_s8 + $0x4] sm:$0xf0] }
 0x154   :  { %2351 = vmatpush.bf16.msra.mxu2 %v6053_v17  ;;  %v6101_v17 = vor.u32 %v7639_v13, %v6098_v16  ;;  %v6162_v13 = vld [vmem:[%s11864_s8 + $0x38] sm:$0xf0]  ;;  %v6152_v16 = vld [vmem:[%s11864_s8 + $0x20] sm:$0xf] }
 0x155   :  { %v1589_v31 = vpop.f32.mrf.mxu2 }
 0x156   :  { %v1590_v57 = vadd.f32 %v1589_v31, %v1577_v40  ;;  %v7647_v31 = vld [vmem:[%s11863_s6 + $0xf4] sm:$0xf]  ;;  %v7646_v40 = vld [vmem:[%s11863_s6 + $0xe4] sm:$0xf0] }
 0x158   :  { %v1578_v51 = vpop.f32.mrf.mxu3  ;;  %v1603_v43 = vadd.f32 %v1602_v33, %v1590_v57  ;;  %v6130_v33 = vld [vmem:[%s11863_s6 + $0xf8] sm:$0xf0]  ;;  %2352 = vmatpush.bf16.msra.mxu2 %v6045_v24  ;;  %v6026_v57 = vld [vmem:[%s11863_s6 + $0x28] sm:$0xf0]  ;;  %v6080_v24 = vld [vmem:[%s11863_s6 + $0x90] sm:$0xf] }
 0x159   :  { %v1604_v42 = vpop.f32.mrf.mxu0  ;;  %v6133_v14 = vor.u32 %v7647_v31, %v6130_v33  ;;  %v7622_v51 = vld [vmem:[%s11863_s6 + $0x24] sm:$0xf0]  ;;  %v6081_v27 = vor.u32 %v7636_v4, %v6080_v24  ;;  %v6072_v33 = vld [vmem:[%s11863_s6 + $0x80] sm:$0xf]  ;;  %v6146_v24 = vld [vmem:[%s11864_s8 + $0x18] sm:$0xf0] }
 0x15a   :  { %v6121_v42 = vor.u32 %v7646_v40, %v6120_v36  ;;  %v6074_v36 = vld [vmem:[%s11863_s6 + $0x88] sm:$0xf0]  ;;  %v7664_v40 = vld [vmem:[%s11864_s8 + $0x74] sm:$0xf0] }
 0x15c   :  { %2353 = vmatpush.bf16.msra.mxu2 %v6037_v39  ;;  %2337 = vmatpush.bf16.msra.mxu1 %v6121_v42 }
 0x15d   :  { %v1591_v41 = vpop.f32.mrf.mxu2 }
 0x15e   :  { %v7621_v41 = vld [vmem:[%s11863_s6 + $0x24] sm:$0xf] }
 0x165   :  { %v1615_v44 = vpop.f32.mrf.mxu2 }
 0x166   :  { %v1616_v26 = vadd.f32 %v1615_v44, %v1603_v43  ;;  %v7645_v43 = vld [vmem:[%s11863_s6 + $0xe4] sm:$0xf]  ;;  %v6122_v44 = vld [vmem:[%s11863_s6 + $0xe8] sm:$0xf0] }
 0x168   :  { %v1622_v46 = vmax.f32 %v1616_v26, 0.0  ;;  %v6125_v26 = vor.u32 %v7645_v43, %v6122_v44 }
 0x16a   :  { %v1626_v30 = vpack.c.bf16 %v1622_v46, %v1622_v46 }
 0x16c   :  { %2064 = vmatmul.bf16.vlgmr.msra.gmra.mxu0 %v1626_v30 }
 0x16d   :  { %v1617_v47 = vpop.f32.mrf.mxu2  ;;  %2362 = vmatpush.bf16.msra.mxu0 %v6133_v14  ;;  %v7633_v14 = vld [vmem:[%s11863_s6 + $0x84] sm:$0xf] }
 0x16e   :  { %v6029_v47 = vor.u32 %v7621_v41, %v6026_v57  ;;  %v6077_v39 = vor.u32 %v7633_v14, %v6074_v36  ;;  %v7663_v41 = vld [vmem:[%s11864_s8 + $0x74] sm:$0xf]  ;;  %v6194_v57 = vld [vmem:[%s11864_s8 + $0x78] sm:$0xf0]  ;;  %v6440_v14 = vld [vmem:[%s11865_s10 + $0x1e0] sm:$0xf] }
 0x16f   :  { %v6197_v43 = vor.u32 %v7663_v41, %v6194_v57  ;;  %v7725_v36 = vld [vmem:[%s11865_s10 + $0x1e4] sm:$0xf]  ;;  %v7723_v41 = vld [vmem:[%s11865_s10 + $0x1cc] sm:$0xf0] }
 0x170   :  { %v2026_v48 = vpop.f32.mrf.mxu3  ;;  %2354 = vmatpush.bf16.msra.mxu2 %v6029_v47 }
 0x171   :  { %v2027_v54 = vadd.f32 %v2026_v48, %v1693_v53  ;;  %2363 = vmatpush.bf16.msra.mxu0 %v6125_v26  ;;  %v6016_v48 = vld [vmem:[%s11863_s6 + $0x10] sm:$0xf] }
 0x178   :  { %v2028_v50 = vpop.f32.mrf.mxu3 }
 0x179   :  { %v7620_v50 = vld [vmem:[%s11863_s6 + $0x14] sm:$0xf0] }
 0x17a   :  { %v6017_v53 = vor.u32 %v7620_v50, %v6016_v48 }
 0x17b   :  { %v2039_v56 = vpop.f32.mrf.mxu1 }
 0x17c   :  { %2116 = vmatmul.bf16.vlgmr.msrb.gmra.mxu0 %v1626_v30  ;;  %v9723_v32 = vadd.f32 %v2039_v56, %v2027_v54  ;;  %v6025_v30 = vor.u32 %v7622_v51, %v6024_v34  ;;  %v7644_v54 = vld [vmem:[%s11863_s6 + $0xd4] sm:$0xf0]  ;;  %v7619_v56 = vld [vmem:[%s11863_s6 + $0x14] sm:$0xf]  ;;  %v6073_v34 = vor.u32 %v7634_v49, %v6072_v33  ;;  %v6192_v51 = vld [vmem:[%s11864_s8 + $0x70] sm:$0xf] }
 0x17d   :  { %v6193_v42 = vor.u32 %v7664_v40, %v6192_v51  ;;  %v6442_v51 = vld [vmem:[%s11865_s10 + $0x1f0] sm:$0xf0]  ;;  %v6424_v40 = vld [vmem:[%s11865_s10 + $0x1c0] sm:$0xf] }
 0x17e   :  { %2328 = vmatpush.bf16.msra.mxu3 %v6025_v30 }
 0x182   :  { %2329 = vmatpush.bf16.msra.mxu3 %v6017_v53 }
 0x183   :  { %v2041_v59 = vpop.f32.mrf.mxu1 }
 0x184   :  { %v6113_v59 = vor.u32 %v7644_v54, %v6112_v52 }
 0x186   :  { %2338 = vmatpush.bf16.msra.mxu1 %v6113_v59  ;;  %2330 = vmatpush.bf16.msra.mxu3 %v6009_v2  ;;  %v6181_v2 = vor.u32 %v7659_v0, %v6178_v37 }
 0x18a   :  { %2339 = vmatpush.bf16.msra.mxu1 %v6105_v6  ;;  %2484 = vmatpush.bf16.msrb.mxu3 %v6193_v42  ;;  %v6169_v6 = vor.u32 %v7658_v3, %v6168_v55  ;;  %v2157_v42 = vld [vmem:[%s11866_s7] sm:$0x3]  ;;  %v7715_v3 = vld [vmem:[%s11865_s10 + $0x18c] sm:$0xf0] }
 0x18b   :  { %v2091_v62 = vpop.f32.mrf.mxu1  ;;  %v2159_v0 = vperm.slane %v2157_v42, 0  ;;  %v2160_v37 = vperm.slane %v2157_v42, 1  ;;  %v6392_v55 = vld [vmem:[%s11865_s10 + $0x180] sm:$0xf] }
 0x18e   :  { %2340 = vmatpush.bf16.msra.mxu1 %v6097_v15  ;;  %v6165_v15 = vor.u32 %v7655_v11, %v6162_v13  ;;  %v6282_v11 = vld [vmem:[%s11865_s10 + $0xb0] sm:$0xf0] }
 0x190   :  { %v2078_v58 = vpop.f32.mrf.mxu3 }
 0x191   :  { %v2079_v38 = vadd.f32 %v2078_v58, %v1694_v60  ;;  %v6018_v58 = vld [vmem:[%s11863_s6 + $0x18] sm:$0xf0] }
 0x192   :  { %v6021_v60 = vor.u32 %v7619_v56, %v6018_v58  ;;  %2341 = vmatpush.bf16.msra.mxu1 %v6089_v22  ;;  %v6157_v22 = vor.u32 %v7653_v18, %v6154_v19  ;;  %v6393_v19 = vor.u32 %v7715_v3, %v6392_v55  ;;  %v6218_v55 = vld [vmem:[%s11865_s10 + $0x30] sm:$0xf0] }
 0x193   :  { %v9725_v35 = vadd.f32 %v2091_v62, %v2079_v38  ;;  %v2093_v63 = vpop.f32.mrf.mxu1  ;;  %v6114_v38 = vld [vmem:[%s11863_s6 + $0xd8] sm:$0xf0] }
 0x194   :  { %2355 = vmatpush.bf16.msra.mxu2 %v6021_v60  ;;  %v7661_v60 = vld [vmem:[%s11864_s8 + $0x64] sm:$0xf] }
 0x196   :  { %2342 = vmatpush.bf16.msra.mxu1 %v6081_v27  ;;  %v6136_v27 = vld [vmem:[%s11864_s8] sm:$0xf] }
 0x197   :  { %v6137_v33 = vor.u32 %v7650_v28, %v6136_v27  ;;  %v7711_v27 = vld [vmem:[%s11865_s10 + $0x16c] sm:$0xf0] }
 0x198   :  { %v2080_v61 = vpop.f32.mrf.mxu3  ;;  %2356 = vmatpush.bf16.msra.mxu2 %v6013_v7  ;;  %v6170_v7 = vld [vmem:[%s11864_s8 + $0x48] sm:$0xf0] }
 0x199   :  { %v7643_v61 = vld [vmem:[%s11863_s6 + $0xd4] sm:$0xf]  ;;  %v6173_v8 = vor.u32 %v7657_v5, %v6170_v7  ;;  %v7687_v7 = vld [vmem:[%s11865_s10 + $0xac] sm:$0xf0] }
 0x19a   :  { %v6117_v63 = vor.u32 %v7643_v61, %v6114_v38  ;;  %2343 = vmatpush.bf16.msra.mxu1 %v6073_v34  ;;  %v6186_v61 = vld [vmem:[%s11864_s8 + $0x68] sm:$0xf0]  ;;  %v6176_v38 = vld [vmem:[%s11864_s8 + $0x50] sm:$0xf] }
 0x19b   :  { %v7727_v34 = vld [vmem:[%s11865_s10 + $0x1ec] sm:$0xf0] }
 0x19c   :  { %2364 = vmatpush.bf16.msra.mxu0 %v6117_v63  ;;  %v6189_v63 = vor.u32 %v7661_v60, %v6186_v61  ;;  %v6410_v60 = vld [vmem:[%s11865_s10 + $0x1b0] sm:$0xf0]  ;;  %v7691_v61 = vld [vmem:[%s11865_s10 + $0xcc] sm:$0xf0] }
 0x19e   :  { %2497 = vmatpush.bf16.msrb.mxu1 %v6197_v43 }
 0x1a0   :  { %2365 = vmatpush.bf16.msra.mxu0 %v6109_v10  ;;  %v7656_v10 = vld [vmem:[%s11864_s8 + $0x34] sm:$0xf0] }
 0x1a1   :  { %v6161_v12 = vor.u32 %v7656_v10, %v6160_v9  ;;  %v7713_v9 = vld [vmem:[%s11865_s10 + $0x184] sm:$0xf]  ;;  %v6394_v10 = vld [vmem:[%s11865_s10 + $0x190] sm:$0xf0] }
 0x1a2   :  { %2498 = vmatpush.bf16.msrb.mxu1 %v6189_v63  ;;  %v6298_v63 = vld [vmem:[%s11865_s10 + $0xd0] sm:$0xf0] }
 0x1a4   :  { %2366 = vmatpush.bf16.msra.mxu0 %v6101_v17  ;;  %v7654_v17 = vld [vmem:[%s11864_s8 + $0x24] sm:$0xf0] }
 0x1a5   :  { %v6153_v45 = vor.u32 %v7654_v17, %v6152_v16  ;;  %v6264_v17 = vld [vmem:[%s11865_s10 + $0x80] sm:$0xf] }
 0x1a6   :  { %2499 = vmatpush.bf16.msrb.mxu1 %v6181_v2 }
 0x1a8   :  { %2367 = vmatpush.bf16.msra.mxu0 %v6093_v23  ;;  %v7651_v23 = vld [vmem:[%s11864_s8 + $0x14] sm:$0xf] }
 0x1a9   :  { %v6149_v25 = vor.u32 %v7651_v23, %v6146_v24 }
 0x1aa   :  { %2500 = vmatpush.bf16.msrb.mxu1 %v6173_v8  ;;  %v7685_v8 = vld [vmem:[%s11865_s10 + $0xa4] sm:$0xf] }
 0x1ab   :  { %v6285_v16 = vor.u32 %v7685_v8, %v6282_v11  ;;  %v7697_v8 = vld [vmem:[%s11865_s10 + $0x104] sm:$0xf] }
 0x1ac   :  { %2368 = vmatpush.bf16.msra.mxu0 %v6085_v29  ;;  %v7649_v29 = vld [vmem:[%s11864_s8 + $0x4] sm:$0xf] }
 0x1ae   :  { %2501 = vmatpush.bf16.msrb.mxu1 %v6165_v15 }
 0x1b0   :  { %2369 = vmatpush.bf16.msra.mxu0 %v6077_v39  ;;  %v6441_v39 = vor.u32 %v7727_v34, %v6440_v14  ;;  %v6248_v34 = vld [vmem:[%s11865_s10 + $0x60] sm:$0xf] }
 0x1b2   :  { %2502 = vmatpush.bf16.msrb.mxu1 %v6157_v22  ;;  %v6266_v22 = vld [vmem:[%s11865_s10 + $0x90] sm:$0xf0] }
 0x1b4   :  { %2921 = vmatpush.bf16.msrb.mxu0 %v6441_v39 }
 0x1b6   :  { %2503 = vmatpush.bf16.msrb.mxu1 %v6149_v25  ;;  %v6376_v25 = vld [vmem:[%s11865_s10 + $0x160] sm:$0xf] }
 0x1bc   :  { %v9823_v46 = vpop.f32.mrf.mxu2 }
 0x1bd   :  { %v2053_v44 = vadd.f32 %v9823_v46, %v9723_v32  ;;  %v6184_v32 = vld [vmem:[%s11864_s8 + $0x60] sm:$0xf]  ;;  %v7662_v46 = vld [vmem:[%s11864_s8 + $0x64] sm:$0xf0] }
 0x1c4   :  { %v2054_v62 = vpop.f32.mrf.mxu2 }
 0x1c5   :  { %v7660_v62 = vld [vmem:[%s11864_s8 + $0x54] sm:$0xf0] }
 0x1c6   :  { %v6177_v1 = vor.u32 %v7660_v62, %v6176_v38  ;;  %v7689_v62 = vld [vmem:[%s11865_s10 + $0xc4] sm:$0xf] }
 0x1c7   :  { %v6301_v2 = vor.u32 %v7689_v62, %v6298_v63 }
 0x1cc   :  { %v2104_v20 = vpop.f32.mrf.mxu2 }
 0x1cd   :  { %v2105_v52 = vadd.f32 %v2104_v20, %v9725_v35  ;;  %v6185_v35 = vor.u32 %v7662_v46, %v6184_v32  ;;  %v6144_v20 = vld [vmem:[%s11864_s8 + $0x10] sm:$0xf]  ;;  %v7717_v46 = vld [vmem:[%s11865_s10 + $0x1a4] sm:$0xf] }
 0x1ce   :  { %v6145_v4 = vor.u32 %v7652_v21, %v6144_v20  ;;  %v7719_v32 = vld [vmem:[%s11865_s10 + $0x1ac] sm:$0xf0]  ;;  %v6413_v5 = vor.u32 %v7717_v46, %v6410_v60  ;;  %v7681_v21 = vld [vmem:[%s11865_s10 + $0x84] sm:$0xf]  ;;  %v6344_v46 = vld [vmem:[%s11865_s10 + $0x120] sm:$0xf] }
 0x1cf   :  { %2485 = vmatpush.bf16.msrb.mxu3 %v6185_v35  ;;  %v6296_v35 = vld [vmem:[%s11865_s10 + $0xc0] sm:$0xf]  ;;  %v7683_v20 = vld [vmem:[%s11865_s10 + $0x8c] sm:$0xf0]  ;;  %v6269_v14 = vor.u32 %v7681_v21, %v6266_v22  ;;  %v6202_v22 = vld [vmem:[%s11865_s10 + $0x10] sm:$0xf0] }
 0x1d0   :  { %v6297_v38 = vor.u32 %v7691_v61, %v6296_v35  ;;  %v7703_v60 = vld [vmem:[%s11865_s10 + $0x12c] sm:$0xf0]  ;;  %v7701_v35 = vld [vmem:[%s11865_s10 + $0x124] sm:$0xf]  ;;  %v6346_v61 = vld [vmem:[%s11865_s10 + $0x130] sm:$0xf0] }
 0x1d1   :  { %v6349_v3 = vor.u32 %v7701_v35, %v6346_v61  ;;  %v6288_v61 = vld [vmem:[%s11865_s10 + $0xa8] sm:$0xf] }
 0x1d3   :  { %2486 = vmatpush.bf16.msrb.mxu3 %v6177_v1 }
 0x1d4   :  { %v2106_v31 = vpop.f32.mrf.mxu2 }
 0x1d5   :  { %v6138_v31 = vld [vmem:[%s11864_s8 + $0x8] sm:$0xf0] }
 0x1d6   :  { %v6141_v49 = vor.u32 %v7649_v29, %v6138_v31  ;;  %v7709_v31 = vld [vmem:[%s11865_s10 + $0x164] sm:$0xf] }
 0x1d7   :  { %2487 = vmatpush.bf16.msrb.mxu3 %v6169_v6  ;;  %v6280_v6 = vld [vmem:[%s11865_s10 + $0xa0] sm:$0xf] }
 0x1d8   :  { %2504 = vmatpush.bf16.msrb.mxu1 %v6141_v49  ;;  %v6281_v15 = vor.u32 %v7687_v7, %v6280_v6  ;;  %v6265_v49 = vor.u32 %v7683_v20, %v6264_v17  ;;  %v7699_v6 = vld [vmem:[%s11865_s10 + $0x10c] sm:$0xf0]  ;;  %v7665_v20 = vld [vmem:[%s11865_s10 + $0x4] sm:$0xf] }
 0x1db   :  { %2488 = vmatpush.bf16.msrb.mxu3 %v6161_v12 }
 0x1df   :  { %2489 = vmatpush.bf16.msrb.mxu3 %v6153_v45 }
 0x1e3   :  { %2490 = vmatpush.bf16.msrb.mxu3 %v6145_v4  ;;  %v6397_v4 = vor.u32 %v7713_v9, %v6394_v10  ;;  %v6330_v9 = vld [vmem:[%s11865_s10 + $0x110] sm:$0xf0]  ;;  %v6448_v10 = vld [vmem:[%s11865_s10 + $0x1e8] sm:$0xf] }
 0x1e7   :  { %2491 = vmatpush.bf16.msrb.mxu3 %v6137_v33  ;;  %v6378_v33 = vld [vmem:[%s11865_s10 + $0x170] sm:$0xf0] }
 0x1e8   :  { %v6381_v42 = vor.u32 %v7709_v31, %v6378_v33  ;;  %v6432_v33 = vld [vmem:[%s11865_s10 + $0x1c8] sm:$0xf] }
 0x1e9   :  { %v2065_v26 = vpop.f32.mrf.mxu0 }
 0x1ea   :  { %v2066_v30 = vadd.f32 %v2065_v26, %v2053_v44  ;;  %v6445_v44 = vor.u32 %v7725_v36, %v6442_v51  ;;  %v7721_v26 = vld [vmem:[%s11865_s10 + $0x1c4] sm:$0xf]  ;;  %v7679_v36 = vld [vmem:[%s11865_s10 + $0x6c] sm:$0xf0]  ;;  %v6377_v51 = vor.u32 %v7711_v27, %v6376_v25  ;;  %v7694_v27 = vld [vmem:[%s11865_s10 + $0xec] sm:$0xf] }
 0x1ec   :  { %v2121_v47 = vmax.f32 %v2066_v30, 0.0  ;;  %v6426_v30 = vld [vmem:[%s11865_s10 + $0x1d0] sm:$0xf0] }
 0x1ee   :  { %v2123_v48 = vpack.c.bf16 %v2121_v47, %v2121_v47  ;;  %v6312_v47 = vld [vmem:[%s11865_s10 + $0xe0] sm:$0xf] }
 0x1f0   :  { %2331 = vmatmul.bf16.vlgmr.msra.gmra.mxu3 %v2123_v48  ;;  %2357 = vmatmul.bf16.vlgmr.msra.gmra.mxu2 %v2123_v48  ;;  %v6425_v48 = vor.u32 %v7723_v41, %v6424_v40  ;;  %v7677_v40 = vld [vmem:[%s11865_s10 + $0x64] sm:$0xf]  ;;  %v6250_v41 = vld [vmem:[%s11865_s10 + $0x70] sm:$0xf0] }
 0x1f1   :  { %v2067_v50 = vpop.f32.mrf.mxu0 }
 0x1f2   :  { %v7695_v50 = vld [vmem:[%s11865_s10 + $0xec] sm:$0xf0]  ;;  %2922 = vmatpush.bf16.msrb.mxu0 %v6425_v48  ;;  %v6253_v48 = vor.u32 %v7677_v40, %v6250_v41 }
 0x1f9   :  { %v2117_v53 = vpop.f32.mrf.mxu0 }
 0x1fa   :  { %v2118_v54 = vadd.f32 %v2117_v53, %v2105_v52  ;;  %v7693_v52 = vld [vmem:[%s11865_s10 + $0xe4] sm:$0xf]  ;;  %v6314_v53 = vld [vmem:[%s11865_s10 + $0xf0] sm:$0xf0] }
 0x1fc   :  { %v2122_v56 = vmax.f32 %v2118_v54, 0.0  ;;  %v6429_v54 = vor.u32 %v7721_v26, %v6426_v30  ;;  %v7705_v26 = vld [vmem:[%s11865_s10 + $0x144] sm:$0xf]  ;;  %v6362_v30 = vld [vmem:[%s11865_s10 + $0x150] sm:$0xf0] }
 0x1fe   :  { %v2124_v58 = vpack.c.bf16 %v2122_v56, %v2122_v56  ;;  %v6313_v56 = vor.u32 %v7695_v50, %v6312_v47  ;;  %v6249_v47 = vor.u32 %v7679_v36, %v6248_v34  ;;  %v6232_v50 = vld [vmem:[%s11865_s10 + $0x40] sm:$0xf]  ;;  %v7722_v34 = vld [vmem:[%s11865_s10 + $0x1cc] sm:$0xf]  ;;  %v6434_v36 = vld [vmem:[%s11865_s10 + $0x1d8] sm:$0xf0] }
 0x200   :  { %2344 = vmatmul.bf16.vlgmr.msra.gmra.mxu1 %v2124_v58  ;;  %2370 = vmatmul.bf16.vlgmr.msra.gmra.mxu0 %v2124_v58  ;;  %v6317_v58 = vor.u32 %v7693_v52, %v6314_v53  ;;  %v7675_v53 = vld [vmem:[%s11865_s10 + $0x4c] sm:$0xf0] }
 0x201   :  { %v2119_v59 = vpop.f32.mrf.mxu0  ;;  %2947 = vmatpush.bf16.msra.mxu1 %v6445_v44  ;;  %2908 = vmatpush.bf16.msrb.mxu2 %v6313_v56  ;;  %v6234_v56 = vld [vmem:[%s11865_s10 + $0x50] sm:$0xf0]  ;;  %v6233_v62 = vor.u32 %v7675_v53, %v6232_v50  ;;  %v7692_v50 = vld [vmem:[%s11865_s10 + $0xd4] sm:$0xf0] }
 0x202   :  { %v6408_v59 = vld [vmem:[%s11865_s10 + $0x1a0] sm:$0xf]  ;;  %2934 = vmatpush.bf16.msra.mxu3 %v6317_v58 }
 0x203   :  { %v6409_v1 = vor.u32 %v7719_v32, %v6408_v59  ;;  %v6365_v32 = vor.u32 %v7705_v26, %v6362_v30  ;;  %v6418_v30 = vld [vmem:[%s11865_s10 + $0x1b8] sm:$0xf0] }
 0x205   :  { %2948 = vmatpush.bf16.msra.mxu1 %v6429_v54  ;;  %2909 = vmatpush.bf16.msrb.mxu2 %v6297_v38  ;;  %v7673_v54 = vld [vmem:[%s11865_s10 + $0x44] sm:$0xf] }
 0x206   :  { %2935 = vmatpush.bf16.msra.mxu3 %v6301_v2  ;;  %2923 = vmatpush.bf16.msrb.mxu0 %v6409_v1  ;;  %v2375_v38 = vld [vmem:[%s11869_s1] sm:$0xff]  ;;  %v6237_v63 = vor.u32 %v7673_v54, %v6234_v56  ;;  %v7671_v1 = vld [vmem:[%s11865_s10 + $0x2c] sm:$0xf0]  ;;  %v6306_v54 = vld [vmem:[%s11865_s10 + $0xd8] sm:$0xf0] }
 0x207   :  { %v7669_v2 = vld [vmem:[%s11865_s10 + $0x24] sm:$0xf] }
 0x208   :  { %v6221_v17 = vor.u32 %v7669_v2, %v6218_v55  ;;  %v7712_v2 = vld [vmem:[%s11865_s10 + $0x174] sm:$0xf0]  ;;  %v7710_v55 = vld [vmem:[%s11865_s10 + $0x16c] sm:$0xf] }
 0x209   :  { %2949 = vmatpush.bf16.msra.mxu1 %v6413_v5  ;;  %2910 = vmatpush.bf16.msrb.mxu2 %v6281_v15  ;;  %v6328_v5 = vld [vmem:[%s11865_s10 + $0x100] sm:$0xf]  ;;  %v6450_v15 = vld [vmem:[%s11865_s10 + $0x1f8] sm:$0xf0] }
 0x20a   :  { %2936 = vmatpush.bf16.msra.mxu3 %v6285_v16  ;;  %2924 = vmatpush.bf16.msrb.mxu0 %v6393_v19  ;;  %v7667_v19 = vld [vmem:[%s11865_s10 + $0xc] sm:$0xf0] }
 0x20d   :  { %2950 = vmatpush.bf16.msra.mxu1 %v6397_v4  ;;  %2911 = vmatpush.bf16.msrb.mxu2 %v6265_v49  ;;  %v6333_v4 = vor.u32 %v7697_v8, %v6330_v9  ;;  %v7724_v49 = vld [vmem:[%s11865_s10 + $0x1d4] sm:$0xf0]  ;;  %v7682_v9 = vld [vmem:[%s11865_s10 + $0x8c] sm:$0xf] }
 0x20e   :  { %2937 = vmatpush.bf16.msra.mxu3 %v6269_v14  ;;  %2925 = vmatpush.bf16.msrb.mxu0 %v6377_v51  ;;  %v6433_v41 = vor.u32 %v7724_v49, %v6432_v33  ;;  %v7684_v8 = vld [vmem:[%s11865_s10 + $0x94] sm:$0xf0] }
 0x20f   :  { %v7676_v33 = vld [vmem:[%s11865_s10 + $0x54] sm:$0xf0] }
 0x211   :  { %2951 = vmatpush.bf16.msra.mxu1 %v6381_v42  ;;  %2912 = vmatpush.bf16.msrb.mxu2 %v6249_v47  ;;  %v6437_v42 = vor.u32 %v7722_v34, %v6434_v36  ;;  %v7674_v34 = vld [vmem:[%s11865_s10 + $0x4c] sm:$0xf]  ;;  %v6242_v36 = vld [vmem:[%s11865_s10 + $0x58] sm:$0xf0] }
 0x212   :  { %2938 = vmatpush.bf16.msra.mxu3 %v6253_v48  ;;  %v6304_v48 = vld [vmem:[%s11865_s10 + $0xc8] sm:$0xf] }
 0x213   :  { %v6305_v53 = vor.u32 %v7692_v50, %v6304_v48  ;;  %v6226_v48 = vld [vmem:[%s11865_s10 + $0x38] sm:$0xf0] }
 0x215   :  { %2952 = vmatpush.bf16.msra.mxu1 %v6365_v32  ;;  %2913 = vmatpush.bf16.msrb.mxu2 %v6233_v62  ;;  %v7714_v32 = vld [vmem:[%s11865_s10 + $0x18c] sm:$0xf] }
 0x216   :  { %2939 = vmatpush.bf16.msra.mxu3 %v6237_v63  ;;  %v7686_v62 = vld [vmem:[%s11865_s10 + $0xac] sm:$0xf] }
 0x219   :  { %2953 = vmatpush.bf16.msra.mxu1 %v6349_v3 }
 0x21a   :  { %2940 = vmatpush.bf16.msra.mxu3 %v6221_v17 }
 0x21d   :  { %2954 = vmatpush.bf16.msra.mxu1 %v6333_v4  ;;  %v6352_v4 = vld [vmem:[%s11865_s10 + $0x128] sm:$0xf] }
 0x273   :  { %v2332_v57 = vpop.f32.mrf.mxu3  ;;  %v2358_v43 = vpop.f32.mrf.mxu2 }
 0x274   :  { %v2333_v18 = vadd.f32 %v2332_v57, %v2159_v0  ;;  %v2359_v45 = vadd.f32 %v2358_v43, %v2160_v37  ;;  %v6360_v57 = vld [vmem:[%s11865_s10 + $0x140] sm:$0xf]  ;;  %v7707_v43 = vld [vmem:[%s11865_s10 + $0x14c] sm:$0xf0]  ;;  %v6345_v37 = vor.u32 %v7703_v60, %v6344_v46  ;;  %v6402_v60 = vld [vmem:[%s11865_s10 + $0x198] sm:$0xf0] }
 0x275   :  { %v6361_v52 = vor.u32 %v7707_v43, %v6360_v57  ;;  %v6216_v0 = vld [vmem:[%s11865_s10 + $0x20] sm:$0xf]  ;;  %v6416_v57 = vld [vmem:[%s11865_s10 + $0x1a8] sm:$0xf]  ;;  %v7720_v43 = vld [vmem:[%s11865_s10 + $0x1b4] sm:$0xf0]  ;;  %v6405_v35 = vor.u32 %v7714_v32, %v6402_v60 }
 0x276   :  { %v6217_v16 = vor.u32 %v7671_v1, %v6216_v0  ;;  %v6417_v26 = vor.u32 %v7720_v43, %v6416_v57  ;;  %v6290_v0 = vld [vmem:[%s11865_s10 + $0xb8] sm:$0xf0]  ;;  %v6384_v1 = vld [vmem:[%s11865_s10 + $0x168] sm:$0xf]  ;;  %v2398_v32 = vld [vmem:[%s11870_s9] sm:$0x3] }
 0x277   :  { %2926 = vmatpush.bf16.msrb.mxu0 %v6361_v52  ;;  %v7690_v52 = vld [vmem:[%s11865_s10 + $0xcc] sm:$0xf]  ;;  %v6385_v3 = vor.u32 %v7712_v2, %v6384_v1  ;;  %v6848_v2 = vld [vmem:[%s11871_s12 + $0x310] sm:$0xf] }
 0x278   :  { %2914 = vmatpush.bf16.msrb.mxu2 %v6217_v16  ;;  %v6309_v56 = vor.u32 %v7690_v52, %v6306_v54  ;;  %v7706_v16 = vld [vmem:[%s11865_s10 + $0x14c] sm:$0xf]  ;;  %v6208_v52 = vld [vmem:[%s11865_s10 + $0x8] sm:$0xf] }
 0x279   :  { %v7666_v54 = vld [vmem:[%s11865_s10 + $0xc] sm:$0xf] }
 0x27b   :  { %v2334_v12 = vpop.f32.mrf.mxu3  ;;  %v2360_v13 = vpop.f32.mrf.mxu2  ;;  %2927 = vmatpush.bf16.msrb.mxu0 %v6345_v37  ;;  %v6293_v37 = vor.u32 %v7686_v62, %v6290_v0 }
 0x27c   :  { %v7728_v12 = vld [vmem:[%s11865_s10 + $0x1f4] sm:$0xf0]  ;;  %v7726_v13 = vld [vmem:[%s11865_s10 + $0x1ec] sm:$0xf] }
 0x27d   :  { %v2345_v23 = vpop.f32.mrf.mxu1  ;;  %v2371_v24 = vpop.f32.mrf.mxu0  ;;  %v6449_v25 = vor.u32 %v7728_v12, %v6448_v10  ;;  %v6453_v31 = vor.u32 %v7726_v13, %v6450_v15  ;;  %v6368_v13 = vld [vmem:[%s11865_s10 + $0x148] sm:$0xf]  ;;  %v7708_v15 = vld [vmem:[%s11865_s10 + $0x154] sm:$0xf0] }
 0x27e   :  { %v10125_v28 = vadd.f32 %v2345_v23, %v2333_v18  ;;  %v2372_v29 = vadd.f32 %v2371_v24, %v2359_v45  ;;  %v6329_v18 = vor.u32 %v7699_v6, %v6328_v5  ;;  %v6200_v45 = vld [vmem:[%s11865_s10] sm:$0xf]  ;;  %v6320_v23 = vld [vmem:[%s11865_s10 + $0xe8] sm:$0xf]  ;;  %v7696_v24 = vld [vmem:[%s11865_s10 + $0xf4] sm:$0xf0]  ;;  %v6369_v17 = vor.u32 %v7708_v15, %v6368_v13 }
 0x27f   :  { %v6201_v14 = vor.u32 %v7667_v19, %v6200_v45  ;;  %v6321_v51 = vor.u32 %v7696_v24, %v6320_v23  ;;  %v6386_v5 = vld [vmem:[%s11865_s10 + $0x178] sm:$0xf0]  ;;  %v6256_v19 = vld [vmem:[%s11865_s10 + $0x68] sm:$0xf]  ;;  %v7942_v13 = vld [vmem:[%s11871_s12 + $0x6a8] sm:$0xf0] }
 0x280   :  { %4948 = vst [vmem:[%s11867_s15] sm:$0xff] %v10125_v28  ;;  %v2376_v39 = vmul.f32 0.5, %v2372_v29  ;;  %2928 = vmatpush.bf16.msrb.mxu0 %v6329_v18  ;;  %v6389_v6 = vor.u32 %v7710_v55, %v6386_v5  ;;  %v6370_v18 = vld [vmem:[%s11865_s10 + $0x158] sm:$0xf0]  ;;  %v7830_v55 = vld [vmem:[%s11871_s12 + $0x328] sm:$0xf0] }
 0x281   :  { %4949 = vst [vmem:[%s11868_s16] sm:$0xff] %v2372_v29  ;;  %2915 = vmatpush.bf16.msrb.mxu2 %v6201_v14  ;;  %v6373_v45 = vor.u32 %v7706_v16, %v6370_v18  ;;  %v6258_v23 = vld [vmem:[%s11865_s10 + $0x78] sm:$0xf0]  ;;  %v6849_v16 = vor.u32 %v7830_v55, %v6848_v2  ;;  %v7865_v2 = vld [vmem:[%s11871_s12 + $0x440] sm:$0xf0] }
 0x282   :  { %v2377_v44 = vmul.f32 1.442695, %v2376_v39  ;;  %v6205_v39 = vor.u32 %v7665_v20, %v6202_v22  ;;  %v7680_v20 = vld [vmem:[%s11865_s10 + $0x74] sm:$0xf0] }
 0x283   :  { %v6257_v22 = vor.u32 %v7680_v20, %v6256_v19  ;;  %v7823_v19 = vld [vmem:[%s11871_s12 + $0x2f0] sm:$0xf0] }
 0x284   :  { %7953 = vpow2.f32 %v2377_v44  ;;  %2973 = vmatpush.bf16.msra.mxu0 %v6449_v25  ;;  %2941 = vmatpush.bf16.msra.mxu3 %v6205_v39  ;;  %v7718_v44 = vld [vmem:[%s11865_s10 + $0x1ac] sm:$0xf]  ;;  %v7704_v25 = vld [vmem:[%s11865_s10 + $0x134] sm:$0xf0]  ;;  %v6336_v39 = vld [vmem:[%s11865_s10 + $0x108] sm:$0xf] }
 0x285   :  { %v2347_v58 = vpop.f32.mrf.mxu1  ;;  %v2373_v59 = vpop.f32.mrf.mxu0  ;;  %2960 = vmatpush.bf16.msra.mxu2 %v6321_v51  ;;  %v6421_v47 = vor.u32 %v7718_v44, %v6418_v30  ;;  %v6245_v51 = vor.u32 %v7674_v34, %v6242_v36  ;;  %v6224_v44 = vld [vmem:[%s11865_s10 + $0x28] sm:$0xf]  ;;  %v7670_v30 = vld [vmem:[%s11865_s10 + $0x2c] sm:$0xf]  ;;  %v7928_v34 = vld [vmem:[%s11871_s12 + $0x638] sm:$0xf0] }
 0x286   :  { %v6400_v58 = vld [vmem:[%s11865_s10 + $0x188] sm:$0xf]  ;;  %v7716_v59 = vld [vmem:[%s11865_s10 + $0x194] sm:$0xf0]  ;;  %v6229_v50 = vor.u32 %v7670_v30, %v6226_v48  ;;  %v7809_v30 = vld [vmem:[%s11871_s12 + $0x280] sm:$0xf0] }
 0x287   :  { %v6401_v46 = vor.u32 %v7716_v59, %v6400_v58  ;;  %v6210_v58 = vld [vmem:[%s11865_s10 + $0x18] sm:$0xf0]  ;;  %v7921_v48 = vld [vmem:[%s11871_s12 + $0x600] sm:$0xf0] }
 0x288   :  { %2974 = vmatpush.bf16.msra.mxu0 %v6433_v41  ;;  %v7698_v41 = vld [vmem:[%s11865_s10 + $0x10c] sm:$0xf]  ;;  %v6213_v59 = vor.u32 %v7666_v54, %v6210_v58  ;;  %v7760_v54 = vld [vmem:[%s11871_s12 + $0xf8] sm:$0xf0] }
 0x289   :  { %2961 = vmatpush.bf16.msra.mxu2 %v6305_v53  ;;  %v7668_v53 = vld [vmem:[%s11865_s10 + $0x14] sm:$0xf0]  ;;  %v7872_v58 = vld [vmem:[%s11871_s12 + $0x478] sm:$0xf0] }
 0x28a   :  { %v7954_v7 = vpop.eup %7953 }
 0x28b   :  { %v2379_v11 = vmul.f32 %v7954_v7, %v2375_v38  ;;  %v7688_v38 = vld [vmem:[%s11865_s10 + $0xb4] sm:$0xf0]  ;;  %v6272_v7 = vld [vmem:[%s11865_s10 + $0x88] sm:$0xf] }
 0x28c   :  { %2975 = vmatpush.bf16.msra.mxu0 %v6417_v26  ;;  %v6289_v63 = vor.u32 %v7688_v38, %v6288_v61  ;;  %v6273_v10 = vor.u32 %v7684_v8, %v6272_v7  ;;  %v7672_v26 = vld [vmem:[%s11865_s10 + $0x34] sm:$0xf0]  ;;  %v6876_v61 = vld [vmem:[%s11871_s12 + $0x348] sm:$0xf]  ;;  %v7837_v38 = vld [vmem:[%s11871_s12 + $0x360] sm:$0xf0] }
 0x28d   :  { %v2380_v21 = vadd.f32 %v2379_v11, %v10125_v28  ;;  %v6322_v28 = vld [vmem:[%s11865_s10 + $0xf8] sm:$0xf0]  ;;  %v6877_v0 = vor.u32 %v7837_v38, %v6876_v61  ;;  %v7781_v7 = vld [vmem:[%s11871_s12 + $0x1a0] sm:$0xf0]  ;;  %v7100_v8 = vld [vmem:[%s11871_s12 + $0x508] sm:$0xf] }
 0x28e   :  { %v6325_v40 = vor.u32 %v7694_v27, %v6322_v28  ;;  %2962 = vmatpush.bf16.msra.mxu2 %v6289_v63  ;;  %v6274_v11 = vld [vmem:[%s11865_s10 + $0x98] sm:$0xf0]  ;;  %v7702_v27 = vld [vmem:[%s11865_s10 + $0x12c] sm:$0xf]  ;;  %v6353_v28 = vor.u32 %v7704_v25, %v6352_v4  ;;  %v2400_v63 = vperm.slane %v2398_v32, 0 }
 0x28f   :  { %v2381_v29 = vpack.c.bf16 %v2380_v21, %v2380_v21  ;;  %v6277_v12 = vor.u32 %v7682_v9, %v6274_v11  ;;  %v7678_v21 = vld [vmem:[%s11865_s10 + $0x6c] sm:$0xf]  ;;  %v7893_v11 = vld [vmem:[%s11871_s12 + $0x520] sm:$0xf0] }
 0x290   :  { %2976 = vmatpush.bf16.msra.mxu0 %v6401_v46  ;;  %v6261_v24 = vor.u32 %v7678_v21, %v6258_v23  ;;  %v2401_v46 = vperm.slane %v2398_v32, 1  ;;  %v6624_v21 = vld [vmem:[%s11871_s12 + $0x150] sm:$0xf]  ;;  %v7268_v23 = vld [vmem:[%s11871_s12 + $0x658] sm:$0xf] }
 0x291   :  { %2492 = vmatmul.bf16.vlgmr.msrb.gmra.mxu3 %v2381_v29  ;;  %2505 = vmatmul.bf16.vlgmr.msrb.gmra.mxu1 %v2381_v29  ;;  %v6354_v29 = vld [vmem:[%s11865_s10 + $0x138] sm:$0xf0]  ;;  %v7774_v25 = vld [vmem:[%s11871_s12 + $0x168] sm:$0xf0]  ;;  %v6736_v32 = vld [vmem:[%s11871_s12 + $0x230] sm:$0xf] }
 0x292   :  { %2999 = vmatpush.bf16.msrb.mxu1 %v6453_v31  ;;  %2986 = vmatpush.bf16.msrb.mxu3 %v6325_v40  ;;  %v6240_v31 = vld [vmem:[%s11865_s10 + $0x48] sm:$0xf]  ;;  %v6357_v49 = vor.u32 %v7702_v27, %v6354_v29  ;;  %v7700_v40 = vld [vmem:[%s11865_s10 + $0x114] sm:$0xf0]  ;;  %v7072_v27 = vld [vmem:[%s11871_s12 + $0x4d0] sm:$0xf] }
 0x293   :  { %2963 = vmatpush.bf16.msra.mxu2 %v6273_v10  ;;  %v6241_v14 = vor.u32 %v7676_v33, %v6240_v31  ;;  %v6337_v57 = vor.u32 %v7700_v40, %v6336_v39  ;;  %v6792_v31 = vld [vmem:[%s11871_s12 + $0x2a0] sm:$0xf]  ;;  %v6625_v39 = vor.u32 %v7774_v25, %v6624_v21  ;;  %v7914_v61 = vld [vmem:[%s11871_s12 + $0x5c8] sm:$0xf0] }
 0x294   :  { %2977 = vmatpush.bf16.msra.mxu0 %v6385_v3  ;;  %v7949_v3 = vld [vmem:[%s11871_s12 + $0x6e0] sm:$0xf0]  ;;  %v6456_v25 = vld [vmem:[%s11871_s12] sm:$0xf] }
 0x296   :  { %3000 = vmatpush.bf16.msrb.mxu1 %v6437_v42  ;;  %2987 = vmatpush.bf16.msrb.mxu3 %v6309_v56  ;;  %v6338_v42 = vld [vmem:[%s11865_s10 + $0x118] sm:$0xf0]  ;;  %v6209_v56 = vor.u32 %v7668_v53, %v6208_v52  ;;  %v6568_v52 = vld [vmem:[%s11871_s12 + $0xe0] sm:$0xf] }
 0x297   :  { %2964 = vmatpush.bf16.msra.mxu2 %v6257_v22  ;;  %v6341_v43 = vor.u32 %v7698_v41, %v6338_v42  ;;  %v7101_v22 = vor.u32 %v7893_v11, %v7100_v8  ;;  %v7767_v41 = vld [vmem:[%s11871_s12 + $0x130] sm:$0xf0]  ;;  %v7044_v42 = vld [vmem:[%s11871_s12 + $0x498] sm:$0xf]  ;;  %v6569_v38 = vor.u32 %v7760_v54, %v6568_v52  ;;  %v7858_v11 = vld [vmem:[%s11871_s12 + $0x408] sm:$0xf0] }
 0x298   :  { %2978 = vmatpush.bf16.msra.mxu0 %v6369_v17  ;;  %v7813_v54 = vld [vmem:[%s11871_s12 + $0x2a4] sm:$0xf] }
 0x29a   :  { %3001 = vmatpush.bf16.msrb.mxu1 %v6421_v47  ;;  %2988 = vmatpush.bf16.msrb.mxu3 %v6293_v37  ;;  %v6225_v47 = vor.u32 %v7672_v26, %v6224_v44  ;;  %v7324_v37 = vld [vmem:[%s11871_s12 + $0x6c8] sm:$0xf] }
 0x29b   :  { %2965 = vmatpush.bf16.msra.mxu2 %v6241_v14  ;;  %v7325_v9 = vor.u32 %v7949_v3, %v7324_v37  ;;  %v7240_v14 = vld [vmem:[%s11871_s12 + $0x620] sm:$0xf]  ;;  %v6764_v44 = vld [vmem:[%s11871_s12 + $0x268] sm:$0xf] }
 0x29c   :  { %2979 = vmatpush.bf16.msra.mxu0 %v6353_v28  ;;  %v7886_v28 = vld [vmem:[%s11871_s12 + $0x4e8] sm:$0xf0]  ;;  %v7241_v26 = vor.u32 %v7928_v34, %v7240_v14  ;;  %v6988_v37 = vld [vmem:[%s11871_s12 + $0x428] sm:$0xf]  ;;  %v7771_v14 = vld [vmem:[%s11871_s12 + $0x154] sm:$0xf] }
 0x29d   :  { %v7073_v40 = vor.u32 %v7886_v28, %v7072_v27  ;;  %v6989_v8 = vor.u32 %v7865_v2, %v6988_v37  ;;  %v7732_v27 = vld [vmem:[%s11871_s12 + $0x18] sm:$0xf0]  ;;  %v7778_v28 = vld [vmem:[%s11871_s12 + $0x18c] sm:$0xf]  ;;  %v6626_v34 = vld [vmem:[%s11871_s12 + $0x16c] sm:$0xf0] }
 0x29e   :  { %3002 = vmatpush.bf16.msrb.mxu1 %v6405_v35  ;;  %2989 = vmatpush.bf16.msrb.mxu3 %v6277_v12  ;;  %v7296_v12 = vld [vmem:[%s11871_s12 + $0x690] sm:$0xf]  ;;  %v6766_v37 = vld [vmem:[%s11871_s12 + $0x284] sm:$0xf0]  ;;  %v7890_v2 = vld [vmem:[%s11871_s12 + $0x50c] sm:$0xf] }
 0x29f   :  { %2966 = vmatpush.bf16.msra.mxu2 %v6225_v47  ;;  %v7297_v17 = vor.u32 %v7942_v13, %v7296_v12  ;;  %v7212_v47 = vld [vmem:[%s11871_s12 + $0x5e8] sm:$0xf]  ;;  %v6680_v13 = vld [vmem:[%s11871_s12 + $0x1c0] sm:$0xf] }
 0x2a0   :  { %2980 = vmatpush.bf16.msra.mxu0 %v6337_v57  ;;  %v7879_v57 = vld [vmem:[%s11871_s12 + $0x4b0] sm:$0xf0] }
 0x2a1   :  { %v7045_v53 = vor.u32 %v7879_v57, %v7044_v42  ;;  %v6822_v42 = vld [vmem:[%s11871_s12 + $0x2f4] sm:$0xf0] }
 0x2a2   :  { %3003 = vmatpush.bf16.msrb.mxu1 %v6389_v6  ;;  %2990 = vmatpush.bf16.msrb.mxu3 %v6261_v24  ;;  %v6652_v6 = vld [vmem:[%s11871_s12 + $0x188] sm:$0xf]  ;;  %v7935_v24 = vld [vmem:[%s11871_s12 + $0x670] sm:$0xf0] }
 0x2a3   :  { %2967 = vmatpush.bf16.msra.mxu2 %v6209_v56  ;;  %v6653_v20 = vor.u32 %v7781_v7, %v6652_v6  ;;  %v7269_v33 = vor.u32 %v7935_v24, %v7268_v23  ;;  %v7016_v56 = vld [vmem:[%s11871_s12 + $0x460] sm:$0xf]  ;;  %v6512_v7 = vld [vmem:[%s11871_s12 + $0x70] sm:$0xf]  ;;  %v7827_v24 = vld [vmem:[%s11871_s12 + $0x314] sm:$0xf] }
 0x2a6   :  { %3004 = vmatpush.bf16.msrb.mxu1 %v6373_v45  ;;  %2991 = vmatpush.bf16.msrb.mxu3 %v6245_v51  ;;  %v6820_v45 = vld [vmem:[%s11871_s12 + $0x2d8] sm:$0xf] }
 0x2a7   :  { %v6821_v29 = vor.u32 %v7823_v19, %v6820_v45  ;;  %v6596_v51 = vld [vmem:[%s11871_s12 + $0x118] sm:$0xf] }
 0x2a8   :  { %v6484_v19 = vld [vmem:[%s11871_s12 + $0x38] sm:$0xf] }
 0x2aa   :  { %3005 = vmatpush.bf16.msrb.mxu1 %v6357_v49  ;;  %2992 = vmatpush.bf16.msrb.mxu3 %v6229_v50  ;;  %v7816_v49 = vld [vmem:[%s11871_s12 + $0x2b8] sm:$0xf0]  ;;  %v6597_v50 = vor.u32 %v7767_v41, %v6596_v51  ;;  %v6598_v51 = vld [vmem:[%s11871_s12 + $0x134] sm:$0xf0] }
 0x2ae   :  { %3006 = vmatpush.bf16.msrb.mxu1 %v6341_v43  ;;  %2993 = vmatpush.bf16.msrb.mxu3 %v6213_v59  ;;  %v6793_v43 = vor.u32 %v7816_v49, %v6792_v31  ;;  %v6765_v59 = vor.u32 %v7809_v30, %v6764_v44  ;;  %v7851_v44 = vld [vmem:[%s11871_s12 + $0x3d0] sm:$0xf0] }
 0x30e   :  { %v2506_v60 = vpop.f32.mrf.mxu1 }
 0x30f   :  { %v2507_v35 = vadd.f32 %v2506_v60, %v2401_v46  ;;  %v7213_v46 = vor.u32 %v7921_v48, %v7212_v47  ;;  %v7802_v60 = vld [vmem:[%s11871_s12 + $0x248] sm:$0xf0]  ;;  %v7907_v47 = vld [vmem:[%s11871_s12 + $0x590] sm:$0xf0]  ;;  %v7757_v48 = vld [vmem:[%s11871_s12 + $0xe4] sm:$0xf] }
 0x310   :  { %v6737_v55 = vor.u32 %v7802_v60, %v6736_v32  ;;  %v7844_v32 = vld [vmem:[%s11871_s12 + $0x398] sm:$0xf0] }
 0x311   :  { %v2511_v62 = vmax.f32 %v2507_v35, 0.0  ;;  %v7184_v35 = vld [vmem:[%s11871_s12 + $0x5b0] sm:$0xf]  ;;  %v7900_v60 = vld [vmem:[%s11871_s12 + $0x558] sm:$0xf0] }
 0x312   :  { %v7185_v3 = vor.u32 %v7914_v61, %v7184_v35 }
 0x313   :  { %v10432_v1 = vpack.c.bf16 %v2511_v62, %v2511_v62  ;;  %v6540_v62 = vld [vmem:[%s11871_s12 + $0xa8] sm:$0xf] }
 0x314   :  { %v2493_v5 = vpop.f32.mrf.mxu3 }
 0x315   :  { %v2494_v10 = vadd.f32 %v2493_v5, %v2400_v63  ;;  %2929 = vmatmul.bf16.vlgmr.msrb.gmra.mxu0 %v10432_v1  ;;  %2955 = vmatmul.bf16.vlgmr.msra.gmra.mxu1 %v10432_v1  ;;  %v7017_v63 = vor.u32 %v7872_v58, %v7016_v56  ;;  %v7795_v5 = vld [vmem:[%s11871_s12 + $0x210] sm:$0xf0]  ;;  %v6794_v56 = vld [vmem:[%s11871_s12 + $0x2bc] sm:$0xf0] }
 0x316   :  { %v2508_v15 = vpop.f32.mrf.mxu1  ;;  %4457 = vmatpush.bf16.msrb.mxu0 %v6877_v0  ;;  %4483 = vmatpush.bf16.msra.mxu1 %v7325_v9  ;;  %v7753_v0 = vld [vmem:[%s11871_s12 + $0xc0] sm:$0xf0]  ;;  %v7746_v9 = vld [vmem:[%s11871_s12 + $0x88] sm:$0xf0]  ;;  %v6904_v58 = vld [vmem:[%s11871_s12 + $0x380] sm:$0xf] }
 0x317   :  { %v2510_v18 = vmax.f32 %v2494_v10, 0.0  ;;  %v6541_v6 = vor.u32 %v7753_v0, %v6540_v62  ;;  %v6960_v10 = vld [vmem:[%s11871_s12 + $0x3f0] sm:$0xf]  ;;  %v7788_v15 = vld [vmem:[%s11871_s12 + $0x1d8] sm:$0xf0]  ;;  %v6905_v35 = vor.u32 %v7844_v32, %v6904_v58 }
 0x318   :  { %v6961_v45 = vor.u32 %v7858_v11, %v6960_v10  ;;  %v6681_v21 = vor.u32 %v7788_v15, %v6680_v13  ;;  %v6542_v62 = vld [vmem:[%s11871_s12 + $0xc4] sm:$0xf0]  ;;  %v7799_v10 = vld [vmem:[%s11871_s12 + $0x234] sm:$0xf]  ;;  %v7074_v15 = vld [vmem:[%s11871_s12 + $0x4ec] sm:$0xf0] }
 0x319   :  { %v10478_v4 = vpack.c.bf16 %v2510_v18, %v2510_v18  ;;  %v6878_v18 = vld [vmem:[%s11871_s12 + $0x364] sm:$0xf0]  ;;  %v7883_v13 = vld [vmem:[%s11871_s12 + $0x4d4] sm:$0xf] }
 0x31a   :  { %4458 = vmatpush.bf16.msrb.mxu0 %v6849_v16  ;;  %4484 = vmatpush.bf16.msra.mxu1 %v7297_v17  ;;  %v6513_v16 = vor.u32 %v7746_v9, %v6512_v7  ;;  %v7834_v17 = vld [vmem:[%s11871_s12 + $0x34c] sm:$0xf]  ;;  %v6514_v9 = vld [vmem:[%s11871_s12 + $0x8c] sm:$0xf0]  ;;  %v7911_v58 = vld [vmem:[%s11871_s12 + $0x5b4] sm:$0xf] }
 0x31b   :  { %2916 = vmatmul.bf16.vlgmr.msrb.gmra.mxu2 %v10478_v4  ;;  %2942 = vmatmul.bf16.vlgmr.msra.gmra.mxu3 %v10478_v4 }
 0x31c   :  { %v2495_v36 = vpop.f32.mrf.mxu3  ;;  %4444 = vmatpush.bf16.msrb.mxu2 %v6653_v20  ;;  %4470 = vmatpush.bf16.msra.mxu3 %v7101_v22  ;;  %v7739_v20 = vld [vmem:[%s11871_s12 + $0x50] sm:$0xf0]  ;;  %v6881_v22 = vor.u32 %v7834_v17, %v6878_v18  ;;  %v7077_v17 = vor.u32 %v7883_v13, %v7074_v15 }
 0x31d   :  { %v6485_v23 = vor.u32 %v7739_v20, %v6484_v19  ;;  %v6629_v36 = vor.u32 %v7771_v14, %v6626_v34  ;;  %v7939_v18 = vld [vmem:[%s11871_s12 + $0x694] sm:$0xf]  ;;  %v7736_v20 = vld [vmem:[%s11871_s12 + $0x3c] sm:$0xf]  ;;  %v6458_v14 = vld [vmem:[%s11871_s12 + $0x1c] sm:$0xf0] }
 0x31e   :  { %4459 = vmatpush.bf16.msrb.mxu0 %v6821_v29  ;;  %4485 = vmatpush.bf16.msra.mxu1 %v7269_v33  ;;  %v6654_v29 = vld [vmem:[%s11871_s12 + $0x1a4] sm:$0xf0]  ;;  %v6457_v33 = vor.u32 %v7732_v27, %v6456_v25  ;;  %v7046_v25 = vld [vmem:[%s11871_s12 + $0x4b4] sm:$0xf0]  ;;  %v7785_v34 = vld [vmem:[%s11871_s12 + $0x1c4] sm:$0xf] }
 0x31f   :  { %v6657_v49 = vor.u32 %v7778_v28, %v6654_v29  ;;  %v7932_v29 = vld [vmem:[%s11871_s12 + $0x65c] sm:$0xf] }
 0x320   :  { %4445 = vmatpush.bf16.msrb.mxu2 %v6625_v39  ;;  %4471 = vmatpush.bf16.msra.mxu3 %v7073_v40  ;;  %v7764_v39 = vld [vmem:[%s11871_s12 + $0x11c] sm:$0xf] }
 0x321   :  { %v7820_v40 = vld [vmem:[%s11871_s12 + $0x2dc] sm:$0xf]  ;;  %v6601_v41 = vor.u32 %v7764_v39, %v6598_v51  ;;  %v6682_v39 = vld [vmem:[%s11871_s12 + $0x1dc] sm:$0xf0]  ;;  %v7869_v51 = vld [vmem:[%s11871_s12 + $0x464] sm:$0xf] }
 0x322   :  { %4460 = vmatpush.bf16.msrb.mxu0 %v6793_v43  ;;  %4486 = vmatpush.bf16.msra.mxu1 %v7241_v26  ;;  %v6825_v57 = vor.u32 %v7820_v40, %v6822_v42  ;;  %v6932_v43 = vld [vmem:[%s11871_s12 + $0x3b8] sm:$0xf]  ;;  %v7018_v40 = vld [vmem:[%s11871_s12 + $0x47c] sm:$0xf0] }
 0x323   :  { %v7156_v26 = vld [vmem:[%s11871_s12 + $0x578] sm:$0xf]  ;;  %v6933_v30 = vor.u32 %v7851_v44, %v6932_v43  ;;  %v7021_v42 = vor.u32 %v7869_v51, %v7018_v40  ;;  %v7242_v43 = vld [vmem:[%s11871_s12 + $0x63c] sm:$0xf0]  ;;  %v7768_v40 = vld [vmem:[%s11871_s12 + $0x138] sm:$0xf0] }
 0x324   :  { %4446 = vmatpush.bf16.msrb.mxu2 %v6597_v50  ;;  %4472 = vmatpush.bf16.msra.mxu3 %v7045_v53  ;;  %v6570_v50 = vld [vmem:[%s11871_s12 + $0xfc] sm:$0xf0]  ;;  %v7157_v52 = vor.u32 %v7907_v47, %v7156_v26  ;;  %v7862_v26 = vld [vmem:[%s11871_s12 + $0x42c] sm:$0xf] }
 0x325   :  { %2981 = vmatmul.bf16.vlgmr.msra.gmra.mxu0 %v10432_v1  ;;  %3007 = vmatmul.bf16.vlgmr.msrb.gmra.mxu1 %v10432_v1  ;;  %v6708_v1 = vld [vmem:[%s11871_s12 + $0x1f8] sm:$0xf]  ;;  %v6573_v53 = vor.u32 %v7757_v48, %v6570_v50  ;;  %v7918_v47 = vld [vmem:[%s11871_s12 + $0x5ec] sm:$0xf]  ;;  %v7214_v50 = vld [vmem:[%s11871_s12 + $0x604] sm:$0xf0] }
 0x326   :  { %4461 = vmatpush.bf16.msrb.mxu0 %v6765_v59  ;;  %4487 = vmatpush.bf16.msra.mxu1 %v7213_v46  ;;  %v6709_v12 = vor.u32 %v7795_v5, %v6708_v1  ;;  %v6797_v59 = vor.u32 %v7813_v54, %v6794_v56  ;;  %v7128_v46 = vld [vmem:[%s11871_s12 + $0x540] sm:$0xf]  ;;  %v7946_v5 = vld [vmem:[%s11871_s12 + $0x6cc] sm:$0xf]  ;;  %v6962_v54 = vld [vmem:[%s11871_s12 + $0x40c] sm:$0xf0] }
 0x327   :  { %v7129_v61 = vor.u32 %v7900_v60, %v7128_v46  ;;  %v7848_v46 = vld [vmem:[%s11871_s12 + $0x3bc] sm:$0xf]  ;;  %v6934_v60 = vld [vmem:[%s11871_s12 + $0x3d4] sm:$0xf0]  ;;  %v6604_v51 = vld [vmem:[%s11871_s12 + $0x120] sm:$0xf] }
 0x328   :  { %4447 = vmatpush.bf16.msrb.mxu2 %v6569_v38  ;;  %4473 = vmatpush.bf16.msra.mxu3 %v7017_v63  ;;  %v7750_v38 = vld [vmem:[%s11871_s12 + $0xac] sm:$0xf] }
 0x329   :  { %v7806_v63 = vld [vmem:[%s11871_s12 + $0x26c] sm:$0xf]  ;;  %v6545_v0 = vor.u32 %v7750_v38, %v6542_v62  ;;  %v7158_v38 = vld [vmem:[%s11871_s12 + $0x594] sm:$0xf0] }
 0x32a   :  { %4462 = vmatpush.bf16.msrb.mxu0 %v6737_v55  ;;  %4488 = vmatpush.bf16.msra.mxu1 %v7185_v3  ;;  %v7102_v55 = vld [vmem:[%s11871_s12 + $0x524] sm:$0xf0]  ;;  %v6769_v3 = vor.u32 %v7806_v63, %v6766_v37  ;;  %v7841_v37 = vld [vmem:[%s11871_s12 + $0x384] sm:$0xf] }
 0x32b   :  { %2968 = vmatmul.bf16.vlgmr.msra.gmra.mxu2 %v10478_v4  ;;  %2994 = vmatmul.bf16.vlgmr.msrb.gmra.mxu3 %v10478_v4  ;;  %v6850_v4 = vld [vmem:[%s11871_s12 + $0x32c] sm:$0xf0]  ;;  %v7105_v1 = vor.u32 %v7890_v2, %v7102_v55  ;;  %v6906_v2 = vld [vmem:[%s11871_s12 + $0x39c] sm:$0xf0]  ;;  %v7897_v55 = vld [vmem:[%s11871_s12 + $0x544] sm:$0xf] }
 0x32c   :  { %4448 = vmatpush.bf16.msrb.mxu2 %v6541_v6  ;;  %4474 = vmatpush.bf16.msra.mxu3 %v6989_v8  ;;  %v6853_v31 = vor.u32 %v7827_v24, %v6850_v4  ;;  %v7326_v6 = vld [vmem:[%s11871_s12 + $0x6e4] sm:$0xf0]  ;;  %v7743_v8 = vld [vmem:[%s11871_s12 + $0x74] sm:$0xf]  ;;  %v6710_v24 = vld [vmem:[%s11871_s12 + $0x214] sm:$0xf0] }
 0x32d   :  { %v7329_v7 = vor.u32 %v7946_v5, %v7326_v6  ;;  %v6517_v11 = vor.u32 %v7743_v8, %v6514_v9  ;;  %v7876_v4 = vld [vmem:[%s11871_s12 + $0x49c] sm:$0xf]  ;;  %v2578_v6 = vld [vmem:[%s11872_s11] sm:$0xf] }
 0x32e   :  { %4463 = vmatpush.bf16.msrb.mxu0 %v6709_v12  ;;  %4489 = vmatpush.bf16.msra.mxu1 %v7157_v52  ;;  %v6738_v12 = vld [vmem:[%s11871_s12 + $0x24c] sm:$0xf0]  ;;  %v7049_v28 = vor.u32 %v7876_v4, %v7046_v25  ;;  %v7217_v52 = vor.u32 %v7918_v47, %v7214_v50  ;;  %v2580_v9 = vperm.slane %v2578_v6, 0  ;;  %v7761_v50 = vld [vmem:[%s11871_s12 + $0x100] sm:$0xf0] }
 0x330   :  { %4449 = vmatpush.bf16.msrb.mxu2 %v6513_v16  ;;  %4475 = vmatpush.bf16.msra.mxu3 %v6961_v45  ;;  %v6741_v16 = vor.u32 %v7799_v10, %v6738_v12  ;;  %v7298_v45 = vld [vmem:[%s11871_s12 + $0x6ac] sm:$0xf0]  ;;  %v2581_v10 = vperm.slane %v2578_v6, 1 }
 0x331   :  { %v7301_v19 = vor.u32 %v7939_v18, %v7298_v45  ;;  %v7782_v45 = vld [vmem:[%s11871_s12 + $0x1a8] sm:$0xf0] }
 0x332   :  { %4464 = vmatpush.bf16.msrb.mxu0 %v6681_v21  ;;  %4490 = vmatpush.bf16.msra.mxu1 %v7129_v61  ;;  %v6486_v21 = vld [vmem:[%s11871_s12 + $0x54] sm:$0xf0]  ;;  %v6937_v61 = vor.u32 %v7848_v46, %v6934_v60 }
 0x334   :  { %4450 = vmatpush.bf16.msrb.mxu2 %v6485_v23  ;;  %4476 = vmatpush.bf16.msra.mxu3 %v6933_v30  ;;  %v6489_v23 = vor.u32 %v7736_v20, %v6486_v21  ;;  %v6990_v30 = vld [vmem:[%s11871_s12 + $0x444] sm:$0xf0]  ;;  %v7838_v20 = vld [vmem:[%s11871_s12 + $0x368] sm:$0xf0] }
 0x335   :  { %v6993_v48 = vor.u32 %v7862_v26, %v6990_v30  ;;  %v2583_v26 = vperm.slane %v2578_v6, 3  ;;  %v6605_v30 = vor.u32 %v7768_v40, %v6604_v51  ;;  %v6464_v51 = vld [vmem:[%s11871_s12 + $0x8] sm:$0xf]  ;;  %v7733_v40 = vld [vmem:[%s11871_s12 + $0x20] sm:$0xf0] }
 0x336   :  { %4509 = vmatpush.bf16.msra.mxu0 %v6881_v22  ;;  %4535 = vmatpush.bf16.msrb.mxu1 %v7329_v7  ;;  %v7792_v22 = vld [vmem:[%s11871_s12 + $0x1fc] sm:$0xf] }
 0x337   :  { %v6713_v27 = vor.u32 %v7792_v22, %v6710_v24 }
 0x338   :  { %4451 = vmatpush.bf16.msrb.mxu2 %v6457_v33  ;;  %4477 = vmatpush.bf16.msra.mxu3 %v6905_v35  ;;  %v7904_v35 = vld [vmem:[%s11871_s12 + $0x57c] sm:$0xf] }
 0x33a   :  { %4510 = vmatpush.bf16.msra.mxu0 %v6853_v31  ;;  %4536 = vmatpush.bf16.msrb.mxu1 %v7301_v19  ;;  %v7270_v31 = vld [vmem:[%s11871_s12 + $0x674] sm:$0xf0]  ;;  %v6884_v19 = vld [vmem:[%s11871_s12 + $0x350] sm:$0xf] }
 0x33b   :  { %v7273_v33 = vor.u32 %v7932_v29, %v7270_v31  ;;  %v6885_v25 = vor.u32 %v7838_v20, %v6884_v19  ;;  %v7775_v31 = vld [vmem:[%s11871_s12 + $0x170] sm:$0xf0]  ;;  %v7304_v19 = vld [vmem:[%s11871_s12 + $0x698] sm:$0xf] }
 0x33c   :  { %4496 = vmatpush.bf16.msra.mxu2 %v6657_v49  ;;  %4522 = vmatpush.bf16.msrb.mxu3 %v7105_v1  ;;  %v7729_v49 = vld [vmem:[%s11871_s12 + $0x4] sm:$0xf]  ;;  %v7130_v1 = vld [vmem:[%s11871_s12 + $0x55c] sm:$0xf0]  ;;  %v7943_v20 = vld [vmem:[%s11871_s12 + $0x6b0] sm:$0xf0] }
 0x33d   :  { %v7133_v5 = vor.u32 %v7897_v55, %v7130_v1  ;;  %v7950_v1 = vld [vmem:[%s11871_s12 + $0x6e8] sm:$0xf0] }
 0x33e   :  { %4511 = vmatpush.bf16.msra.mxu0 %v6825_v57  ;;  %4537 = vmatpush.bf16.msrb.mxu1 %v7273_v33  ;;  %v7925_v57 = vld [vmem:[%s11871_s12 + $0x624] sm:$0xf]  ;;  %v6856_v33 = vld [vmem:[%s11871_s12 + $0x318] sm:$0xf] }
 0x33f   :  { %v7245_v44 = vor.u32 %v7925_v57, %v7242_v43 }
 0x340   :  { %4497 = vmatpush.bf16.msra.mxu2 %v6629_v36  ;;  %4523 = vmatpush.bf16.msrb.mxu3 %v7077_v17  ;;  %v6461_v36 = vor.u32 %v7729_v49, %v6458_v14  ;;  %v7831_v49 = vld [vmem:[%s11871_s12 + $0x330] sm:$0xf0] }
 0x342   :  { %4512 = vmatpush.bf16.msra.mxu0 %v6797_v59  ;;  %4538 = vmatpush.bf16.msrb.mxu1 %v7245_v44  ;;  %v7186_v59 = vld [vmem:[%s11871_s12 + $0x5cc] sm:$0xf0]  ;;  %v2582_v44 = vperm.slane %v2578_v6, 2 }
 0x343   :  { %v7189_v32 = vor.u32 %v7911_v58, %v7186_v59 }
 0x344   :  { %4498 = vmatpush.bf16.msra.mxu2 %v6601_v41  ;;  %4524 = vmatpush.bf16.msrb.mxu3 %v7049_v28  ;;  %v6685_v41 = vor.u32 %v7785_v34, %v6682_v39  ;;  %v6857_v39 = vor.u32 %v7831_v49, %v6856_v33  ;;  %v7052_v33 = vld [vmem:[%s11871_s12 + $0x4a0] sm:$0xf]  ;;  %v7880_v49 = vld [vmem:[%s11871_s12 + $0x4b8] sm:$0xf0] }
 0x346   :  { %4513 = vmatpush.bf16.msra.mxu0 %v6769_v3  ;;  %4539 = vmatpush.bf16.msrb.mxu1 %v7217_v52  ;;  %v6909_v3 = vor.u32 %v7841_v37, %v6906_v2  ;;  %v6800_v52 = vld [vmem:[%s11871_s12 + $0x2a8] sm:$0xf]  ;;  %v7894_v37 = vld [vmem:[%s11871_s12 + $0x528] sm:$0xf0] }
 0x348   :  { %4499 = vmatpush.bf16.msra.mxu2 %v6573_v53  ;;  %4525 = vmatpush.bf16.msrb.mxu3 %v7021_v42  ;;  %v7855_v53 = vld [vmem:[%s11871_s12 + $0x3f4] sm:$0xf]  ;;  %v7824_v42 = vld [vmem:[%s11871_s12 + $0x2f8] sm:$0xf0] }
 0x349   :  { %v6965_v56 = vor.u32 %v7855_v53, %v6962_v54  ;;  %v7817_v53 = vld [vmem:[%s11871_s12 + $0x2c0] sm:$0xf0] }
 0x34a   :  { %4514 = vmatpush.bf16.msra.mxu0 %v6741_v16  ;;  %4540 = vmatpush.bf16.msrb.mxu1 %v7189_v32  ;;  %v6660_v16 = vld [vmem:[%s11871_s12 + $0x190] sm:$0xf]  ;;  %v6801_v46 = vor.u32 %v7817_v53, %v6800_v52  ;;  %v7835_v52 = vld [vmem:[%s11871_s12 + $0x354] sm:$0xf] }
 0x34b   :  { %v6661_v4 = vor.u32 %v7782_v45, %v6660_v16  ;;  %v6744_v16 = vld [vmem:[%s11871_s12 + $0x238] sm:$0xf]  ;;  %v7887_v45 = vld [vmem:[%s11871_s12 + $0x4f0] sm:$0xf0]  ;;  %v6886_v53 = vld [vmem:[%s11871_s12 + $0x36c] sm:$0xf0] }
 0x34c   :  { %4500 = vmatpush.bf16.msra.mxu2 %v6545_v0  ;;  %4526 = vmatpush.bf16.msrb.mxu3 %v6993_v48  ;;  %v7161_v0 = vor.u32 %v7904_v35, %v7158_v38  ;;  %v6576_v48 = vld [vmem:[%s11871_s12 + $0xe8] sm:$0xf]  ;;  %v7754_v38 = vld [vmem:[%s11871_s12 + $0xc8] sm:$0xf0] }
 0x34d   :  { %v6577_v32 = vor.u32 %v7761_v50, %v6576_v48  ;;  %v7779_v48 = vld [vmem:[%s11871_s12 + $0x194] sm:$0xf]  ;;  %v6662_v50 = vld [vmem:[%s11871_s12 + $0x1ac] sm:$0xf0] }
 0x34e   :  { %4515 = vmatpush.bf16.msra.mxu0 %v6713_v27  ;;  %4541 = vmatpush.bf16.msrb.mxu1 %v7161_v0  ;;  %v6632_v27 = vld [vmem:[%s11871_s12 + $0x158] sm:$0xf]  ;;  %v7108_v0 = vld [vmem:[%s11871_s12 + $0x510] sm:$0xf] }
 0x350   :  { %4501 = vmatpush.bf16.msra.mxu2 %v6517_v11  ;;  %4527 = vmatpush.bf16.msrb.mxu3 %v6965_v56 }
 0x352   :  { %4516 = vmatpush.bf16.msra.mxu0 %v6685_v41  ;;  %4542 = vmatpush.bf16.msrb.mxu1 %v7133_v5  ;;  %v6828_v41 = vld [vmem:[%s11871_s12 + $0x2e0] sm:$0xf] }
 0x353   :  { %v6829_v47 = vor.u32 %v7824_v42, %v6828_v41  ;;  %v6688_v41 = vld [vmem:[%s11871_s12 + $0x1c8] sm:$0xf]  ;;  %v7053_v42 = vor.u32 %v7880_v49, %v7052_v33  ;;  %v7845_v49 = vld [vmem:[%s11871_s12 + $0x3a0] sm:$0xf0] }
 0x354   :  { %4502 = vmatpush.bf16.msra.mxu2 %v6489_v23  ;;  %4528 = vmatpush.bf16.msrb.mxu3 %v6937_v61  ;;  %v6548_v61 = vld [vmem:[%s11871_s12 + $0xb0] sm:$0xf]  ;;  %v6912_v33 = vld [vmem:[%s11871_s12 + $0x388] sm:$0xf] }
 0x358   :  { %4503 = vmatpush.bf16.msra.mxu2 %v6461_v36  ;;  %4529 = vmatpush.bf16.msrb.mxu3 %v6909_v3  ;;  %v6633_v36 = vor.u32 %v7775_v31, %v6632_v27  ;;  %v7332_v3 = vld [vmem:[%s11871_s12 + $0x6d0] sm:$0xf]  ;;  %v6716_v27 = vld [vmem:[%s11871_s12 + $0x200] sm:$0xf]  ;;  %v7796_v31 = vld [vmem:[%s11871_s12 + $0x218] sm:$0xf0] }
 0x392   :  { %v2930_v62 = vpop.f32.mrf.mxu0  ;;  %v2956_v63 = vpop.f32.mrf.mxu1 }
 0x39a   :  { %v2932_v7 = vpop.f32.mrf.mxu0  ;;  %v2958_v8 = vpop.f32.mrf.mxu1 }
 0x39b   :  { %v6549_v7 = vor.u32 %v7754_v38, %v6548_v61  ;;  %v7220_v61 = vld [vmem:[%s11871_s12 + $0x5f0] sm:$0xf]  ;;  %v7922_v38 = vld [vmem:[%s11871_s12 + $0x608] sm:$0xf0] }
 0x39e   :  { %v2917_v11 = vpop.f32.mrf.mxu2  ;;  %v2943_v12 = vpop.f32.mrf.mxu3 }
 0x39f   :  { %v2918_v13 = vadd.f32 %v2917_v11, %v2580_v9  ;;  %v2944_v15 = vadd.f32 %v2943_v12, %v2581_v10  ;;  %v6520_v9 = vld [vmem:[%s11871_s12 + $0x78] sm:$0xf]  ;;  %v7747_v10 = vld [vmem:[%s11871_s12 + $0x90] sm:$0xf0] }
 0x3a1   :  { %v2931_v17 = vadd.f32 %v2930_v62, %v2918_v13  ;;  %v2957_v18 = vadd.f32 %v2956_v63, %v2944_v15  ;;  %v6772_v62 = vld [vmem:[%s11871_s12 + $0x270] sm:$0xf]  ;;  %v7810_v63 = vld [vmem:[%s11871_s12 + $0x288] sm:$0xf0]  ;;  %v7109_v13 = vor.u32 %v7894_v37, %v7108_v0  ;;  %v7333_v15 = vor.u32 %v7950_v1, %v7332_v3  ;;  %v7828_v0 = vld [vmem:[%s11871_s12 + $0x31c] sm:$0xf] }
 0x3a2   :  { %v2982_v21 = vpop.f32.mrf.mxu0  ;;  %v3008_v22 = vpop.f32.mrf.mxu1  ;;  %v6773_v8 = vor.u32 %v7810_v63, %v6772_v62  ;;  %v7772_v62 = vld [vmem:[%s11871_s12 + $0x15c] sm:$0xf]  ;;  %v6634_v63 = vld [vmem:[%s11871_s12 + $0x174] sm:$0xf0]  ;;  %v7859_v1 = vld [vmem:[%s11871_s12 + $0x410] sm:$0xf0] }
 0x3a3   :  { %v3012_v23 = vmax.f32 %v2931_v17, 0.0  ;;  %v3013_v24 = vmax.f32 %v2957_v18, 0.0  ;;  %v7803_v17 = vld [vmem:[%s11871_s12 + $0x250] sm:$0xf0]  ;;  %v7080_v18 = vld [vmem:[%s11871_s12 + $0x4d8] sm:$0xf] }
 0x3a4   :  { %v6858_v37 = vld [vmem:[%s11871_s12 + $0x334] sm:$0xf0] }
 0x3a5   :  { %v10837_v28 = vpack.c.bf16 %v3012_v23, %v3012_v23  ;;  %v10839_v29 = vpack.c.bf16 %v3013_v24, %v3013_v24  ;;  %v6492_v23 = vld [vmem:[%s11871_s12 + $0x40] sm:$0xf]  ;;  %v7740_v24 = vld [vmem:[%s11871_s12 + $0x58] sm:$0xf0]  ;;  %v6968_v3 = vld [vmem:[%s11871_s12 + $0x3f8] sm:$0xf] }
 0x3a6   :  { %v2919_v14 = vpop.f32.mrf.mxu2  ;;  %v2945_v34 = vpop.f32.mrf.mxu3 }
 0x3a7   :  { %4452 = vmatmul.bf16.vlgmr.msrb.gmra.mxu2 %v10837_v28  ;;  %4465 = vmatmul.bf16.vlgmr.msrb.gmra.mxu0 %v10839_v29  ;;  %v7276_v14 = vld [vmem:[%s11871_s12 + $0x660] sm:$0xf]  ;;  %v7936_v34 = vld [vmem:[%s11871_s12 + $0x678] sm:$0xf0] }
 0x3a8   :  { %4548 = vmatpush.bf16.msrb.mxu2 %v6661_v4  ;;  %4561 = vmatpush.bf16.msrb.mxu0 %v6885_v25  ;;  %v7081_v4 = vor.u32 %v7887_v45, %v7080_v18  ;;  %v7305_v25 = vor.u32 %v7943_v20, %v7304_v19  ;;  %v6940_v18 = vld [vmem:[%s11871_s12 + $0x3c0] sm:$0xf]  ;;  %v7852_v45 = vld [vmem:[%s11871_s12 + $0x3d8] sm:$0xf0] }
 0x3aa   :  { %v2984_v57 = vpop.f32.mrf.mxu0  ;;  %v3010_v43 = vpop.f32.mrf.mxu1 }
 0x3ab   :  { %v7277_v57 = vor.u32 %v7936_v34, %v7276_v14  ;;  %v7789_v43 = vld [vmem:[%s11871_s12 + $0x1e0] sm:$0xf0]  ;;  %v7136_v14 = vld [vmem:[%s11871_s12 + $0x548] sm:$0xf] }
 0x3ac   :  { %4549 = vmatpush.bf16.msrb.mxu2 %v6633_v36  ;;  %4562 = vmatpush.bf16.msrb.mxu0 %v6857_v39  ;;  %v6493_v36 = vor.u32 %v7740_v24, %v6492_v23  ;;  %v6717_v39 = vor.u32 %v7796_v31, %v6716_v27  ;;  %v7758_v23 = vld [vmem:[%s11871_s12 + $0xec] sm:$0xf]  ;;  %v6578_v24 = vld [vmem:[%s11871_s12 + $0x104] sm:$0xf0]  ;;  %v6941_v27 = vor.u32 %v7852_v45, %v6940_v18 }
 0x3ad   :  { %v6581_v34 = vor.u32 %v7758_v23, %v6578_v24  ;;  %v7870_v18 = vld [vmem:[%s11871_s12 + $0x46c] sm:$0xf]  ;;  %v7026_v45 = vld [vmem:[%s11871_s12 + $0x484] sm:$0xf0]  ;;  %v6892_v23 = vld [vmem:[%s11871_s12 + $0x358] sm:$0xf] }
 0x3ae   :  { %v2969_v54 = vpop.f32.mrf.mxu2  ;;  %v2995_v56 = vpop.f32.mrf.mxu3  ;;  %v7839_v24 = vld [vmem:[%s11871_s12 + $0x370] sm:$0xf0] }
 0x3af   :  { %v2970_v58 = vadd.f32 %v2969_v54, %v2582_v44  ;;  %v2996_v59 = vadd.f32 %v2995_v56, %v2583_v26  ;;  %v7024_v44 = vld [vmem:[%s11871_s12 + $0x468] sm:$0xf]  ;;  %v7873_v26 = vld [vmem:[%s11871_s12 + $0x480] sm:$0xf0]  ;;  %v6465_v54 = vor.u32 %v7733_v40, %v6464_v51  ;;  %v6689_v56 = vor.u32 %v7789_v43, %v6688_v41  ;;  %v7751_v51 = vld [vmem:[%s11871_s12 + $0xb4] sm:$0xf] }
 0x3b0   :  { %4550 = vmatpush.bf16.msrb.mxu2 %v6605_v30  ;;  %4563 = vmatpush.bf16.msrb.mxu0 %v6829_v47  ;;  %v7248_v30 = vld [vmem:[%s11871_s12 + $0x628] sm:$0xf]  ;;  %v7929_v47 = vld [vmem:[%s11871_s12 + $0x640] sm:$0xf0]  ;;  %v6550_v40 = vld [vmem:[%s11871_s12 + $0xcc] sm:$0xf0] }
 0x3b1   :  { %v2983_v60 = vadd.f32 %v2982_v21, %v2970_v58  ;;  %v3009_v35 = vadd.f32 %v3008_v22, %v2996_v59  ;;  %v6521_v21 = vor.u32 %v7747_v10, %v6520_v9  ;;  %v6745_v22 = vor.u32 %v7803_v17, %v6744_v16  ;;  %v7192_v9 = vld [vmem:[%s11871_s12 + $0x5b8] sm:$0xf]  ;;  %v7915_v10 = vld [vmem:[%s11871_s12 + $0x5d0] sm:$0xf0]  ;;  %v7110_v43 = vld [vmem:[%s11871_s12 + $0x52c] sm:$0xf0] }
 0x3b2   :  { %v7025_v58 = vor.u32 %v7873_v26, %v7024_v44  ;;  %v7249_v59 = vor.u32 %v7929_v47, %v7248_v30  ;;  %v6969_v16 = vor.u32 %v7859_v1, %v6968_v3  ;;  %v7193_v17 = vor.u32 %v7915_v10, %v7192_v9  ;;  %v7807_v41 = vld [vmem:[%s11871_s12 + $0x274] sm:$0xf]  ;;  %v7334_v26 = vld [vmem:[%s11871_s12 + $0x6ec] sm:$0xf0]  ;;  %v7877_v3 = vld [vmem:[%s11871_s12 + $0x4a4] sm:$0xf] }
 0x3b3   :  { %v3014_v2 = vmax.f32 %v2983_v60, 0.0  ;;  %v3015_v55 = vmax.f32 %v3009_v35, 0.0  ;;  %v6665_v60 = vor.u32 %v7779_v48, %v6662_v50  ;;  %v6889_v35 = vor.u32 %v7835_v52, %v6886_v53  ;;  %v7947_v44 = vld [vmem:[%s11871_s12 + $0x6d4] sm:$0xf]  ;;  %v7744_v52 = vld [vmem:[%s11871_s12 + $0x7c] sm:$0xf] }
 0x3b4   :  { %4551 = vmatpush.bf16.msrb.mxu2 %v6577_v32  ;;  %4564 = vmatpush.bf16.msrb.mxu0 %v6801_v46  ;;  %v6996_v32 = vld [vmem:[%s11871_s12 + $0x430] sm:$0xf]  ;;  %v7866_v46 = vld [vmem:[%s11871_s12 + $0x448] sm:$0xf0]  ;;  %v6913_v30 = vor.u32 %v7845_v49, %v6912_v33  ;;  %v6553_v48 = vor.u32 %v7751_v51, %v6550_v40  ;;  %v6522_v53 = vld [vmem:[%s11871_s12 + $0x94] sm:$0xf0] }
 0x3b5   :  { %v10900_v5 = vpack.c.bf16 %v3014_v2, %v3014_v2  ;;  %v10902_v6 = vpack.c.bf16 %v3015_v55, %v3015_v55  ;;  %v6997_v2 = vor.u32 %v7866_v46, %v6996_v32  ;;  %v7221_v55 = vor.u32 %v7922_v38, %v7220_v61  ;;  %v7884_v32 = vld [vmem:[%s11871_s12 + $0x4dc] sm:$0xf]  ;;  %v7082_v46 = vld [vmem:[%s11871_s12 + $0x4f4] sm:$0xf0]  ;;  %v7054_v1 = vld [vmem:[%s11871_s12 + $0x4bc] sm:$0xf0] }
 0x3b6   :  { %v2971_v11 = vpop.f32.mrf.mxu2  ;;  %v2997_v12 = vpop.f32.mrf.mxu3  ;;  %v6525_v61 = vor.u32 %v7744_v52, %v6522_v53  ;;  %v7863_v33 = vld [vmem:[%s11871_s12 + $0x434] sm:$0xf]  ;;  %v6998_v49 = vld [vmem:[%s11871_s12 + $0x44c] sm:$0xf0]  ;;  %v6640_v51 = vld [vmem:[%s11871_s12 + $0x160] sm:$0xf] }
 0x3b7   :  { %4478 = vmatmul.bf16.vlgmr.msra.gmra.mxu3 %v10900_v5  ;;  %4491 = vmatmul.bf16.vlgmr.msra.gmra.mxu1 %v10902_v6  ;;  %v7765_v11 = vld [vmem:[%s11871_s12 + $0x124] sm:$0xf]  ;;  %v6606_v12 = vld [vmem:[%s11871_s12 + $0x13c] sm:$0xf0]  ;;  %v7776_v40 = vld [vmem:[%s11871_s12 + $0x178] sm:$0xf0] }
 0x3b8   :  { %4504 = vmatmul.bf16.vlgmr.msra.gmra.mxu2 %v10837_v28  ;;  %4517 = vmatmul.bf16.vlgmr.msra.gmra.mxu0 %v10839_v29  ;;  %v6609_v19 = vor.u32 %v7765_v11, %v6606_v12  ;;  %v7730_v11 = vld [vmem:[%s11871_s12 + $0xc] sm:$0xf]  ;;  %v6466_v12 = vld [vmem:[%s11871_s12 + $0x24] sm:$0xf0]  ;;  %v7769_v53 = vld [vmem:[%s11871_s12 + $0x140] sm:$0xf0] }
 0x3b9   :  { %4552 = vmatpush.bf16.msrb.mxu2 %v6549_v7  ;;  %4565 = vmatpush.bf16.msrb.mxu0 %v6773_v8  ;;  %v6637_v7 = vor.u32 %v7772_v62, %v6634_v63  ;;  %v6861_v8 = vor.u32 %v7828_v0, %v6858_v37  ;;  %v7737_v62 = vld [vmem:[%s11871_s12 + $0x44] sm:$0xf]  ;;  %v6494_v63 = vld [vmem:[%s11871_s12 + $0x5c] sm:$0xf0]  ;;  %v7085_v0 = vor.u32 %v7884_v32, %v7082_v46  ;;  %v6612_v52 = vld [vmem:[%s11871_s12 + $0x128] sm:$0xf] }
 0x3ba   :  { %4574 = vmatpush.bf16.msra.mxu3 %v7109_v13  ;;  %4587 = vmatpush.bf16.msra.mxu1 %v7333_v15  ;;  %v7821_v13 = vld [vmem:[%s11871_s12 + $0x2e4] sm:$0xf]  ;;  %v6830_v15 = vld [vmem:[%s11871_s12 + $0x2fc] sm:$0xf0]  ;;  %v6497_v9 = vor.u32 %v7737_v62, %v6494_v63  ;;  %v6584_v62 = vld [vmem:[%s11871_s12 + $0xf0] sm:$0xf] }
 0x3bb   :  { %v6833_v20 = vor.u32 %v7821_v13, %v6830_v15  ;;  %v7786_v13 = vld [vmem:[%s11871_s12 + $0x1cc] sm:$0xf]  ;;  %v7057_v15 = vor.u32 %v7877_v3, %v7054_v1  ;;  %v7849_v32 = vld [vmem:[%s11871_s12 + $0x3c4] sm:$0xf]  ;;  %v6942_v46 = vld [vmem:[%s11871_s12 + $0x3dc] sm:$0xf0] }
 0x3bc   :  { %v7762_v63 = vld [vmem:[%s11871_s12 + $0x108] sm:$0xf0]  ;;  %v6914_v1 = vld [vmem:[%s11871_s12 + $0x3a4] sm:$0xf0] }
 0x3bd   :  { %4553 = vmatpush.bf16.msrb.mxu2 %v6521_v21  ;;  %4566 = vmatpush.bf16.msrb.mxu0 %v6745_v22  ;;  %v7164_v21 = vld [vmem:[%s11871_s12 + $0x580] sm:$0xf]  ;;  %v7908_v22 = vld [vmem:[%s11871_s12 + $0x598] sm:$0xf0]  ;;  %v7842_v3 = vld [vmem:[%s11871_s12 + $0x38c] sm:$0xf] }
 0x3be   :  { %4575 = vmatpush.bf16.msra.mxu3 %v7081_v4  ;;  %4588 = vmatpush.bf16.msra.mxu1 %v7305_v25  ;;  %v7814_v4 = vld [vmem:[%s11871_s12 + $0x2ac] sm:$0xf]  ;;  %v6802_v25 = vld [vmem:[%s11871_s12 + $0x2c4] sm:$0xf0]  ;;  %v7165_v31 = vor.u32 %v7908_v22, %v7164_v21  ;;  %v6668_v21 = vld [vmem:[%s11871_s12 + $0x198] sm:$0xf] }
 0x3bf   :  { %v7783_v22 = vld [vmem:[%s11871_s12 + $0x1b0] sm:$0xf0] }
 0x3c1   :  { %4554 = vmatpush.bf16.msrb.mxu2 %v6493_v36  ;;  %4567 = vmatpush.bf16.msrb.mxu0 %v6717_v39  ;;  %v6805_v36 = vor.u32 %v7814_v4, %v6802_v25  ;;  %v7901_v39 = vld [vmem:[%s11871_s12 + $0x560] sm:$0xf0]  ;;  %v6469_v4 = vor.u32 %v7730_v11, %v6466_v12  ;;  %v6556_v11 = vld [vmem:[%s11871_s12 + $0xb8] sm:$0xf]  ;;  %v7755_v12 = vld [vmem:[%s11871_s12 + $0xd0] sm:$0xf0] }
 0x3c2   :  { %4576 = vmatpush.bf16.msra.mxu3 %v7053_v42  ;;  %4589 = vmatpush.bf16.msra.mxu1 %v7277_v57  ;;  %v6774_v42 = vld [vmem:[%s11871_s12 + $0x28c] sm:$0xf0]  ;;  %v7891_v57 = vld [vmem:[%s11871_s12 + $0x514] sm:$0xf]  ;;  %v7137_v47 = vor.u32 %v7901_v39, %v7136_v14  ;;  %v6669_v14 = vor.u32 %v7783_v22, %v6668_v21  ;;  %v6557_v21 = vor.u32 %v7755_v12, %v6556_v11  ;;  %v7773_v11 = vld [vmem:[%s11871_s12 + $0x164] sm:$0xf] }
 0x3c3   :  { %v6777_v50 = vor.u32 %v7807_v41, %v6774_v42  ;;  %v7222_v39 = vld [vmem:[%s11871_s12 + $0x60c] sm:$0xf0]  ;;  %v6864_v41 = vld [vmem:[%s11871_s12 + $0x320] sm:$0xf]  ;;  %v7832_v42 = vld [vmem:[%s11871_s12 + $0x338] sm:$0xf0] }
 0x3c4   :  { %v6642_v12 = vld [vmem:[%s11871_s12 + $0x17c] sm:$0xf0] }
 0x3c5   :  { %4555 = vmatpush.bf16.msrb.mxu2 %v6465_v54  ;;  %4568 = vmatpush.bf16.msrb.mxu0 %v6689_v56  ;;  %v7113_v54 = vor.u32 %v7891_v57, %v7110_v43  ;;  %v7337_v56 = vor.u32 %v7947_v44, %v7334_v26  ;;  %v7001_v57 = vor.u32 %v7863_v33, %v6998_v49  ;;  %v7856_v44 = vld [vmem:[%s11871_s12 + $0x3fc] sm:$0xf]  ;;  %v6970_v26 = vld [vmem:[%s11871_s12 + $0x414] sm:$0xf0]  ;;  %v7088_v33 = vld [vmem:[%s11871_s12 + $0x4e0] sm:$0xf] }
 0x3c6   :  { %4577 = vmatpush.bf16.msra.mxu3 %v7025_v58  ;;  %4590 = vmatpush.bf16.msra.mxu1 %v7249_v59  ;;  %v7800_v58 = vld [vmem:[%s11871_s12 + $0x23c] sm:$0xf]  ;;  %v6746_v59 = vld [vmem:[%s11871_s12 + $0x254] sm:$0xf0] }
 0x3c7   :  { %4530 = vmatmul.bf16.vlgmr.msrb.gmra.mxu3 %v10900_v5  ;;  %4543 = vmatmul.bf16.vlgmr.msrb.gmra.mxu1 %v10902_v6  ;;  %v6749_v38 = vor.u32 %v7800_v58, %v6746_v59  ;;  %v6973_v58 = vor.u32 %v7856_v44, %v6970_v26  ;;  %v7888_v49 = vld [vmem:[%s11871_s12 + $0x4f8] sm:$0xf0]  ;;  %v7060_v44 = vld [vmem:[%s11871_s12 + $0x4a8] sm:$0xf]  ;;  %v7881_v26 = vld [vmem:[%s11871_s12 + $0x4c0] sm:$0xf0] }
 0x3c8   :  { %4556 = vmatmul.bf16.vlgmr.msrb.gmra.mxu2 %v10837_v28  ;;  %4569 = vmatmul.bf16.vlgmr.msrb.gmra.mxu0 %v10839_v29 }
 0x3c9   :  { %4600 = vmatpush.bf16.msra.mxu2 %v6665_v60  ;;  %4613 = vmatpush.bf16.msra.mxu0 %v6889_v35  ;;  %v7940_v60 = vld [vmem:[%s11871_s12 + $0x69c] sm:$0xf]  ;;  %v7306_v35 = vld [vmem:[%s11871_s12 + $0x6b4] sm:$0xf0] }
 0x3ca   :  { %4578 = vmatpush.bf16.msra.mxu3 %v6997_v2  ;;  %4591 = vmatpush.bf16.msra.mxu1 %v7221_v55  ;;  %v7309_v37 = vor.u32 %v7940_v60, %v7306_v35  ;;  %v7793_v2 = vld [vmem:[%s11871_s12 + $0x204] sm:$0xf]  ;;  %v6718_v55 = vld [vmem:[%s11871_s12 + $0x21c] sm:$0xf0]  ;;  %v6613_v60 = vor.u32 %v7769_v53, %v6612_v52  ;;  %v6472_v52 = vld [vmem:[%s11871_s12 + $0x10] sm:$0xf] }
 0x3cb   :  { %v6721_v10 = vor.u32 %v7793_v2, %v6718_v55  ;;  %v6945_v2 = vor.u32 %v7849_v32, %v6942_v46  ;;  %v7734_v53 = vld [vmem:[%s11871_s12 + $0x28] sm:$0xf0]  ;;  %v7032_v32 = vld [vmem:[%s11871_s12 + $0x470] sm:$0xf] }
 0x3cc   :  { %v7874_v46 = vld [vmem:[%s11871_s12 + $0x488] sm:$0xf0] }
 0x3cd   :  { %4601 = vmatpush.bf16.msra.mxu2 %v6637_v7  ;;  %4614 = vmatpush.bf16.msra.mxu0 %v6861_v8  ;;  %v7933_v7 = vld [vmem:[%s11871_s12 + $0x664] sm:$0xf]  ;;  %v7278_v8 = vld [vmem:[%s11871_s12 + $0x67c] sm:$0xf0] }
 0x3ce   :  { %4579 = vmatpush.bf16.msra.mxu3 %v6969_v16  ;;  %4592 = vmatpush.bf16.msra.mxu1 %v7193_v17  ;;  %v7281_v16 = vor.u32 %v7933_v7, %v7278_v8  ;;  %v6690_v17 = vld [vmem:[%s11871_s12 + $0x1e4] sm:$0xf0]  ;;  %v7898_v7 = vld [vmem:[%s11871_s12 + $0x54c] sm:$0xf]  ;;  %v6585_v8 = vor.u32 %v7762_v63, %v6584_v62  ;;  %v7836_v62 = vld [vmem:[%s11871_s12 + $0x35c] sm:$0xf] }
 0x3cf   :  { %v6693_v25 = vor.u32 %v7786_v13, %v6690_v17  ;;  %v6780_v13 = vld [vmem:[%s11871_s12 + $0x278] sm:$0xf]  ;;  %v7895_v17 = vld [vmem:[%s11871_s12 + $0x530] sm:$0xf0] }
 0x3d0   :  { %v6894_v63 = vld [vmem:[%s11871_s12 + $0x374] sm:$0xf0] }
 0x3d1   :  { %4602 = vmatpush.bf16.msra.mxu2 %v6609_v19  ;;  %4615 = vmatpush.bf16.msra.mxu0 %v6833_v20  ;;  %v7926_v19 = vld [vmem:[%s11871_s12 + $0x62c] sm:$0xf]  ;;  %v7250_v20 = vld [vmem:[%s11871_s12 + $0x644] sm:$0xf0] }
 0x3d2   :  { %4580 = vmatpush.bf16.msra.mxu3 %v6941_v27  ;;  %4593 = vmatpush.bf16.msra.mxu1 %v7165_v31  ;;  %v7029_v27 = vor.u32 %v7870_v18, %v7026_v45  ;;  %v7253_v31 = vor.u32 %v7926_v19, %v7250_v20  ;;  %v7340_v18 = vld [vmem:[%s11871_s12 + $0x6d8] sm:$0xf]  ;;  %v7951_v45 = vld [vmem:[%s11871_s12 + $0x6f0] sm:$0xf0]  ;;  %v6917_v19 = vor.u32 %v7842_v3, %v6914_v1 }
 0x3d3   :  { %v7004_v3 = vld [vmem:[%s11871_s12 + $0x438] sm:$0xf]  ;;  %v7867_v1 = vld [vmem:[%s11871_s12 + $0x450] sm:$0xf0] }
 0x3d5   :  { %4603 = vmatpush.bf16.msra.mxu2 %v6581_v34  ;;  %4616 = vmatpush.bf16.msra.mxu0 %v6805_v36  ;;  %v6893_v34 = vor.u32 %v7839_v24, %v6892_v23  ;;  %v7919_v36 = vld [vmem:[%s11871_s12 + $0x5f4] sm:$0xf]  ;;  %v6528_v23 = vld [vmem:[%s11871_s12 + $0x80] sm:$0xf]  ;;  %v7748_v24 = vld [vmem:[%s11871_s12 + $0x98] sm:$0xf0] }
 0x3d6   :  { %4581 = vmatpush.bf16.msra.mxu3 %v6913_v30  ;;  %4594 = vmatpush.bf16.msra.mxu1 %v7137_v47  ;;  %v7225_v43 = vor.u32 %v7919_v36, %v7222_v39  ;;  %v6641_v30 = vor.u32 %v7776_v40, %v6640_v51  ;;  %v6865_v47 = vor.u32 %v7832_v42, %v6864_v41  ;;  %v6500_v51 = vld [vmem:[%s11871_s12 + $0x48] sm:$0xf]  ;;  %v7741_v40 = vld [vmem:[%s11871_s12 + $0x60] sm:$0xf0] }
 0x3d7   :  { %v6529_v36 = vor.u32 %v7748_v24, %v6528_v23  ;;  %v7089_v41 = vor.u32 %v7888_v49, %v7088_v33  ;;  %v7766_v23 = vld [vmem:[%s11871_s12 + $0x12c] sm:$0xf]  ;;  %v6614_v24 = vld [vmem:[%s11871_s12 + $0x144] sm:$0xf0]  ;;  %v7853_v49 = vld [vmem:[%s11871_s12 + $0x3e0] sm:$0xf0] }
 0x3d8   :  { %v6948_v33 = vld [vmem:[%s11871_s12 + $0x3c8] sm:$0xf] }
 0x3d9   :  { %4604 = vmatpush.bf16.msra.mxu2 %v6553_v48  ;;  %4617 = vmatpush.bf16.msra.mxu0 %v6777_v50  ;;  %v7912_v48 = vld [vmem:[%s11871_s12 + $0x5bc] sm:$0xf]  ;;  %v7194_v50 = vld [vmem:[%s11871_s12 + $0x5d4] sm:$0xf0] }
 0x3da   :  { %4626 = vmatpush.bf16.msrb.mxu3 %v7113_v54  ;;  %4639 = vmatpush.bf16.msrb.mxu1 %v7337_v56  ;;  %v6836_v54 = vld [vmem:[%s11871_s12 + $0x2e8] sm:$0xf]  ;;  %v7825_v56 = vld [vmem:[%s11871_s12 + $0x300] sm:$0xf0]  ;;  %v7197_v59 = vor.u32 %v7912_v48, %v7194_v50  ;;  %v6501_v48 = vor.u32 %v7741_v40, %v6500_v51  ;;  %v7759_v51 = vld [vmem:[%s11871_s12 + $0xf4] sm:$0xf] }
 0x3db   :  { %4582 = vmatmul.bf16.vlgmr.msra.gmra.mxu3 %v10900_v5  ;;  %4595 = vmatmul.bf16.vlgmr.msra.gmra.mxu1 %v10902_v6  ;;  %v6837_v35 = vor.u32 %v7825_v56, %v6836_v54  ;;  %v6696_v54 = vld [vmem:[%s11871_s12 + $0x1d0] sm:$0xf]  ;;  %v7061_v56 = vor.u32 %v7881_v26, %v7060_v44  ;;  %v7846_v26 = vld [vmem:[%s11871_s12 + $0x3a8] sm:$0xf0] }
 0x3dc   :  { %v6586_v40 = vld [vmem:[%s11871_s12 + $0x10c] sm:$0xf0] }
 0x3dd   :  { %4605 = vmatpush.bf16.msra.mxu2 %v6525_v61  ;;  %4618 = vmatpush.bf16.msra.mxu0 %v6749_v38  ;;  %v7905_v61 = vld [vmem:[%s11871_s12 + $0x584] sm:$0xf]  ;;  %v7166_v38 = vld [vmem:[%s11871_s12 + $0x59c] sm:$0xf0]  ;;  %v6920_v44 = vld [vmem:[%s11871_s12 + $0x390] sm:$0xf] }
 0x3de   :  { %4627 = vmatpush.bf16.msrb.mxu3 %v7085_v0  ;;  %4640 = vmatpush.bf16.msrb.mxu1 %v7309_v37  ;;  %v6808_v0 = vld [vmem:[%s11871_s12 + $0x2b0] sm:$0xf]  ;;  %v7818_v37 = vld [vmem:[%s11871_s12 + $0x2c8] sm:$0xf0]  ;;  %v7169_v55 = vor.u32 %v7905_v61, %v7166_v38  ;;  %v7780_v61 = vld [vmem:[%s11871_s12 + $0x19c] sm:$0xf] }
 0x3df   :  { %v6670_v38 = vld [vmem:[%s11871_s12 + $0x1b4] sm:$0xf0] }
 0x3e1   :  { %4606 = vmatpush.bf16.msra.mxu2 %v6497_v9  ;;  %4619 = vmatpush.bf16.msra.mxu0 %v6721_v10  ;;  %v6809_v9 = vor.u32 %v7818_v37, %v6808_v0  ;;  %v7138_v10 = vld [vmem:[%s11871_s12 + $0x564] sm:$0xf0]  ;;  %v6473_v0 = vor.u32 %v7734_v53, %v6472_v52  ;;  %v7752_v52 = vld [vmem:[%s11871_s12 + $0xbc] sm:$0xf]  ;;  %v6558_v53 = vld [vmem:[%s11871_s12 + $0xd4] sm:$0xf0] }
 0x3e2   :  { %4628 = vmatpush.bf16.msrb.mxu3 %v7057_v15  ;;  %4641 = vmatpush.bf16.msrb.mxu1 %v7281_v16  ;;  %v7811_v15 = vld [vmem:[%s11871_s12 + $0x290] sm:$0xf0]  ;;  %v7116_v16 = vld [vmem:[%s11871_s12 + $0x518] sm:$0xf]  ;;  %v7141_v20 = vor.u32 %v7898_v7, %v7138_v10  ;;  %v6673_v7 = vor.u32 %v7780_v61, %v6670_v38  ;;  %v6561_v61 = vor.u32 %v7752_v52, %v6558_v53  ;;  %v6648_v52 = vld [vmem:[%s11871_s12 + $0x168] sm:$0xf] }
 0x3e3   :  { %v6781_v22 = vor.u32 %v7811_v15, %v6780_v13  ;;  %v7923_v10 = vld [vmem:[%s11871_s12 + $0x610] sm:$0xf0]  ;;  %v7829_v13 = vld [vmem:[%s11871_s12 + $0x324] sm:$0xf]  ;;  %v6866_v15 = vld [vmem:[%s11871_s12 + $0x33c] sm:$0xf0] }
 0x3e4   :  { %v7777_v53 = vld [vmem:[%s11871_s12 + $0x180] sm:$0xf0] }
 0x3e5   :  { %4607 = vmatpush.bf16.msra.mxu2 %v6469_v4  ;;  %4620 = vmatpush.bf16.msra.mxu0 %v6693_v25  ;;  %v7117_v4 = vor.u32 %v7895_v17, %v7116_v16  ;;  %v7341_v25 = vor.u32 %v7951_v45, %v7340_v18  ;;  %v7005_v16 = vor.u32 %v7867_v1, %v7004_v3  ;;  %v6976_v18 = vld [vmem:[%s11871_s12 + $0x400] sm:$0xf]  ;;  %v7860_v45 = vld [vmem:[%s11871_s12 + $0x418] sm:$0xf0]  ;;  %v7885_v3 = vld [vmem:[%s11871_s12 + $0x4e4] sm:$0xf] }
 0x3e6   :  { %4629 = vmatpush.bf16.msrb.mxu3 %v7029_v27  ;;  %4642 = vmatpush.bf16.msrb.mxu1 %v7253_v31  ;;  %v6752_v27 = vld [vmem:[%s11871_s12 + $0x240] sm:$0xf]  ;;  %v7804_v31 = vld [vmem:[%s11871_s12 + $0x258] sm:$0xf0] }
 0x3e7   :  { %v6753_v39 = vor.u32 %v7804_v31, %v6752_v27  ;;  %v6977_v27 = vor.u32 %v7860_v45, %v6976_v18  ;;  %v7090_v1 = vld [vmem:[%s11871_s12 + $0x4fc] sm:$0xf0]  ;;  %v7878_v18 = vld [vmem:[%s11871_s12 + $0x4ac] sm:$0xf]  ;;  %v7062_v45 = vld [vmem:[%s11871_s12 + $0x4c4] sm:$0xf0] }
 0x3e8   :  { %4608 = vmatmul.bf16.vlgmr.msra.gmra.mxu2 %v10837_v28  ;;  %4621 = vmatmul.bf16.vlgmr.msra.gmra.mxu0 %v10839_v29 }
 0x3e9   :  { %4652 = vmatpush.bf16.msrb.mxu2 %v6669_v14  ;;  %4665 = vmatpush.bf16.msrb.mxu0 %v6893_v34  ;;  %v7312_v14 = vld [vmem:[%s11871_s12 + $0x6a0] sm:$0xf]  ;;  %v7944_v34 = vld [vmem:[%s11871_s12 + $0x6b8] sm:$0xf0] }
 0x3ea   :  { %4630 = vmatpush.bf16.msrb.mxu3 %v7001_v57  ;;  %4643 = vmatpush.bf16.msrb.mxu1 %v7225_v43  ;;  %v7313_v42 = vor.u32 %v7944_v34, %v7312_v14  ;;  %v6724_v57 = vld [vmem:[%s11871_s12 + $0x208] sm:$0xf]  ;;  %v7797_v43 = vld [vmem:[%s11871_s12 + $0x220] sm:$0xf0]  ;;  %v6617_v14 = vor.u32 %v7766_v23, %v6614_v24  ;;  %v7731_v23 = vld [vmem:[%s11871_s12 + $0x14] sm:$0xf] }
 0x3eb   :  { %v6725_v50 = vor.u32 %v7797_v43, %v6724_v57  ;;  %v6949_v57 = vor.u32 %v7853_v49, %v6948_v33  ;;  %v6474_v24 = vld [vmem:[%s11871_s12 + $0x2c] sm:$0xf0]  ;;  %v7871_v33 = vld [vmem:[%s11871_s12 + $0x474] sm:$0xf] }
 0x3ec   :  { %v7034_v49 = vld [vmem:[%s11871_s12 + $0x48c] sm:$0xf0] }
 0x3ed   :  { %4653 = vmatpush.bf16.msrb.mxu2 %v6641_v30  ;;  %4666 = vmatpush.bf16.msrb.mxu0 %v6865_v47  ;;  %v7284_v30 = vld [vmem:[%s11871_s12 + $0x668] sm:$0xf]  ;;  %v7937_v47 = vld [vmem:[%s11871_s12 + $0x680] sm:$0xf0] }
 0x3ee   :  { %4631 = vmatpush.bf16.msrb.mxu3 %v6973_v58  ;;  %4644 = vmatpush.bf16.msrb.mxu1 %v7197_v59  ;;  %v7285_v58 = vor.u32 %v7937_v47, %v7284_v30  ;;  %v7790_v59 = vld [vmem:[%s11871_s12 + $0x1e8] sm:$0xf0]  ;;  %v7144_v30 = vld [vmem:[%s11871_s12 + $0x550] sm:$0xf]  ;;  %v6589_v47 = vor.u32 %v7759_v51, %v6586_v40  ;;  %v6900_v51 = vld [vmem:[%s11871_s12 + $0x360] sm:$0xf] }
 0x3ef   :  { %v6697_v37 = vor.u32 %v7790_v59, %v6696_v54  ;;  %v7808_v54 = vld [vmem:[%s11871_s12 + $0x27c] sm:$0xf]  ;;  %v7118_v59 = vld [vmem:[%s11871_s12 + $0x534] sm:$0xf0] }
 0x3f0   :  { %v7840_v40 = vld [vmem:[%s11871_s12 + $0x378] sm:$0xf0] }
 0x3f1   :  { %4654 = vmatpush.bf16.msrb.mxu2 %v6613_v60  ;;  %4667 = vmatpush.bf16.msrb.mxu0 %v6837_v35  ;;  %v7256_v60 = vld [vmem:[%s11871_s12 + $0x630] sm:$0xf]  ;;  %v7930_v35 = vld [vmem:[%s11871_s12 + $0x648] sm:$0xf0] }
 0x3f2   :  { %4632 = vmatpush.bf16.msrb.mxu3 %v6945_v2  ;;  %4645 = vmatpush.bf16.msrb.mxu1 %v7169_v55  ;;  %v7033_v2 = vor.u32 %v7874_v46, %v7032_v32  ;;  %v7257_v55 = vor.u32 %v7930_v35, %v7256_v60  ;;  %v7948_v32 = vld [vmem:[%s11871_s12 + $0x6dc] sm:$0xf]  ;;  %v7342_v46 = vld [vmem:[%s11871_s12 + $0x6f4] sm:$0xf0]  ;;  %v6921_v60 = vor.u32 %v7846_v26, %v6920_v44 }
 0x3f3   :  { %v7864_v44 = vld [vmem:[%s11871_s12 + $0x43c] sm:$0xf]  ;;  %v7006_v26 = vld [vmem:[%s11871_s12 + $0x454] sm:$0xf0] }
 0x3f5   :  { %4655 = vmatpush.bf16.msrb.mxu2 %v6585_v8  ;;  %4668 = vmatpush.bf16.msrb.mxu0 %v6809_v9  ;;  %v6897_v8 = vor.u32 %v7836_v62, %v6894_v63  ;;  %v7228_v9 = vld [vmem:[%s11871_s12 + $0x5f8] sm:$0xf]  ;;  %v7745_v62 = vld [vmem:[%s11871_s12 + $0x84] sm:$0xf]  ;;  %v6530_v63 = vld [vmem:[%s11871_s12 + $0x9c] sm:$0xf0] }
 0x3f6   :  { %4633 = vmatpush.bf16.msrb.mxu3 %v6917_v19  ;;  %4646 = vmatpush.bf16.msrb.mxu1 %v7141_v20  ;;  %v7229_v17 = vor.u32 %v7923_v10, %v7228_v9  ;;  %v6645_v19 = vor.u32 %v7773_v11, %v6642_v12  ;;  %v6869_v20 = vor.u32 %v7829_v13, %v6866_v15  ;;  %v7738_v11 = vld [vmem:[%s11871_s12 + $0x4c] sm:$0xf]  ;;  %v6502_v12 = vld [vmem:[%s11871_s12 + $0x64] sm:$0xf0] }
 0x3f7   :  { %v6533_v9 = vor.u32 %v7745_v62, %v6530_v63  ;;  %v7093_v13 = vor.u32 %v7885_v3, %v7090_v1  ;;  %v6620_v62 = vld [vmem:[%s11871_s12 + $0x130] sm:$0xf]  ;;  %v7770_v63 = vld [vmem:[%s11871_s12 + $0x148] sm:$0xf0] }
 0x3f8   :  { %v7850_v1 = vld [vmem:[%s11871_s12 + $0x3cc] sm:$0xf] }
 0x3f9   :  { %4656 = vmatpush.bf16.msrb.mxu2 %v6557_v21  ;;  %4669 = vmatpush.bf16.msrb.mxu0 %v6781_v22  ;;  %v7200_v21 = vld [vmem:[%s11871_s12 + $0x5c0] sm:$0xf]  ;;  %v7916_v22 = vld [vmem:[%s11871_s12 + $0x5d8] sm:$0xf0] }
 0x3fa   :  { %4678 = vmatpush.bf16.msra.mxu3 %v7117_v4  ;;  %4691 = vmatpush.bf16.msra.mxu1 %v7341_v25  ;;  %v7822_v4 = vld [vmem:[%s11871_s12 + $0x2ec] sm:$0xf]  ;;  %v6838_v25 = vld [vmem:[%s11871_s12 + $0x304] sm:$0xf0]  ;;  %v7201_v31 = vor.u32 %v7916_v22, %v7200_v21  ;;  %v6505_v21 = vor.u32 %v7738_v11, %v6502_v12  ;;  %v6592_v12 = vld [vmem:[%s11871_s12 + $0xf8] sm:$0xf] }
 0x3fb   :  { %4634 = vmatmul.bf16.vlgmr.msrb.gmra.mxu3 %v10900_v5  ;;  %4647 = vmatmul.bf16.vlgmr.msrb.gmra.mxu1 %v10902_v6  ;;  %v6841_v34 = vor.u32 %v7822_v4, %v6838_v25  ;;  %v7787_v4 = vld [vmem:[%s11871_s12 + $0x1d4] sm:$0xf]  ;;  %v7065_v25 = vor.u32 %v7878_v18, %v7062_v45  ;;  %v7174_v11 = vld [vmem:[%s11871_s12 + $0x5a4] sm:$0xf0] }
 0x3fc   :  { %v7843_v45 = vld [vmem:[%s11871_s12 + $0x394] sm:$0xf] }
 0x3fd   :  { %4657 = vmatpush.bf16.msrb.mxu2 %v6529_v36  ;;  %4670 = vmatpush.bf16.msrb.mxu0 %v6753_v39  ;;  %v7172_v36 = vld [vmem:[%s11871_s12 + $0x588] sm:$0xf]  ;;  %v7909_v39 = vld [vmem:[%s11871_s12 + $0x5a0] sm:$0xf0] }
 0x3fe   :  { %4679 = vmatpush.bf16.msra.mxu3 %v7089_v41  ;;  %4692 = vmatpush.bf16.msra.mxu1 %v7313_v42  ;;  %v7815_v41 = vld [vmem:[%s11871_s12 + $0x2b4] sm:$0xf]  ;;  %v6810_v42 = vld [vmem:[%s11871_s12 + $0x2cc] sm:$0xf0]  ;;  %v7173_v43 = vor.u32 %v7909_v39, %v7172_v36  ;;  %v6676_v36 = vld [vmem:[%s11871_s12 + $0x1a0] sm:$0xf] }
 0x3ff   :  { %v7784_v39 = vld [vmem:[%s11871_s12 + $0x1b8] sm:$0xf0] }
 0x401   :  { %4658 = vmatpush.bf16.msrb.mxu2 %v6501_v48  ;;  %4671 = vmatpush.bf16.msrb.mxu0 %v6725_v50  ;;  %v6813_v48 = vor.u32 %v7815_v41, %v6810_v42  ;;  %v7902_v50 = vld [vmem:[%s11871_s12 + $0x568] sm:$0xf0]  ;;  %v6477_v41 = vor.u32 %v7731_v23, %v6474_v24  ;;  %v7146_v23 = vld [vmem:[%s11871_s12 + $0x56c] sm:$0xf0]  ;;  %v6564_v24 = vld [vmem:[%s11871_s12 + $0xc0] sm:$0xf] }
 0x402   :  { %4680 = vmatpush.bf16.msra.mxu3 %v7061_v56  ;;  %4693 = vmatpush.bf16.msra.mxu1 %v7285_v58  ;;  %v6782_v56 = vld [vmem:[%s11871_s12 + $0x294] sm:$0xf0]  ;;  %v7892_v58 = vld [vmem:[%s11871_s12 + $0x51c] sm:$0xf]  ;;  %v7145_v35 = vor.u32 %v7902_v50, %v7144_v30  ;;  %v6677_v30 = vor.u32 %v7784_v39, %v6676_v36 }
 0x403   :  { %v6785_v38 = vor.u32 %v7808_v54, %v6782_v56  ;;  %v7230_v50 = vld [vmem:[%s11871_s12 + $0x614] sm:$0xf0]  ;;  %v6872_v54 = vld [vmem:[%s11871_s12 + $0x328] sm:$0xf]  ;;  %v7833_v56 = vld [vmem:[%s11871_s12 + $0x340] sm:$0xf0] }
 0x405   :  { %4659 = vmatpush.bf16.msrb.mxu2 %v6473_v0  ;;  %4672 = vmatpush.bf16.msrb.mxu0 %v6697_v37  ;;  %v7121_v0 = vor.u32 %v7892_v58, %v7118_v59  ;;  %v7345_v37 = vor.u32 %v7948_v32, %v7342_v46  ;;  %v7009_v58 = vor.u32 %v7864_v44, %v7006_v26  ;;  %v7857_v32 = vld [vmem:[%s11871_s12 + $0x404] sm:$0xf]  ;;  %v6978_v46 = vld [vmem:[%s11871_s12 + $0x41c] sm:$0xf0] }
 0x406   :  { %4681 = vmatpush.bf16.msra.mxu3 %v7033_v2  ;;  %4694 = vmatpush.bf16.msra.mxu1 %v7257_v55  ;;  %v7801_v2 = vld [vmem:[%s11871_s12 + $0x244] sm:$0xf]  ;;  %v6754_v55 = vld [vmem:[%s11871_s12 + $0x25c] sm:$0xf0] }
 0x407   :  { %v6757_v10 = vor.u32 %v7801_v2, %v6754_v55  ;;  %v6981_v2 = vor.u32 %v7857_v32, %v6978_v46  ;;  %v7742_v32 = vld [vmem:[%s11871_s12 + $0x68] sm:$0xf0] }
 0x408   :  { %4660 = vmatmul.bf16.vlgmr.msrb.gmra.mxu2 %v10837_v28  ;;  %4673 = vmatmul.bf16.vlgmr.msrb.gmra.mxu0 %v10839_v29 }
 0x409   :  { %4704 = vmatpush.bf16.msra.mxu2 %v6673_v7  ;;  %4717 = vmatpush.bf16.msra.mxu0 %v6897_v8  ;;  %v7941_v7 = vld [vmem:[%s11871_s12 + $0x6a4] sm:$0xf]  ;;  %v7314_v8 = vld [vmem:[%s11871_s12 + $0x6bc] sm:$0xf0] }
 0x40a   :  { %4682 = vmatpush.bf16.msra.mxu3 %v7005_v16  ;;  %4695 = vmatpush.bf16.msra.mxu1 %v7229_v17  ;;  %v7317_v15 = vor.u32 %v7941_v7, %v7314_v8  ;;  %v7794_v16 = vld [vmem:[%s11871_s12 + $0x20c] sm:$0xf]  ;;  %v6726_v17 = vld [vmem:[%s11871_s12 + $0x224] sm:$0xf0]  ;;  %v6621_v8 = vor.u32 %v7770_v63, %v6620_v62  ;;  %v7068_v62 = vld [vmem:[%s11871_s12 + $0x4b0] sm:$0xf] }
 0x40b   :  { %v6729_v22 = vor.u32 %v7794_v16, %v6726_v17  ;;  %v6950_v7 = vld [vmem:[%s11871_s12 + $0x3e4] sm:$0xf0]  ;;  %v7819_v16 = vld [vmem:[%s11871_s12 + $0x2d0] sm:$0xf0]  ;;  %v7882_v63 = vld [vmem:[%s11871_s12 + $0x4c8] sm:$0xf0] }
 0x40c   :  { %v6953_v17 = vor.u32 %v7850_v1, %v6950_v7 }
 0x40d   :  { %4705 = vmatpush.bf16.msra.mxu2 %v6645_v19  ;;  %4718 = vmatpush.bf16.msra.mxu0 %v6869_v20  ;;  %v7934_v19 = vld [vmem:[%s11871_s12 + $0x66c] sm:$0xf]  ;;  %v7286_v20 = vld [vmem:[%s11871_s12 + $0x684] sm:$0xf0] }
 0x40e   :  { %4683 = vmatpush.bf16.msra.mxu3 %v6977_v27  ;;  %4696 = vmatpush.bf16.msra.mxu1 %v7201_v31  ;;  %v7289_v27 = vor.u32 %v7934_v19, %v7286_v20  ;;  %v6698_v31 = vld [vmem:[%s11871_s12 + $0x1ec] sm:$0xf0]  ;;  %v7899_v20 = vld [vmem:[%s11871_s12 + $0x554] sm:$0xf] }
 0x40f   :  { %v6701_v42 = vor.u32 %v7787_v4, %v6698_v31  ;;  %v6922_v19 = vld [vmem:[%s11871_s12 + $0x3ac] sm:$0xf0]  ;;  %v7756_v4 = vld [vmem:[%s11871_s12 + $0xd8] sm:$0xf0]  ;;  %v7149_v39 = vor.u32 %v7899_v20, %v7146_v23 }
 0x410   :  { %v7812_v31 = vld [vmem:[%s11871_s12 + $0x298] sm:$0xf0]  ;;  %v6925_v36 = vor.u32 %v7843_v45, %v6922_v19  ;;  %v7931_v45 = vld [vmem:[%s11871_s12 + $0x650] sm:$0xf0] }
 0x411   :  { %4706 = vmatpush.bf16.msra.mxu2 %v6617_v14  ;;  %4719 = vmatpush.bf16.msra.mxu0 %v6841_v34  ;;  %v7927_v14 = vld [vmem:[%s11871_s12 + $0x634] sm:$0xf]  ;;  %v7258_v34 = vld [vmem:[%s11871_s12 + $0x64c] sm:$0xf0] }
 0x412   :  { %4684 = vmatpush.bf16.msra.mxu3 %v6949_v57  ;;  %4697 = vmatpush.bf16.msra.mxu1 %v7173_v43  ;;  %v7037_v57 = vor.u32 %v7871_v33, %v7034_v49  ;;  %v7261_v43 = vor.u32 %v7927_v14, %v7258_v34  ;;  %v7124_v33 = vld [vmem:[%s11871_s12 + $0x520] sm:$0xf]  ;;  %v7896_v49 = vld [vmem:[%s11871_s12 + $0x538] sm:$0xf0] }
 0x413   :  { %v7348_v14 = vld [vmem:[%s11871_s12 + $0x6e0] sm:$0xf]  ;;  %v7952_v34 = vld [vmem:[%s11871_s12 + $0x6f8] sm:$0xf0]  ;;  %v7125_v44 = vor.u32 %v7896_v49, %v7124_v33 }
 0x414   :  { %v7349_v26 = vor.u32 %v7952_v34, %v7348_v14  ;;  %v7236_v33 = vld [vmem:[%s11871_s12 + $0x600] sm:$0xf] }
 0x415   :  { %4707 = vmatpush.bf16.msra.mxu2 %v6589_v47  ;;  %4720 = vmatpush.bf16.msra.mxu0 %v6813_v48  ;;  %v6901_v47 = vor.u32 %v7840_v40, %v6900_v51  ;;  %v7920_v48 = vld [vmem:[%s11871_s12 + $0x5fc] sm:$0xf]  ;;  %v11697_v40 = vld [vmem:[%s11873_s13] sm:$0x7f] }
 0x416   :  { %4685 = vmatpush.bf16.msra.mxu3 %v6921_v60  ;;  %4698 = vmatpush.bf16.msra.mxu1 %v7145_v35  ;;  %v7233_v59 = vor.u32 %v7920_v48, %v7230_v50  ;;  %v6649_v60 = vor.u32 %v7777_v53, %v6648_v52  ;;  %v6873_v35 = vor.u32 %v7833_v56, %v6872_v54  ;;  %v7096_v48 = vld [vmem:[%s11871_s12 + $0x4e8] sm:$0xf]  ;;  %v7889_v50 = vld [vmem:[%s11871_s12 + $0x500] sm:$0xf0]  ;;  %v3278_v54 = vperm.slane %v11697_v40, 0 }
 0x417   :  { %v7320_v52 = vld [vmem:[%s11871_s12 + $0x6a8] sm:$0xf]  ;;  %v7945_v53 = vld [vmem:[%s11871_s12 + $0x6c0] sm:$0xf0]  ;;  %v7097_v46 = vor.u32 %v7889_v50, %v7096_v48  ;;  %v6956_v48 = vld [vmem:[%s11871_s12 + $0x3d0] sm:$0xf] }
 0x419   :  { %4708 = vmatpush.bf16.msra.mxu2 %v6561_v61  ;;  %4721 = vmatpush.bf16.msra.mxu0 %v6785_v38  ;;  %v7913_v61 = vld [vmem:[%s11871_s12 + $0x5c4] sm:$0xf]  ;;  %v7202_v38 = vld [vmem:[%s11871_s12 + $0x5dc] sm:$0xf0] }
 0x41a   :  { %4730 = vmatpush.bf16.msrb.mxu3 %v7121_v0  ;;  %4743 = vmatpush.bf16.msrb.mxu1 %v7345_v37  ;;  %v6844_v0 = vld [vmem:[%s11871_s12 + $0x2f0] sm:$0xf]  ;;  %v7826_v37 = vld [vmem:[%s11871_s12 + $0x308] sm:$0xf0]  ;;  %v7205_v55 = vor.u32 %v7913_v61, %v7202_v38 }
 0x41b   :  { %4686 = vmatmul.bf16.vlgmr.msra.gmra.mxu3 %v10900_v5  ;;  %4699 = vmatmul.bf16.vlgmr.msra.gmra.mxu1 %v10902_v6  ;;  %v6732_v61 = vld [vmem:[%s11871_s12 + $0x210] sm:$0xf]  ;;  %v7798_v38 = vld [vmem:[%s11871_s12 + $0x228] sm:$0xf0] }
 0x41c   :  { %v6733_v7 = vor.u32 %v7798_v38, %v6732_v61  ;;  %v7903_v61 = vld [vmem:[%s11871_s12 + $0x570] sm:$0xf0] }
 0x41d   :  { %4709 = vmatpush.bf16.msra.mxu2 %v6533_v9  ;;  %4722 = vmatpush.bf16.msra.mxu0 %v6757_v10  ;;  %v6845_v9 = vor.u32 %v7826_v37, %v6844_v0  ;;  %v7906_v10 = vld [vmem:[%s11871_s12 + $0x58c] sm:$0xf]  ;;  %v7292_v0 = vld [vmem:[%s11871_s12 + $0x670] sm:$0xf] }
 0x41e   :  { %4731 = vmatpush.bf16.msrb.mxu3 %v7093_v13  ;;  %4744 = vmatpush.bf16.msrb.mxu1 %v7317_v15  ;;  %v7763_v13 = vld [vmem:[%s11871_s12 + $0x110] sm:$0xf0]  ;;  %v6816_v15 = vld [vmem:[%s11871_s12 + $0x2b8] sm:$0xf]  ;;  %v7177_v18 = vor.u32 %v7906_v10, %v7174_v11  ;;  %v7938_v37 = vld [vmem:[%s11871_s12 + $0x688] sm:$0xf0]  ;;  %v7069_v11 = vor.u32 %v7882_v63, %v7068_v62 }
 0x41f   :  { %v7735_v10 = vld [vmem:[%s11871_s12 + $0x30] sm:$0xf0] }
 0x421   :  { %4710 = vmatpush.bf16.msra.mxu2 %v6505_v21  ;;  %4723 = vmatpush.bf16.msra.mxu0 %v6729_v22  ;;  %v6593_v21 = vor.u32 %v7763_v13, %v6592_v12  ;;  %v6817_v22 = vor.u32 %v7819_v16, %v6816_v15  ;;  %v7293_v12 = vor.u32 %v7938_v37, %v7292_v0  ;;  %v6704_v13 = vld [vmem:[%s11871_s12 + $0x1d8] sm:$0xf]  ;;  %v7791_v15 = vld [vmem:[%s11871_s12 + $0x1f0] sm:$0xf0] }
 0x422   :  { %4732 = vmatpush.bf16.msrb.mxu3 %v7065_v25  ;;  %4745 = vmatpush.bf16.msrb.mxu1 %v7289_v27  ;;  %v6788_v27 = vld [vmem:[%s11871_s12 + $0x280] sm:$0xf]  ;;  %v7040_v16 = vld [vmem:[%s11871_s12 + $0x478] sm:$0xf]  ;;  %v6705_v20 = vor.u32 %v7791_v15, %v6704_v13  ;;  %v3280_v15 = vperm.slane %v11697_v40, 2 }
 0x424   :  { %v11632_v3 = vpop.f32.mrf.mxu0 }
 0x425   :  { %4711 = vmatpush.bf16.msra.mxu2 %v6477_v41  ;;  %4724 = vmatpush.bf16.msra.mxu0 %v6701_v42  ;;  %v6565_v41 = vor.u32 %v7756_v4, %v6564_v24  ;;  %v6789_v42 = vor.u32 %v7812_v31, %v6788_v27  ;;  %v7012_v4 = vld [vmem:[%s11871_s12 + $0x440] sm:$0xf]  ;;  %v7868_v31 = vld [vmem:[%s11871_s12 + $0x458] sm:$0xf0] }
 0x426   :  { %4733 = vmatpush.bf16.msrb.mxu3 %v7037_v57  ;;  %4746 = vmatpush.bf16.msrb.mxu1 %v7261_v43  ;;  %v6536_v57 = vld [vmem:[%s11871_s12 + $0x88] sm:$0xf]  ;;  %v7749_v43 = vld [vmem:[%s11871_s12 + $0xa0] sm:$0xf0] }
 0x427   :  { %v6537_v56 = vor.u32 %v7749_v43, %v6536_v57  ;;  %v7208_v57 = vld [vmem:[%s11871_s12 + $0x5c8] sm:$0xf]  ;;  %v7917_v43 = vld [vmem:[%s11871_s12 + $0x5e0] sm:$0xf0] }
 0x428   :  { %4712 = vmatmul.bf16.vlgmr.msra.gmra.mxu2 %v10837_v28  ;;  %4725 = vmatmul.bf16.vlgmr.msra.gmra.mxu0 %v10839_v29 }
 0x429   :  { %4756 = vmatpush.bf16.msrb.mxu2 %v6677_v30  ;;  %4769 = vmatpush.bf16.msrb.mxu0 %v6901_v47  ;;  %v6760_v30 = vld [vmem:[%s11871_s12 + $0x248] sm:$0xf]  ;;  %v7805_v47 = vld [vmem:[%s11871_s12 + $0x260] sm:$0xf0] }
 0x42a   :  { %4734 = vmatpush.bf16.msrb.mxu3 %v7009_v58  ;;  %4747 = vmatpush.bf16.msrb.mxu1 %v7233_v59  ;;  %v4453_v25 = vpop.f32.mrf.mxu2  ;;  %v6761_v58 = vor.u32 %v7805_v47, %v6760_v30  ;;  %v6508_v59 = vld [vmem:[%s11871_s12 + $0x50] sm:$0xf]  ;;  %v7209_v30 = vor.u32 %v7917_v43, %v7208_v57 }
 0x42b   :  { %v6509_v1 = vor.u32 %v7742_v32, %v6508_v59  ;;  %v6928_v32 = vld [vmem:[%s11871_s12 + $0x398] sm:$0xf] }
 0x42c   :  { %v4468_v51 = vpop.f32.mrf.mxu0 }
 0x42d   :  { %4757 = vmatpush.bf16.msrb.mxu2 %v6649_v60  ;;  %4770 = vmatpush.bf16.msrb.mxu0 %v6873_v35  ;;  %v7321_v60 = vor.u32 %v7945_v53, %v7320_v52  ;;  %v6984_v51 = vld [vmem:[%s11871_s12 + $0x408] sm:$0xf]  ;;  %v7854_v52 = vld [vmem:[%s11871_s12 + $0x3e8] sm:$0xf0] }
 0x42e   :  { %4735 = vmatpush.bf16.msrb.mxu3 %v6981_v2  ;;  %4748 = vmatpush.bf16.msrb.mxu1 %v7205_v55  ;;  %v4454_v55 = vadd.f32 %v4453_v25, %v3278_v54 }
 0x431   :  { %4758 = vmatpush.bf16.msrb.mxu2 %v6621_v8  ;;  %4771 = vmatpush.bf16.msrb.mxu0 %v6845_v9  ;;  %v6480_v9 = vld [vmem:[%s11871_s12 + $0x18] sm:$0xf] }
 0x432   :  { %4736 = vmatpush.bf16.msrb.mxu3 %v6953_v17  ;;  %4749 = vmatpush.bf16.msrb.mxu1 %v7177_v18  ;;  %v4455_v35 = vpop.f32.mrf.mxu2  ;;  %v7875_v17 = vld [vmem:[%s11871_s12 + $0x490] sm:$0xf0]  ;;  %v7264_v18 = vld [vmem:[%s11871_s12 + $0x638] sm:$0xf]  ;;  %v6481_v19 = vor.u32 %v7735_v10, %v6480_v9 }
 0x433   :  { %v7265_v23 = vor.u32 %v7931_v45, %v7264_v18  ;;  %v7152_v35 = vld [vmem:[%s11871_s12 + $0x558] sm:$0xf] }
 0x434   :  { %v4492_v2 = vpop.f32.mrf.mxu1  ;;  %v7153_v63 = vor.u32 %v7903_v61, %v7152_v35 }
 0x435   :  { %4759 = vmatpush.bf16.msrb.mxu2 %v6593_v21  ;;  %4772 = vmatpush.bf16.msrb.mxu0 %v6817_v22  ;;  %v11750_v8 = vpop.f32.mrf.mxu0  ;;  %v4467_v21 = vadd.f32 %v11632_v3, %v4454_v55  ;;  %v7041_v22 = vor.u32 %v7875_v17, %v7040_v16  ;;  %v7924_v3 = vld [vmem:[%s11871_s12 + $0x618] sm:$0xf0] }
 0x436   :  { %4737 = vmatpush.bf16.msrb.mxu3 %v6925_v36  ;;  %4750 = vmatpush.bf16.msrb.mxu1 %v7149_v39  ;;  %v7013_v36 = vor.u32 %v7868_v31, %v7012_v4  ;;  %v7237_v39 = vor.u32 %v7924_v3, %v7236_v33 }
 0x439   :  { %4760 = vmatpush.bf16.msrb.mxu2 %v6565_v41  ;;  %4773 = vmatpush.bf16.msrb.mxu0 %v6789_v42  ;;  %v7861_v41 = vld [vmem:[%s11871_s12 + $0x420] sm:$0xf0] }
 0x43a   :  { %4782 = vmatpush.bf16.msra.mxu3 %v7125_v44  ;;  %4795 = vmatpush.bf16.msra.mxu1 %v7349_v26  ;;  %v4479_v24 = vpop.f32.mrf.mxu3  ;;  %v3279_v44 = vperm.slane %v11697_v40, 1  ;;  %v6985_v26 = vor.u32 %v7861_v41, %v6984_v51 }
 0x43b   :  { %4738 = vmatmul.bf16.vlgmr.msrb.gmra.mxu3 %v10900_v5  ;;  %4751 = vmatmul.bf16.vlgmr.msrb.gmra.mxu1 %v10902_v6  ;;  %v4480_v25 = vadd.f32 %v4479_v24, %v4467_v21  ;;  %v4505_v27 = vpop.f32.mrf.mxu2 }
 0x43c   :  { %v4494_v49 = vpop.f32.mrf.mxu1  ;;  %v4506_v54 = vadd.f32 %v4505_v27, %v3279_v44 }
 0x43d   :  { %4761 = vmatpush.bf16.msrb.mxu2 %v6537_v56  ;;  %4774 = vmatpush.bf16.msrb.mxu0 %v6761_v58  ;;  %v4493_v14 = vadd.f32 %v4492_v2, %v4480_v25  ;;  %v4520_v34 = vpop.f32.mrf.mxu0  ;;  %v6957_v56 = vor.u32 %v7854_v52, %v6956_v48  ;;  %v3281_v52 = vperm.slane %v11697_v40, 3 }
 0x43e   :  { %4783 = vmatpush.bf16.msra.mxu3 %v7097_v46  ;;  %4796 = vmatpush.bf16.msra.mxu1 %v7321_v60  ;;  %v7847_v60 = vld [vmem:[%s11871_s12 + $0x3b0] sm:$0xf0]  ;;  %v4519_v0 = vadd.f32 %v11750_v8, %v4506_v54 }
 0x43f   :  { %v7350_v42 = vmul.f32 -1.442695, %v4493_v14  ;;  %v6929_v62 = vor.u32 %v7847_v60, %v6928_v32 }
 0x441   :  { %4762 = vmatpush.bf16.msrb.mxu2 %v6509_v1  ;;  %4775 = vmatpush.bf16.msrb.mxu0 %v6733_v7  ;;  %7955 = vpow2.f32 %v7350_v42 }
 0x442   :  { %4784 = vmatpush.bf16.msra.mxu3 %v7069_v11  ;;  %4797 = vmatpush.bf16.msra.mxu1 %v7293_v12  ;;  %v4481_v47 = vpop.f32.mrf.mxu3 }
 0x443   :  { %v4507_v50 = vpop.f32.mrf.mxu2 }
 0x444   :  { %v4544_v53 = vpop.f32.mrf.mxu1 }
 0x445   :  { %4763 = vmatpush.bf16.msrb.mxu2 %v6481_v19  ;;  %4776 = vmatpush.bf16.msrb.mxu0 %v6705_v20  ;;  %v4570_v59 = vpop.f32.mrf.mxu0 }
 0x446   :  { %4785 = vmatpush.bf16.msra.mxu3 %v7041_v22  ;;  %4798 = vmatpush.bf16.msra.mxu1 %v7265_v23 }
 0x447   :  { %v7956_v46 = vpop.eup %7955 }
 0x448   :  { %4764 = vmatmul.bf16.vlgmr.msrb.gmra.mxu2 %v10837_v28  ;;  %4777 = vmatmul.bf16.vlgmr.msrb.gmra.mxu0 %v10839_v29  ;;  %v7180_v28 = vld [vmem:[%s11871_s12 + $0x590] sm:$0xf]  ;;  %v7910_v29 = vld [vmem:[%s11871_s12 + $0x5a8] sm:$0xf0]  ;;  %v4829_v38 = vadd.f32 1.0, %v7956_v46 }
 0x449   :  { %v7181_v58 = vor.u32 %v7910_v29, %v7180_v28 }
 0x44a   :  { %4786 = vmatpush.bf16.msra.mxu3 %v7013_v36  ;;  %4799 = vmatpush.bf16.msra.mxu1 %v7237_v39  ;;  %7957 = vrcp.f32 %v4829_v38  ;;  %v4531_v37 = vpop.f32.mrf.mxu3  ;;  %v4847_v16 = vand.u32 2147483648, %v4829_v38  ;;  %v4845_v45 = vand.u32 2147483647, %v4829_v38  ;;  %vm4841_vm2 = vweird.f32 %v4829_v38 }
 0x44b   :  { %v4532_v2 = vadd.f32 %v4531_v37, %v4519_v0  ;;  %v4557_v55 = vpop.f32.mrf.mxu2 }
 0x44c   :  { %v4546_v1 = vpop.f32.mrf.mxu1  ;;  %v4558_v21 = vadd.f32 %v4557_v55, %v3280_v15  ;;  %v4848_v23 = vor.u32 1.1754944e-38, %v4847_v16  ;;  %vm4846_vm4 = vcmp.eq.f32.partialorder %v4845_v45, 8.507059e+37 }
 0x44d   :  { %v4545_v7 = vadd.f32 %v4544_v53, %v4532_v2  ;;  %v4572_v9 = vpop.f32.mrf.mxu0 }
 0x44e   :  { %4787 = vmatpush.bf16.msra.mxu3 %v6985_v26  ;;  %4800 = vmatpush.bf16.msra.mxu1 %v7209_v30  ;;  %v4571_v4 = vadd.f32 %v4570_v59, %v4558_v21 }
 0x44f   :  { %v7351_v11 = vmul.f32 -1.442695, %v4545_v7 }
 0x450   :  { %v7958_v10 = vpop.eup %7957 }
 0x451   :  { %v4837_v12 = vmul.f32 %v7958_v10, %v4829_v38  ;;  %7959 = vpow2.f32 %v7351_v11  ;;  %vm4842_vm1 = vweird.f32 %v7958_v10 }
 0x452   :  { %4788 = vmatpush.bf16.msra.mxu3 %v6957_v56  ;;  %4801 = vmatpush.bf16.msra.mxu1 %v7181_v58  ;;  %v4533_v8 = vpop.f32.mrf.mxu3  ;;  %vm4843_vm3 = vmor %vm4841_vm2, %vm4842_vm1 }
 0x453   :  { %v4838_v13 = vsub.f32 1.0, %v4837_v12  ;;  %v4559_v17 = vpop.f32.mrf.mxu2 }
 0x455   :  { %v4839_v18 = vmul.f32 %v7958_v10, %v4838_v13  ;;  %v3282_v13 = vperm.slane %v11697_v40, 4 }
 0x456   :  { %4789 = vmatpush.bf16.msra.mxu3 %v6929_v62  ;;  %4802 = vmatpush.bf16.msra.mxu1 %v7153_v63 }
 0x457   :  { %v4840_v20 = vadd.f32 %v7958_v10, %v4839_v18  ;;  %v7960_v22 = vpop.eup %7959 }
 0x458   :  { %v4596_v19 = vpop.f32.mrf.mxu1 }
 0x459   :  { %4790 = vmatmul.bf16.vlgmr.msra.gmra.mxu3 %v10900_v5  ;;  %4803 = vmatmul.bf16.vlgmr.msra.gmra.mxu1 %v10902_v6  ;;  %v4844_v5 = vsel %vm4843_vm3, %v7958_v10, %v4840_v20  ;;  %v4830_v6 = vadd.f32 1.0, %v7960_v22 }
 0x45a   :  { %v4849_v24 = vsel %vm4846_vm4, %v4848_v23, %v4844_v5 }
 0x45b   :  { %4941 = vst [vmem:[%s11874_s14] sm:$0xff] %v4849_v24  ;;  %7961 = vrcp.f32 %v4830_v6  ;;  %v4862_v51 = vand.u32 2147483648, %v4830_v6  ;;  %v4860_v42 = vand.u32 2147483647, %v4830_v6  ;;  %vm4856_vm6 = vweird.f32 %v4830_v6 }
 0x45d   :  { %v4863_v44 = vor.u32 1.1754944e-38, %v4862_v51  ;;  %vm4861_vm8 = vcmp.eq.f32.partialorder %v4860_v42, 8.507059e+37  ;;  %v3283_v51 = vperm.slane %v11697_v40, 5 }
 0x45e   :  { %v4583_v25 = vpop.f32.mrf.mxu3 }
 0x45f   :  { %v4584_v27 = vadd.f32 %v4583_v25, %v4571_v4 }
 0x460   :  { %v4598_v31 = vpop.f32.mrf.mxu1 }
 0x461   :  { %v4597_v33 = vadd.f32 %v4596_v19, %v4584_v27  ;;  %v7962_v3 = vpop.eup %7961 }
 0x462   :  { %v4852_v14 = vmul.f32 %v7962_v3, %v4830_v6  ;;  %vm4857_vm5 = vweird.f32 %v7962_v3 }
 0x463   :  { %v7352_v49 = vmul.f32 -1.442695, %v4597_v33  ;;  %vm4858_vm7 = vmor %vm4856_vm6, %vm4857_vm5 }
 0x464   :  { %v4853_v36 = vsub.f32 1.0, %v4852_v14 }
 0x465   :  { %7963 = vpow2.f32 %v7352_v49  ;;  %v4622_v34 = vpop.f32.mrf.mxu0 }
 0x466   :  { %v4585_v39 = vpop.f32.mrf.mxu3  ;;  %v4854_v41 = vmul.f32 %v7962_v3, %v4853_v36 }
 0x468   :  { %v4855_v57 = vadd.f32 %v7962_v3, %v4854_v41 }
 0x46a   :  { %v4859_v30 = vsel %vm4858_vm7, %v7962_v3, %v4855_v57 }
 0x46b   :  { %v7964_v43 = vpop.eup %7963  ;;  %v4609_v26 = vpop.f32.mrf.mxu2  ;;  %v4864_v48 = vsel %vm4861_vm8, %v4863_v44, %v4859_v30 }
 0x46c   :  { %v4831_v47 = vadd.f32 1.0, %v7964_v43  ;;  %4942 = vst [vmem:[%s11874_s14 + $0x8] sm:$0xff] %v4864_v48  ;;  %v4610_v58 = vadd.f32 %v4609_v26, %v3281_v52 }
 0x46d   :  { %v4624_v50 = vpop.f32.mrf.mxu0 }
 0x46e   :  { %7965 = vrcp.f32 %v4831_v47  ;;  %v4877_v59 = vand.u32 2147483648, %v4831_v47  ;;  %v4875_v46 = vand.u32 2147483647, %v4831_v47  ;;  %vm4871_vm10 = vweird.f32 %v4831_v47 }
 0x46f   :  { %v4623_v35 = vadd.f32 %v4622_v34, %v4610_v58 }
 0x470   :  { %v4878_v61 = vor.u32 1.1754944e-38, %v4877_v59  ;;  %vm4876_vm12 = vcmp.eq.f32.partialorder %v4875_v46, 8.507059e+37 }
 0x473   :  { %v4611_v28 = vpop.f32.mrf.mxu2 }
 0x474   :  { %v7966_v29 = vpop.eup %7965 }
 0x475   :  { %v4867_v53 = vmul.f32 %v7966_v29, %v4831_v47  ;;  %vm4872_vm9 = vweird.f32 %v7966_v29 }
 0x476   :  { %vm4873_vm11 = vmor %vm4871_vm10, %vm4872_vm9 }
 0x477   :  { %v4868_v56 = vsub.f32 1.0, %v4867_v53 }
 0x478   :  { %v4648_v54 = vpop.f32.mrf.mxu1 }
 0x479   :  { %v4869_v32 = vmul.f32 %v7966_v29, %v4868_v56 }
 0x47b   :  { %v4870_v60 = vadd.f32 %v7966_v29, %v4869_v32 }
 0x47d   :  { %v4874_v62 = vsel %vm4873_vm11, %v7966_v29, %v4870_v60 }
 0x47e   :  { %v4635_v38 = vpop.f32.mrf.mxu3  ;;  %v4879_v0 = vsel %vm4876_vm12, %v4878_v61, %v4874_v62 }
 0x47f   :  { %v4636_v63 = vadd.f32 %v4635_v38, %v4623_v35  ;;  %4943 = vst [vmem:[%s11874_s14 + $0x10] sm:$0xff] %v4879_v0 }
 0x480   :  { %v4650_v37 = vpop.f32.mrf.mxu1 }
 0x481   :  { %v4649_v2 = vadd.f32 %v4648_v54, %v4636_v63  ;;  %v3284_v63 = vperm.slane %v11697_v40, 6 }
 0x483   :  { %v7353_v55 = vmul.f32 -1.442695, %v4649_v2 }
 0x485   :  { %7967 = vpow2.f32 %v7353_v55  ;;  %v4674_v1 = vpop.f32.mrf.mxu0 }
 0x486   :  { %v4637_v7 = vpop.f32.mrf.mxu3 }
 0x48b   :  { %v7968_v9 = vpop.eup %7967  ;;  %v4661_v10 = vpop.f32.mrf.mxu2 }
 0x48c   :  { %v4832_v11 = vadd.f32 1.0, %v7968_v9  ;;  %v4662_v45 = vadd.f32 %v4661_v10, %v3282_v13 }
 0x48d   :  { %v4676_v12 = vpop.f32.mrf.mxu0 }
 0x48e   :  { %7969 = vrcp.f32 %v4832_v11  ;;  %v4892_v19 = vand.u32 2147483648, %v4832_v11  ;;  %v4890_v21 = vand.u32 2147483647, %v4832_v11  ;;  %vm4886_vm14 = vweird.f32 %v4832_v11 }
 0x48f   :  { %v4675_v23 = vadd.f32 %v4674_v1, %v4662_v45 }
 0x490   :  { %v4893_v5 = vor.u32 1.1754944e-38, %v4892_v19  ;;  %vm4891_vm1 = vcmp.eq.f32.partialorder %v4890_v21, 8.507059e+37 }
 0x493   :  { %v4663_v15 = vpop.f32.mrf.mxu2 }
 0x494   :  { %v7970_v8 = vpop.eup %7969 }
 0x495   :  { %v4882_v16 = vmul.f32 %v7970_v8, %v4832_v11  ;;  %vm4887_vm13 = vweird.f32 %v7970_v8 }
 0x496   :  { %vm4888_vm15 = vmor %vm4886_vm14, %vm4887_vm13 }
 0x497   :  { %v4883_v18 = vsub.f32 1.0, %v4882_v16 }
 0x498   :  { %v4700_v17 = vpop.f32.mrf.mxu1 }
 0x499   :  { %v4884_v20 = vmul.f32 %v7970_v8, %v4883_v18 }
 0x49b   :  { %v4885_v22 = vadd.f32 %v7970_v8, %v4884_v20 }
 0x49d   :  { %v4889_v24 = vsel %vm4888_vm15, %v7970_v8, %v4885_v22 }
 0x49e   :  { %v4687_v6 = vpop.f32.mrf.mxu3  ;;  %v4894_v25 = vsel %vm4891_vm1, %v4893_v5, %v4889_v24 }
 0x49f   :  { %v4688_v4 = vadd.f32 %v4687_v6, %v4675_v23  ;;  %4944 = vst [vmem:[%s11874_s14 + $0x18] sm:$0xff] %v4894_v25 }
 0x4a0   :  { %v4702_v27 = vpop.f32.mrf.mxu1 }
 0x4a1   :  { %v4701_v31 = vadd.f32 %v4700_v17, %v4688_v4 }
 0x4a3   :  { %v7354_v33 = vmul.f32 -1.442695, %v4701_v31 }
 0x4a5   :  { %7971 = vpow2.f32 %v7354_v33  ;;  %v4726_v3 = vpop.f32.mrf.mxu0 }
 0x4a6   :  { %v4689_v49 = vpop.f32.mrf.mxu3 }
 0x4ab   :  { %v7972_v14 = vpop.eup %7971  ;;  %v4713_v34 = vpop.f32.mrf.mxu2 }
 0x4ac   :  { %v4833_v36 = vadd.f32 1.0, %v7972_v14  ;;  %v4714_v26 = vadd.f32 %v4713_v34, %v3283_v51 }
 0x4ad   :  { %v4728_v39 = vpop.f32.mrf.mxu0 }
 0x4ae   :  { %7973 = vrcp.f32 %v4833_v36  ;;  %v4907_v30 = vand.u32 2147483648, %v4833_v36  ;;  %v4905_v48 = vand.u32 2147483647, %v4833_v36  ;;  %vm4901_vm3 = vweird.f32 %v4833_v36 }
 0x4af   :  { %v4727_v52 = vadd.f32 %v4726_v3, %v4714_v26 }
 0x4b0   :  { %v4908_v28 = vor.u32 1.1754944e-38, %v4907_v30  ;;  %vm4906_vm5 = vcmp.eq.f32.partialorder %v4905_v48, 8.507059e+37 }
 0x4b3   :  { %v4715_v41 = vpop.f32.mrf.mxu2 }
 0x4b4   :  { %v7974_v42 = vpop.eup %7973 }
 0x4b5   :  { %v4897_v57 = vmul.f32 %v7974_v42, %v4833_v36  ;;  %vm4902_vm2 = vweird.f32 %v7974_v42 }
 0x4b6   :  { %vm4903_vm4 = vmor %vm4901_vm3, %vm4902_vm2 }
 0x4b7   :  { %v4898_v44 = vsub.f32 1.0, %v4897_v57 }
 0x4b8   :  { %v4752_v43 = vpop.f32.mrf.mxu1 }
 0x4b9   :  { %v4899_v47 = vmul.f32 %v7974_v42, %v4898_v44 }
 0x4bb   :  { %v4900_v50 = vadd.f32 %v7974_v42, %v4899_v47 }
 0x4bd   :  { %v4904_v53 = vsel %vm4903_vm4, %v7974_v42, %v4900_v50 }
 0x4be   :  { %v4739_v29 = vpop.f32.mrf.mxu3  ;;  %v4909_v56 = vsel %vm4906_vm5, %v4908_v28, %v4904_v53 }
 0x4bf   :  { %v4740_v54 = vadd.f32 %v4739_v29, %v4727_v52  ;;  %4945 = vst [vmem:[%s11874_s14 + $0x20] sm:$0xff] %v4909_v56 }
 0x4c0   :  { %v4754_v58 = vpop.f32.mrf.mxu1 }
 0x4c1   :  { %v4753_v59 = vadd.f32 %v4752_v43, %v4740_v54 }
 0x4c3   :  { %v7355_v32 = vmul.f32 -1.442695, %v4753_v59 }
 0x4c5   :  { %7975 = vpow2.f32 %v7355_v32  ;;  %v4778_v46 = vpop.f32.mrf.mxu0 }
 0x4c6   :  { %v4741_v60 = vpop.f32.mrf.mxu3 }
 0x4cb   :  { %v7976_v35 = vpop.eup %7975  ;;  %v4765_v61 = vpop.f32.mrf.mxu2 }
 0x4cc   :  { %v4834_v38 = vadd.f32 1.0, %v7976_v35  ;;  %v4766_v7 = vadd.f32 %v4765_v61, %v3284_v63 }
 0x4cd   :  { %v4780_v62 = vpop.f32.mrf.mxu0 }
 0x4ce   :  { %7977 = vrcp.f32 %v4834_v38  ;;  %v4922_v9 = vand.u32 2147483648, %v4834_v38  ;;  %v4920_v11 = vand.u32 2147483647, %v4834_v38  ;;  %vm4916_vm7 = vweird.f32 %v4834_v38 }
 0x4cf   :  { %v4779_v13 = vadd.f32 %v4778_v46, %v4766_v7 }
 0x4d0   :  { %v4923_v15 = vor.u32 1.1754944e-38, %v4922_v9  ;;  %vm4921_vm9 = vcmp.eq.f32.partialorder %v4920_v11, 8.507059e+37 }
 0x4d3   :  { %v4767_v0 = vpop.f32.mrf.mxu2 }
 0x4d4   :  { %v7978_v37 = vpop.eup %7977 }
 0x4d5   :  { %v4912_v2 = vmul.f32 %v7978_v37, %v4834_v38  ;;  %vm4917_vm6 = vweird.f32 %v7978_v37 }
 0x4d6   :  { %v4804_v55 = vpop.f32.mrf.mxu1  ;;  %vm4918_vm8 = vmor %vm4916_vm7, %vm4917_vm6 }
 0x4d7   :  { %v4913_v1 = vsub.f32 1.0, %v4912_v2 }
 0x4d9   :  { %v4914_v10 = vmul.f32 %v7978_v37, %v4913_v1 }
 0x4db   :  { %v4915_v12 = vadd.f32 %v7978_v37, %v4914_v10 }
 0x4dc   :  { %v4791_v8 = vpop.f32.mrf.mxu3 }
 0x4dd   :  { %v4919_v16 = vsel %vm4918_vm8, %v7978_v37, %v4915_v12  ;;  %v4792_v17 = vadd.f32 %v4791_v8, %v4779_v13 }
 0x4de   :  { %v4924_v40 = vsel %vm4921_vm9, %v4923_v15, %v4919_v16  ;;  %v4806_v18 = vpop.f32.mrf.mxu1 }
 0x4df   :  { %4946 = vst [vmem:[%s11874_s14 + $0x28] sm:$0xff] %v4924_v40  ;;  %v4805_v45 = vadd.f32 %v4804_v55, %v4792_v17 }
 0x4e1   :  { %v7356_v19 = vmul.f32 -1.442695, %v4805_v45 }
 0x4e3   :  { %7979 = vpow2.f32 %v7356_v19 }
 0x4e4   :  { %v4793_v20 = vpop.f32.mrf.mxu3 }
 0x4e9   :  { %v7980_v21 = vpop.eup %7979 }
 0x4ea   :  { %v4835_v22 = vadd.f32 1.0, %v7980_v21 }
 0x4ec   :  { %7981 = vrcp.f32 %v4835_v22  ;;  %v4937_v24 = vand.u32 2147483648, %v4835_v22  ;;  %v4935_v25 = vand.u32 2147483647, %v4835_v22  ;;  %vm4931_vm11 = vweird.f32 %v4835_v22 }
 0x4ee   :  { %v4938_v31 = vor.u32 1.1754944e-38, %v4937_v24  ;;  %vm4936_vm13 = vcmp.eq.f32.partialorder %v4935_v25, 8.507059e+37 }
 0x4f2   :  { %v7982_v23 = vpop.eup %7981 }
 0x4f3   :  { %v4927_v5 = vmul.f32 %v7982_v23, %v4835_v22  ;;  %vm4932_vm10 = vweird.f32 %v7982_v23 }
 0x4f4   :  { %vm4933_vm12 = vmor %vm4931_vm11, %vm4932_vm10 }
 0x4f5   :  { %v4928_v6 = vsub.f32 1.0, %v4927_v5 }
 0x4f7   :  { %v4929_v4 = vmul.f32 %v7982_v23, %v4928_v6 }
 0x4f9   :  { %v4930_v27 = vadd.f32 %v7982_v23, %v4929_v4 }
 0x4fb   :  { %v4934_v33 = vsel %vm4933_vm12, %v7982_v23, %v4930_v27 }
 0x4fc   :  { %v4939_v3 = vsel %vm4936_vm13, %v4938_v31, %v4934_v33 }
 0x4fd   :  { %4947 = vst.msk [vmem:[%s11874_s14 + $0x30] sm:$0xff] %vm1251_vm0, %v4939_v3 }

</bundles_post_ra>
